<compile_context>
chip_gen: v6e
topology: v6e:2x2x1
jax: 0.10.0
libtpu: 0.0.40
codegen_flags: <defaults>
</compile_context>

<pallas_src>
import numpy as np

import jax
import jax.numpy as jnp
from jax import lax
from jax.experimental import pallas as pl
from jax.experimental.pallas import tpu as pltpu


# --------------------------------------------------------------------------------------
# Fused forward kernel (one batch tile of `block_b` samples per grid step).
# --------------------------------------------------------------------------------------
def _make_kernel(block_b):
    R0 = block_b * 32   # input rows per tile   (28 valid + 4 zero-pad rows per sample)
    R1 = block_b * 16   # rows after pool1      (13 valid + 3 junk rows per sample)
    R2 = block_b * 8    # rows after pool2      (4 valid + 4 junk rows per sample)

    def kernel(x_ref,
               t1_ref, b1_ref, t2_ref, b2_ref,
               wf1_ref, bf1_ref, wf2_ref, bf2_ref, wo_ref, bo_ref,
               o_ref,
               c1s, h1s, c2s, h2s):
        f32, bf16 = jnp.float32, jnp.bfloat16

        def mm(a, b):
            return jnp.dot(a.astype(bf16), b, preferred_element_type=f32)

        # ---- conv1 (1->8, k=3): 3 batched band-matmuls, M = R0 ------------------------
        # t1[kh] emits even output columns in lanes [0,128) and odd ones in [128,256).
        c1 = mm(x_ref[0, pl.ds(0, R0), :], t1_ref[0])
        c1 = c1 + mm(x_ref[0, pl.ds(1, R0), :], t1_ref[1])
        c1 = c1 + mm(x_ref[0, pl.ds(2, R0), :], t1_ref[2])
        # column half of 2x2 max-pool: single VPU max of the two lane groups.
        c1s[...] = jnp.maximum(c1[:, 0:128], c1[:, 128:256])          # (R0, 128)

        # row half of pool1 (stride-2 sublane reads) + bias + ReLU  ->  (R1, 128)
        h1 = jnp.maximum(c1s[pl.ds(0, R1, 2), :], c1s[pl.ds(1, R1, 2), :])
        h1s[pl.ds(0, R1), :] = jnp.maximum(h1 + b1_ref[...], 0.0)
        h1s[pl.ds(R1, 8), :] = jnp.zeros((8, 128), f32)   # slack rows read by conv2 windows

        # ---- conv2 (8->16, k=5): 5 batched band-matmuls, M = R1 -----------------------
        c2 = mm(h1s[pl.ds(0, R1), :], t2_ref[0])
        for kh in range(1, 5):
            c2 = c2 + mm(h1s[pl.ds(kh, R1), :], t2_ref[kh])
        c2s[...] = jnp.maximum(c2[:, 0:128], c2[:, 128:256])          # (R1, 128)

        # row half of pool2 + bias + ReLU  ->  (R2, 128), 4 valid rows / sample
        h2 = jnp.maximum(c2s[pl.ds(0, R2, 2), :], c2s[pl.ds(1, R2, 2), :])
        h2s[...] = jnp.maximum(h2 + b2_ref[...], 0.0)

        # ---- fc1 (256->128): 4 batched matmuls over the 4 valid rows per sample -------
        a1 = mm(h2s[pl.ds(0, block_b, 8), :], wf1_ref[0])
        for h in range(1, 4):
            a1 = a1 + mm(h2s[pl.ds(h, block_b, 8), :], wf1_ref[h])
        a1 = jnp.maximum(a1 + bf1_ref[...], 0.0)                      # (block_b, 128)

        # ---- fc2 -> output head -> log_softmax (whole tile) ---------------------------
        a2 = jnp.maximum(mm(a1, wf2_ref[...]) + bf2_ref[...], 0.0)    # (block_b, 64)
        logits = mm(a2, wo_ref[...]) + bo_ref[...]                    # (block_b, 10)
        mx = jnp.max(logits, axis=-1, keepdims=True)
        lse = mx + jnp.log(jnp.sum(jnp.exp(logits - mx), axis=-1, keepdims=True))
        o_ref[...] = logits - lse

    return kernel


# --------------------------------------------------------------------------------------
# Parameter preparation: PyTorch-layout weights -> banded, pool-split, bf16 operands.
# --------------------------------------------------------------------------------------
def _band_matrices(weight, w_in):
    """weight: (Cout, Cin, K, K) torch conv layout -> T (K, w_in*Cin, w_out*Cout) with
    T[kh, j*Cin+ci, b*Cout+co] = weight[co, ci, kh, j-b] (0 <= j-b < K), so that
    conv_out[i, b*Cout+co] = sum_kh (x_rows[i+kh] @ T[kh])[b*Cout+co]."""
    cout, cin, k, _ = weight.shape
    w_out = w_in - k + 1
    d = np.zeros((k, w_in, w_out), np.float32)           # d[kw, j, b] = (j == b + kw)
    for kw in range(k):
        d[kw, kw:kw + w_out, :] = np.eye(w_out, dtype=np.float32)
    t = jnp.einsum("wjb,ochw->hjcbo", jnp.asarray(d), weight.astype(jnp.float32))
    return t.reshape(k, w_in * cin, w_out * cout)


def _split_pool_cols(t, cout):
    """Re-order a banded weight's output columns so even conv columns land in lanes
    [0,128) and odd conv columns in lanes [128,256); max(y[:,:128], y[:,128:]) then
    implements the column half of the 2x2 max-pool (channel-minor layout preserved)."""
    k, rows, n = t.shape
    w_out = n // cout
    t4 = t.reshape(k, rows, w_out, cout)
    even = t4[:, :, 0::2, :].reshape(k, rows, -1)
    odd = t4[:, :, 1::2, :].reshape(k, rows, -1)
    even = jnp.pad(even, ((0, 0), (0, 0), (0, 128 - even.shape[-1])))
    odd = jnp.pad(odd, ((0, 0), (0, 0), (0, 128 - odd.shape[-1])))
    return jnp.concatenate([even, odd], axis=-1)         # (k, rows, 256)


def init_torch_params(key):
    """Parameters in PyTorch-native shapes (as nn.Module state_dict would hold them)."""
    ks = jax.random.split(key, 10)

    def u(k, shape, fan_in):
        bound = 1.0 / np.sqrt(fan_in)
        return jax.random.uniform(k, shape, jnp.float32, -bound, bound)

    return {
        "conv1_w": u(ks[0], (8, 1, 3, 3), 9),
        "conv1_b": u(ks[1], (8,), 9),
        "conv2_w": u(ks[2], (16, 8, 5, 5), 200),
        "conv2_b": u(ks[3], (16,), 200),
        "fc1_w": u(ks[4], (128, 256), 256),
        "fc1_b": u(ks[5], (128,), 256),
        "fc2_w": u(ks[6], (64, 128), 128),
        "fc2_b": u(ks[7], (64,), 128),
        "out_w": u(ks[8], (10, 64), 64),
        "out_b": u(ks[9], (10,), 64),
    }


def prepare_params(tp):
    bf16 = jnp.bfloat16

    t1 = _split_pool_cols(_band_matrices(tp["conv1_w"], 28), 8)       # (3, 28, 256)
    t2 = _split_pool_cols(_band_matrices(tp["conv2_w"], 13), 16)      # (5, 104, 256)
    t2 = jnp.pad(t2, ((0, 0), (0, 24), (0, 0)))                       # rows 104..127 = 0

    # fc1: fold PyTorch (C,H,W) flatten order into the weight: wf1[h, w*16+c, m].
    wf1 = tp["fc1_w"].reshape(128, 16, 4, 4)                          # (m, c, h, w)
    wf1 = jnp.transpose(wf1, (2, 3, 1, 0)).reshape(4, 64, 128)
    wf1 = jnp.pad(wf1, ((0, 0), (0, 64), (0, 0)))                     # zero rows for junk lanes

    return {
        "t1": t1.astype(bf16),
        "b1": jnp.pad(jnp.tile(tp["conv1_b"], 13), (0, 24)).reshape(1, 128),
        "t2": t2.astype(bf16),
        "b2": jnp.pad(jnp.tile(tp["conv2_b"], 4), (0, 64)).reshape(1, 128),
        "wf1": wf1.astype(bf16),
        "bf1": tp["fc1_b"].reshape(1, 128),
        "wf2": tp["fc2_w"].T.astype(bf16),                            # (128, 64)
        "bf2": tp["fc2_b"].reshape(1, 64),
        "wo": tp["out_w"].T.astype(bf16),                             # (64, 10)
        "bo": tp["out_b"].reshape(1, 10),
    }


# --------------------------------------------------------------------------------------
# Wrapper: one fused pallas_call over batch tiles.
# --------------------------------------------------------------------------------------
def forward(params, x, *, block_b=64):
    B = x.shape[0]
    bb = max(8, -(-min(block_b, B) // 8) * 8)            # clamp to batch, multiple of 8
    grid = -(-B // bb)
    bp = grid * bb

    xf = x.astype(jnp.float32)
    if bp != B:
        xf = jnp.pad(xf, ((0, bp - B), (0, 0), (0, 0)))
    xf = jnp.pad(xf, ((0, 0), (0, 4), (0, 0)))           # 28 -> 32 rows per sample
    xt = xf.reshape(grid, bb * 32, 28)
    xt = jnp.pad(xt, ((0, 0), (0, 8), (0, 0)))           # slack rows for shifted windows

    weight_args = (
        params["t1"], params["b1"], params["t2"], params["b2"],
        params["wf1"], params["bf1"], params["wf2"], params["bf2"],
        params["wo"], params["bo"],
    )

    def full_spec(a):
        return pl.BlockSpec(a.shape, lambda i, _nd=a.ndim: (0,) * _nd)

    out = pl.pallas_call(
        _make_kernel(bb),
        out_shape=jax.ShapeDtypeStruct((bp, 10), jnp.float32),
        grid=(grid,),
        in_specs=[pl.BlockSpec((1, bb * 32 + 8, 28), lambda i: (i, 0, 0))]
                 + [full_spec(a) for a in weight_args],
        out_specs=pl.BlockSpec((bb, 10), lambda i: (i, 0)),
        scratch_shapes=[
            pltpu.VMEM((bb * 32, 128), jnp.float32),      # conv1 slab (post column-pool)
            pltpu.VMEM((bb * 16 + 8, 128), jnp.float32),  # h1 (+ zeroed slack rows)
            pltpu.VMEM((bb * 16, 128), jnp.float32),      # conv2 slab (post column-pool)
            pltpu.VMEM((bb * 8, 128), jnp.float32),       # h2
        ],
        compiler_params=pltpu.CompilerParams(dimension_semantics=("parallel",)),
    )(xt, *weight_args)

    return out[:B]


# --------------------------------------------------------------------------------------
# Pure-JAX reference of the PyTorch module (validation only).
# --------------------------------------------------------------------------------------
def _maxpool_ref(y):  # y: (B, C, H, W), 2x2 / stride 2, floor
    b, c, h, w = y.shape
    h2, w2 = h // 2, w // 2
    y = y[:, :, :2 * h2, :2 * w2]
    return jnp.max(y.reshape(b, c, h2, 2, w2, 2), axis=(3, 5))


def reference_forward(tp, x):
    dn = ("NCHW", "OIHW", "NCHW")
    y = x.astype(jnp.float32)[:, None, :, :]
    y = lax.conv_general_dilated(y, tp["conv1_w"], (1, 1), "VALID", dimension_numbers=dn)
    y = jax.nn.relu(y + tp["conv1_b"][None, :, None, None])
    y = _maxpool_ref(y)
    y = lax.conv_general_dilated(y, tp["conv2_w"], (1, 1), "VALID", dimension_numbers=dn)
    y = jax.nn.relu(y + tp["conv2_b"][None, :, None, None])
    y = _maxpool_ref(y)
    y = y.reshape(y.shape[0], -1)
    y = jax.nn.relu(y @ tp["fc1_w"].T + tp["fc1_b"])
    y = jax.nn.relu(y @ tp["fc2_w"].T + tp["fc2_b"])
    y = y @ tp["out_w"].T + tp["out_b"]
    return jax.nn.log_softmax(y, axis=-1)


if __name__ == "__main__":
    key = jax.random.PRNGKey(0)
    pkey, xkey = jax.random.split(key)
    torch_params = init_torch_params(pkey)
    params = prepare_params(torch_params)

    x = jax.random.normal(xkey, (16, 28, 28), jnp.float32)

    # block_b=8, B=16 -> 2 grid steps (also the right shape for v7x's two TensorCores).
    fwd = jax.jit(lambda p, xx: forward(p, xx, block_b=8))
    out = jax.block_until_ready(fwd(params, x))

    assert out.shape == (16, 10)
    assert bool(jnp.all(jnp.isfinite(out)))
    # log_softmax rows must exp-sum to ~1
    assert bool(jnp.allclose(jnp.sum(jnp.exp(out), axis=1), 1.0, atol=1e-3))

    ref = jax.block_until_ready(jax.jit(reference_forward)(torch_params, x))
    err = float(jnp.max(jnp.abs(out - ref)))
    # bf16 matmul operands (per perf review) -> validate at a bf16-appropriate tolerance.
    assert err < 5e-2, f"mismatch vs pure-JAX reference: max abs err = {err}"

    print("KERNEL_OK")
</pallas_src>

<mosaic_0001>
module attributes {stable_mosaic.version = 11 : i64} {
  func.func @kernel(%arg0: i32, %arg1: memref<1x264x28xf32, #tpu.memory_space<vmem>>, %arg2: memref<3x28x256xbf16, #tpu.memory_space<vmem>>, %arg3: memref<1x128xf32, #tpu.memory_space<vmem>>, %arg4: memref<5x128x256xbf16, #tpu.memory_space<vmem>>, %arg5: memref<1x128xf32, #tpu.memory_space<vmem>>, %arg6: memref<4x128x128xbf16, #tpu.memory_space<vmem>>, %arg7: memref<1x128xf32, #tpu.memory_space<vmem>>, %arg8: memref<128x64xbf16, #tpu.memory_space<vmem>>, %arg9: memref<1x64xf32, #tpu.memory_space<vmem>>, %arg10: memref<64x10xbf16, #tpu.memory_space<vmem>>, %arg11: memref<1x10xf32, #tpu.memory_space<vmem>>, %arg12: memref<8x10xf32, #tpu.memory_space<vmem>>, %arg13: memref<256x128xf32, #tpu.memory_space<vmem>>, %arg14: memref<136x128xf32, #tpu.memory_space<vmem>>, %arg15: memref<128x128xf32, #tpu.memory_space<vmem>>, %arg16: memref<64x128xf32, #tpu.memory_space<vmem>>) attributes {dimension_semantics = [#tpu.dimension_semantics<parallel>], iteration_bounds = array<i64: 2>, scalar_prefetch = 0 : i64, scratch_operands = 4 : i64, tpu.core_type = #tpu.core_type<tc>, window_params = [{transform_indices = @transform_0, window_bounds = array<i64: 1, 264, 28>}, {pipeline_mode = #tpu.pipeline_mode<synchronous>, transform_indices = @transform_1, window_bounds = array<i64: 3, 28, 256>}, {pipeline_mode = #tpu.pipeline_mode<synchronous>, transform_indices = @transform_2, window_bounds = array<i64: 1, 128>}, {pipeline_mode = #tpu.pipeline_mode<synchronous>, transform_indices = @transform_3, window_bounds = array<i64: 5, 128, 256>}, {pipeline_mode = #tpu.pipeline_mode<synchronous>, transform_indices = @transform_4, window_bounds = array<i64: 1, 128>}, {pipeline_mode = #tpu.pipeline_mode<synchronous>, transform_indices = @transform_5, window_bounds = array<i64: 4, 128, 128>}, {pipeline_mode = #tpu.pipeline_mode<synchronous>, transform_indices = @transform_6, window_bounds = array<i64: 1, 128>}, {pipeline_mode = #tpu.pipeline_mode<synchronous>, transform_indices = @transform_7, window_bounds = array<i64: 128, 64>}, {pipeline_mode = #tpu.pipeline_mode<synchronous>, transform_indices = @transform_8, window_bounds = array<i64: 1, 64>}, {pipeline_mode = #tpu.pipeline_mode<synchronous>, transform_indices = @transform_9, window_bounds = array<i64: 64, 10>}, {pipeline_mode = #tpu.pipeline_mode<synchronous>, transform_indices = @transform_10, window_bounds = array<i64: 1, 10>}, {transform_indices = @transform_11, window_bounds = array<i64: 8, 10>}]} {
    %c0 = arith.constant 0 : index
    %c0_0 = arith.constant 0 : index
    %c0_1 = arith.constant 0 : index
    %0 = vector.load %arg1[%c0, %c0_0, %c0_1] : memref<1x264x28xf32, #tpu.memory_space<vmem>>, vector<1x256x28xf32>
    %1 = vector.shape_cast %0 : vector<1x256x28xf32> to vector<256x28xf32>
    %c0_2 = arith.constant 0 : index
    %c0_3 = arith.constant 0 : index
    %c0_4 = arith.constant 0 : index
    %2 = vector.load %arg2[%c0_2, %c0_3, %c0_4] : memref<3x28x256xbf16, #tpu.memory_space<vmem>>, vector<1x28x256xbf16>
    %3 = vector.shape_cast %2 : vector<1x28x256xbf16> to vector<28x256xbf16>
    %4 = arith.truncf %1 : vector<256x28xf32> to vector<256x28xbf16>
    %cst = arith.constant dense<0.000000e+00> : vector<256x256xf32>
    %5 = tpu.matmul %4, %3, %cst {dimension_numbers = #tpu.dot_dimension_numbers<[1], [0], [0], [1], [0, 0, 1, 1], [], []>} : vector<256x28xbf16>, vector<28x256xbf16>, vector<256x256xf32> -> vector<256x256xf32>
    %c0_5 = arith.constant 0 : index
    %c1 = arith.constant 1 : index
    %c0_6 = arith.constant 0 : index
    %6 = vector.load %arg1[%c0_5, %c1, %c0_6] : memref<1x264x28xf32, #tpu.memory_space<vmem>>, vector<1x256x28xf32>
    %7 = vector.shape_cast %6 : vector<1x256x28xf32> to vector<256x28xf32>
    %c1_7 = arith.constant 1 : index
    %c0_8 = arith.constant 0 : index
    %c0_9 = arith.constant 0 : index
    %8 = vector.load %arg2[%c1_7, %c0_8, %c0_9] : memref<3x28x256xbf16, #tpu.memory_space<vmem>>, vector<1x28x256xbf16>
    %9 = vector.shape_cast %8 : vector<1x28x256xbf16> to vector<28x256xbf16>
    %10 = arith.truncf %7 : vector<256x28xf32> to vector<256x28xbf16>
    %cst_10 = arith.constant dense<0.000000e+00> : vector<256x256xf32>
    %11 = tpu.matmul %10, %9, %cst_10 {dimension_numbers = #tpu.dot_dimension_numbers<[1], [0], [0], [1], [0, 0, 1, 1], [], []>} : vector<256x28xbf16>, vector<28x256xbf16>, vector<256x256xf32> -> vector<256x256xf32>
    %12 = arith.addf %5, %11 : vector<256x256xf32>
    %c0_11 = arith.constant 0 : index
    %c2 = arith.constant 2 : index
    %c0_12 = arith.constant 0 : index
    %13 = vector.load %arg1[%c0_11, %c2, %c0_12] : memref<1x264x28xf32, #tpu.memory_space<vmem>>, vector<1x256x28xf32>
    %14 = vector.shape_cast %13 : vector<1x256x28xf32> to vector<256x28xf32>
    %c2_13 = arith.constant 2 : index
    %c0_14 = arith.constant 0 : index
    %c0_15 = arith.constant 0 : index
    %15 = vector.load %arg2[%c2_13, %c0_14, %c0_15] : memref<3x28x256xbf16, #tpu.memory_space<vmem>>, vector<1x28x256xbf16>
    %16 = vector.shape_cast %15 : vector<1x28x256xbf16> to vector<28x256xbf16>
    %17 = arith.truncf %14 : vector<256x28xf32> to vector<256x28xbf16>
    %cst_16 = arith.constant dense<0.000000e+00> : vector<256x256xf32>
    %18 = tpu.matmul %17, %16, %cst_16 {dimension_numbers = #tpu.dot_dimension_numbers<[1], [0], [0], [1], [0, 0, 1, 1], [], []>} : vector<256x28xbf16>, vector<28x256xbf16>, vector<256x256xf32> -> vector<256x256xf32>
    %19 = arith.addf %12, %18 : vector<256x256xf32>
    %20 = vector.extract_strided_slice %19 {offsets = [0, 0], sizes = [256, 128], strides = [1, 1]} : vector<256x256xf32> to vector<256x128xf32>
    %21 = vector.extract_strided_slice %19 {offsets = [0, 128], sizes = [256, 128], strides = [1, 1]} : vector<256x256xf32> to vector<256x128xf32>
    %22 = arith.maximumf %20, %21 : vector<256x128xf32>
    %c0_17 = arith.constant 0 : index
    %c0_18 = arith.constant 0 : index
    %23 = vector.load %arg13[%c0_17, %c0_18] : memref<256x128xf32, #tpu.memory_space<vmem>>, vector<256x128xf32>
    tpu.vector_store %arg13[%c0_17, %c0_18], %22 {strides = array<i32>} : memref<256x128xf32, #tpu.memory_space<vmem>>, vector<256x128xf32>,
    %c0_19 = arith.constant 0 : index
    %c0_20 = arith.constant 0 : index
    %24 = tpu.strided_load %arg13[%c0_19, %c0_20] {strides = array<i32: 2, 1>} : memref<256x128xf32, #tpu.memory_space<vmem>>, vector<128x128xf32>
    %c1_21 = arith.constant 1 : index
    %c0_22 = arith.constant 0 : index
    %25 = tpu.strided_load %arg13[%c1_21, %c0_22] {strides = array<i32: 2, 1>} : memref<256x128xf32, #tpu.memory_space<vmem>>, vector<128x128xf32>
    %26 = arith.maximumf %24, %25 : vector<128x128xf32>
    %c0_23 = arith.constant 0 : index
    %c0_24 = arith.constant 0 : index
    %27 = vector.load %arg3[%c0_23, %c0_24] : memref<1x128xf32, #tpu.memory_space<vmem>>, vector<1x128xf32>
    %28 = vector.broadcast %27 : vector<1x128xf32> to vector<128x128xf32>
    %29 = arith.addf %26, %28 : vector<128x128xf32>
    %cst_25 = arith.constant 0.000000e+00 : f32
    %30 = vector.broadcast %cst_25 : f32 to vector<128x128xf32>
    %31 = arith.maximumf %29, %30 : vector<128x128xf32>
    %c0_26 = arith.constant 0 : index
    %c0_27 = arith.constant 0 : index
    %32 = vector.load %arg14[%c0_26, %c0_27] : memref<136x128xf32, #tpu.memory_space<vmem>>, vector<128x128xf32>
    tpu.vector_store %arg14[%c0_26, %c0_27], %31 {strides = array<i32>} : memref<136x128xf32, #tpu.memory_space<vmem>>, vector<128x128xf32>,
    %cst_28 = arith.constant 0.000000e+00 : f32
    %33 = vector.broadcast %cst_28 : f32 to vector<8x128xf32>
    %c128 = arith.constant 128 : index
    %c0_29 = arith.constant 0 : index
    %34 = vector.load %arg14[%c128, %c0_29] : memref<136x128xf32, #tpu.memory_space<vmem>>, vector<8x128xf32>
    tpu.vector_store %arg14[%c128, %c0_29], %33 {strides = array<i32>} : memref<136x128xf32, #tpu.memory_space<vmem>>, vector<8x128xf32>,
    %c0_30 = arith.constant 0 : index
    %c0_31 = arith.constant 0 : index
    %35 = vector.load %arg14[%c0_30, %c0_31] : memref<136x128xf32, #tpu.memory_space<vmem>>, vector<128x128xf32>
    %c0_32 = arith.constant 0 : index
    %c0_33 = arith.constant 0 : index
    %c0_34 = arith.constant 0 : index
    %36 = vector.load %arg4[%c0_32, %c0_33, %c0_34] : memref<5x128x256xbf16, #tpu.memory_space<vmem>>, vector<1x128x256xbf16>
    %37 = vector.shape_cast %36 : vector<1x128x256xbf16> to vector<128x256xbf16>
    %38 = arith.truncf %35 : vector<128x128xf32> to vector<128x128xbf16>
    %cst_35 = arith.constant dense<0.000000e+00> : vector<128x256xf32>
    %39 = tpu.matmul %38, %37, %cst_35 {dimension_numbers = #tpu.dot_dimension_numbers<[1], [0], [0], [1], [0, 0, 1, 1], [], []>} : vector<128x128xbf16>, vector<128x256xbf16>, vector<128x256xf32> -> vector<128x256xf32>
    %c1_36 = arith.constant 1 : index
    %c0_37 = arith.constant 0 : index
    %40 = vector.load %arg14[%c1_36, %c0_37] : memref<136x128xf32, #tpu.memory_space<vmem>>, vector<128x128xf32>
    %c1_38 = arith.constant 1 : index
    %c0_39 = arith.constant 0 : index
    %c0_40 = arith.constant 0 : index
    %41 = vector.load %arg4[%c1_38, %c0_39, %c0_40] : memref<5x128x256xbf16, #tpu.memory_space<vmem>>, vector<1x128x256xbf16>
    %42 = vector.shape_cast %41 : vector<1x128x256xbf16> to vector<128x256xbf16>
    %43 = arith.truncf %40 : vector<128x128xf32> to vector<128x128xbf16>
    %cst_41 = arith.constant dense<0.000000e+00> : vector<128x256xf32>
    %44 = tpu.matmul %43, %42, %cst_41 {dimension_numbers = #tpu.dot_dimension_numbers<[1], [0], [0], [1], [0, 0, 1, 1], [], []>} : vector<128x128xbf16>, vector<128x256xbf16>, vector<128x256xf32> -> vector<128x256xf32>
    %45 = arith.addf %39, %44 : vector<128x256xf32>
    %c2_42 = arith.constant 2 : index
    %c0_43 = arith.constant 0 : index
    %46 = vector.load %arg14[%c2_42, %c0_43] : memref<136x128xf32, #tpu.memory_space<vmem>>, vector<128x128xf32>
    %c2_44 = arith.constant 2 : index
    %c0_45 = arith.constant 0 : index
    %c0_46 = arith.constant 0 : index
    %47 = vector.load %arg4[%c2_44, %c0_45, %c0_46] : memref<5x128x256xbf16, #tpu.memory_space<vmem>>, vector<1x128x256xbf16>
    %48 = vector.shape_cast %47 : vector<1x128x256xbf16> to vector<128x256xbf16>
    %49 = arith.truncf %46 : vector<128x128xf32> to vector<128x128xbf16>
    %cst_47 = arith.constant dense<0.000000e+00> : vector<128x256xf32>
    %50 = tpu.matmul %49, %48, %cst_47 {dimension_numbers = #tpu.dot_dimension_numbers<[1], [0], [0], [1], [0, 0, 1, 1], [], []>} : vector<128x128xbf16>, vector<128x256xbf16>, vector<128x256xf32> -> vector<128x256xf32>
    %51 = arith.addf %45, %50 : vector<128x256xf32>
    %c3 = arith.constant 3 : index
    %c0_48 = arith.constant 0 : index
    %52 = vector.load %arg14[%c3, %c0_48] : memref<136x128xf32, #tpu.memory_space<vmem>>, vector<128x128xf32>
    %c3_49 = arith.constant 3 : index
    %c0_50 = arith.constant 0 : index
    %c0_51 = arith.constant 0 : index
    %53 = vector.load %arg4[%c3_49, %c0_50, %c0_51] : memref<5x128x256xbf16, #tpu.memory_space<vmem>>, vector<1x128x256xbf16>
    %54 = vector.shape_cast %53 : vector<1x128x256xbf16> to vector<128x256xbf16>
    %55 = arith.truncf %52 : vector<128x128xf32> to vector<128x128xbf16>
    %cst_52 = arith.constant dense<0.000000e+00> : vector<128x256xf32>
    %56 = tpu.matmul %55, %54, %cst_52 {dimension_numbers = #tpu.dot_dimension_numbers<[1], [0], [0], [1], [0, 0, 1, 1], [], []>} : vector<128x128xbf16>, vector<128x256xbf16>, vector<128x256xf32> -> vector<128x256xf32>
    %57 = arith.addf %51, %56 : vector<128x256xf32>
    %c4 = arith.constant 4 : index
    %c0_53 = arith.constant 0 : index
    %58 = vector.load %arg14[%c4, %c0_53] : memref<136x128xf32, #tpu.memory_space<vmem>>, vector<128x128xf32>
    %c4_54 = arith.constant 4 : index
    %c0_55 = arith.constant 0 : index
    %c0_56 = arith.constant 0 : index
    %59 = vector.load %arg4[%c4_54, %c0_55, %c0_56] : memref<5x128x256xbf16, #tpu.memory_space<vmem>>, vector<1x128x256xbf16>
    %60 = vector.shape_cast %59 : vector<1x128x256xbf16> to vector<128x256xbf16>
    %61 = arith.truncf %58 : vector<128x128xf32> to vector<128x128xbf16>
    %cst_57 = arith.constant dense<0.000000e+00> : vector<128x256xf32>
    %62 = tpu.matmul %61, %60, %cst_57 {dimension_numbers = #tpu.dot_dimension_numbers<[1], [0], [0], [1], [0, 0, 1, 1], [], []>} : vector<128x128xbf16>, vector<128x256xbf16>, vector<128x256xf32> -> vector<128x256xf32>
    %63 = arith.addf %57, %62 : vector<128x256xf32>
    %64 = vector.extract_strided_slice %63 {offsets = [0, 0], sizes = [128, 128], strides = [1, 1]} : vector<128x256xf32> to vector<128x128xf32>
    %65 = vector.extract_strided_slice %63 {offsets = [0, 128], sizes = [128, 128], strides = [1, 1]} : vector<128x256xf32> to vector<128x128xf32>
    %66 = arith.maximumf %64, %65 : vector<128x128xf32>
    %c0_58 = arith.constant 0 : index
    %c0_59 = arith.constant 0 : index
    %67 = vector.load %arg15[%c0_58, %c0_59] : memref<128x128xf32, #tpu.memory_space<vmem>>, vector<128x128xf32>
    tpu.vector_store %arg15[%c0_58, %c0_59], %66 {strides = array<i32>} : memref<128x128xf32, #tpu.memory_space<vmem>>, vector<128x128xf32>,
    %c0_60 = arith.constant 0 : index
    %c0_61 = arith.constant 0 : index
    %68 = tpu.strided_load %arg15[%c0_60, %c0_61] {strides = array<i32: 2, 1>} : memref<128x128xf32, #tpu.memory_space<vmem>>, vector<64x128xf32>
    %c1_62 = arith.constant 1 : index
    %c0_63 = arith.constant 0 : index
    %69 = tpu.strided_load %arg15[%c1_62, %c0_63] {strides = array<i32: 2, 1>} : memref<128x128xf32, #tpu.memory_space<vmem>>, vector<64x128xf32>
    %70 = arith.maximumf %68, %69 : vector<64x128xf32>
    %c0_64 = arith.constant 0 : index
    %c0_65 = arith.constant 0 : index
    %71 = vector.load %arg5[%c0_64, %c0_65] : memref<1x128xf32, #tpu.memory_space<vmem>>, vector<1x128xf32>
    %72 = vector.broadcast %71 : vector<1x128xf32> to vector<64x128xf32>
    %73 = arith.addf %70, %72 : vector<64x128xf32>
    %cst_66 = arith.constant 0.000000e+00 : f32
    %74 = vector.broadcast %cst_66 : f32 to vector<64x128xf32>
    %75 = arith.maximumf %73, %74 : vector<64x128xf32>
    %c0_67 = arith.constant 0 : index
    %c0_68 = arith.constant 0 : index
    %76 = vector.load %arg16[%c0_67, %c0_68] : memref<64x128xf32, #tpu.memory_space<vmem>>, vector<64x128xf32>
    tpu.vector_store %arg16[%c0_67, %c0_68], %75 {strides = array<i32>} : memref<64x128xf32, #tpu.memory_space<vmem>>, vector<64x128xf32>,
    %c0_69 = arith.constant 0 : index
    %c0_70 = arith.constant 0 : index
    %77 = tpu.strided_load %arg16[%c0_69, %c0_70] {strides = array<i32: 8, 1>} : memref<64x128xf32, #tpu.memory_space<vmem>>, vector<8x128xf32>
    %c0_71 = arith.constant 0 : index
    %c0_72 = arith.constant 0 : index
    %c0_73 = arith.constant 0 : index
    %78 = vector.load %arg6[%c0_71, %c0_72, %c0_73] : memref<4x128x128xbf16, #tpu.memory_space<vmem>>, vector<1x128x128xbf16>
    %79 = vector.shape_cast %78 : vector<1x128x128xbf16> to vector<128x128xbf16>
    %80 = arith.truncf %77 : vector<8x128xf32> to vector<8x128xbf16>
    %cst_74 = arith.constant dense<0.000000e+00> : vector<8x128xf32>
    %81 = tpu.matmul %80, %79, %cst_74 {dimension_numbers = #tpu.dot_dimension_numbers<[1], [0], [0], [1], [0, 0, 1, 1], [], []>} : vector<8x128xbf16>, vector<128x128xbf16>, vector<8x128xf32> -> vector<8x128xf32>
    %c1_75 = arith.constant 1 : index
    %c0_76 = arith.constant 0 : index
    %82 = tpu.strided_load %arg16[%c1_75, %c0_76] {strides = array<i32: 8, 1>} : memref<64x128xf32, #tpu.memory_space<vmem>>, vector<8x128xf32>
    %c1_77 = arith.constant 1 : index
    %c0_78 = arith.constant 0 : index
    %c0_79 = arith.constant 0 : index
    %83 = vector.load %arg6[%c1_77, %c0_78, %c0_79] : memref<4x128x128xbf16, #tpu.memory_space<vmem>>, vector<1x128x128xbf16>
    %84 = vector.shape_cast %83 : vector<1x128x128xbf16> to vector<128x128xbf16>
    %85 = arith.truncf %82 : vector<8x128xf32> to vector<8x128xbf16>
    %cst_80 = arith.constant dense<0.000000e+00> : vector<8x128xf32>
    %86 = tpu.matmul %85, %84, %cst_80 {dimension_numbers = #tpu.dot_dimension_numbers<[1], [0], [0], [1], [0, 0, 1, 1], [], []>} : vector<8x128xbf16>, vector<128x128xbf16>, vector<8x128xf32> -> vector<8x128xf32>
    %87 = arith.addf %81, %86 : vector<8x128xf32>
    %c2_81 = arith.constant 2 : index
    %c0_82 = arith.constant 0 : index
    %88 = tpu.strided_load %arg16[%c2_81, %c0_82] {strides = array<i32: 8, 1>} : memref<64x128xf32, #tpu.memory_space<vmem>>, vector<8x128xf32>
    %c2_83 = arith.constant 2 : index
    %c0_84 = arith.constant 0 : index
    %c0_85 = arith.constant 0 : index
    %89 = vector.load %arg6[%c2_83, %c0_84, %c0_85] : memref<4x128x128xbf16, #tpu.memory_space<vmem>>, vector<1x128x128xbf16>
    %90 = vector.shape_cast %89 : vector<1x128x128xbf16> to vector<128x128xbf16>
    %91 = arith.truncf %88 : vector<8x128xf32> to vector<8x128xbf16>
    %cst_86 = arith.constant dense<0.000000e+00> : vector<8x128xf32>
    %92 = tpu.matmul %91, %90, %cst_86 {dimension_numbers = #tpu.dot_dimension_numbers<[1], [0], [0], [1], [0, 0, 1, 1], [], []>} : vector<8x128xbf16>, vector<128x128xbf16>, vector<8x128xf32> -> vector<8x128xf32>
    %93 = arith.addf %87, %92 : vector<8x128xf32>
    %c3_87 = arith.constant 3 : index
    %c0_88 = arith.constant 0 : index
    %94 = tpu.strided_load %arg16[%c3_87, %c0_88] {strides = array<i32: 8, 1>} : memref<64x128xf32, #tpu.memory_space<vmem>>, vector<8x128xf32>
    %c3_89 = arith.constant 3 : index
    %c0_90 = arith.constant 0 : index
    %c0_91 = arith.constant 0 : index
    %95 = vector.load %arg6[%c3_89, %c0_90, %c0_91] : memref<4x128x128xbf16, #tpu.memory_space<vmem>>, vector<1x128x128xbf16>
    %96 = vector.shape_cast %95 : vector<1x128x128xbf16> to vector<128x128xbf16>
    %97 = arith.truncf %94 : vector<8x128xf32> to vector<8x128xbf16>
    %cst_92 = arith.constant dense<0.000000e+00> : vector<8x128xf32>
    %98 = tpu.matmul %97, %96, %cst_92 {dimension_numbers = #tpu.dot_dimension_numbers<[1], [0], [0], [1], [0, 0, 1, 1], [], []>} : vector<8x128xbf16>, vector<128x128xbf16>, vector<8x128xf32> -> vector<8x128xf32>
    %99 = arith.addf %93, %98 : vector<8x128xf32>
    %c0_93 = arith.constant 0 : index
    %c0_94 = arith.constant 0 : index
    %100 = vector.load %arg7[%c0_93, %c0_94] : memref<1x128xf32, #tpu.memory_space<vmem>>, vector<1x128xf32>
    %101 = vector.broadcast %100 : vector<1x128xf32> to vector<8x128xf32>
    %102 = arith.addf %99, %101 : vector<8x128xf32>
    %cst_95 = arith.constant 0.000000e+00 : f32
    %103 = vector.broadcast %cst_95 : f32 to vector<8x128xf32>
    %104 = arith.maximumf %102, %103 : vector<8x128xf32>
    %c0_96 = arith.constant 0 : index
    %c0_97 = arith.constant 0 : index
    %105 = vector.load %arg8[%c0_96, %c0_97] : memref<128x64xbf16, #tpu.memory_space<vmem>>, vector<128x64xbf16>
    %106 = arith.truncf %104 : vector<8x128xf32> to vector<8x128xbf16>
    %cst_98 = arith.constant dense<0.000000e+00> : vector<8x64xf32>
    %107 = tpu.matmul %106, %105, %cst_98 {dimension_numbers = #tpu.dot_dimension_numbers<[1], [0], [0], [1], [0, 0, 1, 1], [], []>} : vector<8x128xbf16>, vector<128x64xbf16>, vector<8x64xf32> -> vector<8x64xf32>
    %c0_99 = arith.constant 0 : index
    %c0_100 = arith.constant 0 : index
    %108 = vector.load %arg9[%c0_99, %c0_100] : memref<1x64xf32, #tpu.memory_space<vmem>>, vector<1x64xf32>
    %109 = vector.broadcast %108 : vector<1x64xf32> to vector<8x64xf32>
    %110 = arith.addf %107, %109 : vector<8x64xf32>
    %cst_101 = arith.constant 0.000000e+00 : f32
    %111 = vector.broadcast %cst_101 : f32 to vector<8x64xf32>
    %112 = arith.maximumf %110, %111 : vector<8x64xf32>
    %c0_102 = arith.constant 0 : index
    %c0_103 = arith.constant 0 : index
    %113 = vector.load %arg10[%c0_102, %c0_103] : memref<64x10xbf16, #tpu.memory_space<vmem>>, vector<64x10xbf16>
    %114 = arith.truncf %112 : vector<8x64xf32> to vector<8x64xbf16>
    %cst_104 = arith.constant dense<0.000000e+00> : vector<8x10xf32>
    %115 = tpu.matmul %114, %113, %cst_104 {dimension_numbers = #tpu.dot_dimension_numbers<[1], [0], [0], [1], [0, 0, 1, 1], [], []>} : vector<8x64xbf16>, vector<64x10xbf16>, vector<8x10xf32> -> vector<8x10xf32>
    %c0_105 = arith.constant 0 : index
    %c0_106 = arith.constant 0 : index
    %116 = vector.load %arg11[%c0_105, %c0_106] : memref<1x10xf32, #tpu.memory_space<vmem>>, vector<1x10xf32>
    %117 = vector.broadcast %116 : vector<1x10xf32> to vector<8x10xf32>
    %118 = arith.addf %115, %117 : vector<8x10xf32>
    %cst_107 = arith.constant dense<0xFF800000> : vector<8xf32>
    %119 = vector.multi_reduction <maximumf>, %118, %cst_107 [1] : vector<8x10xf32> to vector<8xf32>
    %120 = vector.shape_cast %119 : vector<8xf32> to vector<8x1xf32>
    %121 = vector.broadcast %120 : vector<8x1xf32> to vector<8x10xf32>
    %122 = arith.subf %118, %121 : vector<8x10xf32>
    %123 = math.exp %122 : vector<8x10xf32>
    %cst_108 = arith.constant dense<0.000000e+00> : vector<8xf32>
    %124 = vector.multi_reduction <add>, %123, %cst_108 [1] : vector<8x10xf32> to vector<8xf32>
    %125 = vector.shape_cast %124 : vector<8xf32> to vector<8x1xf32>
    %126 = math.log %125 : vector<8x1xf32>
    %127 = arith.addf %120, %126 : vector<8x1xf32>
    %128 = vector.broadcast %127 : vector<8x1xf32> to vector<8x10xf32>
    %129 = arith.subf %118, %128 : vector<8x10xf32>
    %c0_109 = arith.constant 0 : index
    %c0_110 = arith.constant 0 : index
    %130 = vector.load %arg12[%c0_109, %c0_110] : memref<8x10xf32, #tpu.memory_space<vmem>>, vector<8x10xf32>
    tpu.vector_store %arg12[%c0_109, %c0_110], %129 {strides = array<i32>} : memref<8x10xf32, #tpu.memory_space<vmem>>, vector<8x10xf32>,
    return
  }
  func.func @transform_0(%arg0: i32) -> (i32, i32, i32) {
    %c0_i32 = arith.constant 0 : i32
    %c0_i32_0 = arith.constant 0 : i32
    %c0_i32_1 = arith.constant 0 : i32
    return %arg0, %c0_i32, %c0_i32_0 : i32, i32, i32
  }
  func.func @transform_1(%arg0: i32) -> (i32, i32, i32) {
    %c0_i32 = arith.constant 0 : i32
    %c0_i32_0 = arith.constant 0 : i32
    %c0_i32_1 = arith.constant 0 : i32
    %c0_i32_2 = arith.constant 0 : i32
    return %c0_i32, %c0_i32_0, %c0_i32_1 : i32, i32, i32
  }
  func.func @transform_2(%arg0: i32) -> (i32, i32) {
    %c0_i32 = arith.constant 0 : i32
    %c0_i32_0 = arith.constant 0 : i32
    %c0_i32_1 = arith.constant 0 : i32
    return %c0_i32, %c0_i32_0 : i32, i32
  }
  func.func @transform_3(%arg0: i32) -> (i32, i32, i32) {
    %c0_i32 = arith.constant 0 : i32
    %c0_i32_0 = arith.constant 0 : i32
    %c0_i32_1 = arith.constant 0 : i32
    %c0_i32_2 = arith.constant 0 : i32
    return %c0_i32, %c0_i32_0, %c0_i32_1 : i32, i32, i32
  }
  func.func @transform_4(%arg0: i32) -> (i32, i32) {
    %c0_i32 = arith.constant 0 : i32
    %c0_i32_0 = arith.constant 0 : i32
    %c0_i32_1 = arith.constant 0 : i32
    return %c0_i32, %c0_i32_0 : i32, i32
  }
  func.func @transform_5(%arg0: i32) -> (i32, i32, i32) {
    %c0_i32 = arith.constant 0 : i32
    %c0_i32_0 = arith.constant 0 : i32
    %c0_i32_1 = arith.constant 0 : i32
    %c0_i32_2 = arith.constant 0 : i32
    return %c0_i32, %c0_i32_0, %c0_i32_1 : i32, i32, i32
  }
  func.func @transform_6(%arg0: i32) -> (i32, i32) {
    %c0_i32 = arith.constant 0 : i32
    %c0_i32_0 = arith.constant 0 : i32
    %c0_i32_1 = arith.constant 0 : i32
    return %c0_i32, %c0_i32_0 : i32, i32
  }
  func.func @transform_7(%arg0: i32) -> (i32, i32) {
    %c0_i32 = arith.constant 0 : i32
    %c0_i32_0 = arith.constant 0 : i32
    %c0_i32_1 = arith.constant 0 : i32
    return %c0_i32, %c0_i32_0 : i32, i32
  }
  func.func @transform_8(%arg0: i32) -> (i32, i32) {
    %c0_i32 = arith.constant 0 : i32
    %c0_i32_0 = arith.constant 0 : i32
    %c0_i32_1 = arith.constant 0 : i32
    return %c0_i32, %c0_i32_0 : i32, i32
  }
  func.func @transform_9(%arg0: i32) -> (i32, i32) {
    %c0_i32 = arith.constant 0 : i32
    %c0_i32_0 = arith.constant 0 : i32
    %c0_i32_1 = arith.constant 0 : i32
    return %c0_i32, %c0_i32_0 : i32, i32
  }
  func.func @transform_10(%arg0: i32) -> (i32, i32) {
    %c0_i32 = arith.constant 0 : i32
    %c0_i32_0 = arith.constant 0 : i32
    %c0_i32_1 = arith.constant 0 : i32
    return %c0_i32, %c0_i32_0 : i32, i32
  }
  func.func @transform_11(%arg0: i32) -> (i32, i32) {
    %c0_i32 = arith.constant 0 : i32
    %c0_i32_0 = arith.constant 0 : i32
    return %arg0, %c0_i32 : i32, i32
  }
}

</mosaic_0001>

<bundles_post_ra>
// kernel: _lambda_.1
= control target key start
LH: loop header
LB: loop body
LE: loop exit
PB: predicated region body
PF: predicated region fallthrough
CT: control target
= control target key end

     0   :  { %16 = vsyncpa [#allocation7], 0  ;;  %s6154_s0 = inlined_call_operand.vmem [shape: f32[2,264,28], index: 0, kind: input, shape index: {}]   ;;  %s6155_s1 = inlined_call_operand.vmem [shape: bf16[3,28,256], index: 1, kind: input, shape index: {}]   ;;  %s6156_s2 = inlined_call_operand.vmem [shape: f32[1,128], index: 2, kind: input, shape index: {}]   ;;  %s6157_s3 = inlined_call_operand.vmem [shape: bf16[5,128,256], index: 3, kind: input, shape index: {}]   ;;  %s6158_s4 = inlined_call_operand.vmem [shape: f32[1,128], index: 4, kind: input, shape index: {}]   ;;  %s6159_s5 = inlined_call_operand.vmem [shape: bf16[4,128,128], index: 5, kind: input, shape index: {}]   ;;  %s6160_s6 = inlined_call_operand.vmem [shape: f32[1,128], index: 6, kind: input, shape index: {}]   ;;  %s6161_s7 = inlined_call_operand.vmem [shape: bf16[128,64], index: 7, kind: input, shape index: {}]   ;;  %s6162_s8 = inlined_call_operand.vmem [shape: f32[1,64], index: 8, kind: input, shape index: {}]   ;;  %s6163_s9 = inlined_call_operand.vmem [shape: bf16[64,10], index: 9, kind: input, shape index: {}]   ;;  %s6164_s10 = inlined_call_operand.vmem [shape: f32[1,10], index: 10, kind: input, shape index: {}]   ;;  %s6165_s11 = inlined_call_operand.hbm [shape: f32[16,10], index: 11, kind: output, shape index: {}]  }
   0x1   :  { %18 = vsyncpa [#allocation7 + $0x1], 0  ;;  %s4551_s17 = smov 0   ;;  %s4553_s18 = smov 0  }
   0x2   :  { %s4555_s19 = smov 0   ;;  %s4557_s20 = smov 0  }
   0x3 LB: > { %6171 = sst [smem:[#allocation9_spill]] %s4481_s19  ;;  %s4572_s21 = sadd.s32 4294967295, %s4485_s20   ;;  %s4485_s20 = sphi %s4557_s20, %s6388_s20   ;;  %s4481_s19 = sphi %s4555_s19, %s6385_s19   ;;  %s4477_s18 = sphi %s4553_s18, %s6387_s18   ;;  %s4473_s17 = sphi %s4551_s17, %s6386_s17  }
   0x4   : > { %s3705_s22 = sadd.s32 4294967294, %s4485_s20   ;;  %s4576_s23 = sadd.s32 1, %s4485_s20  }
   0x5   : > { %s267_s24 = sadd.s32 1, %s4481_s19  ;;  %s264_s25 = ssub.s32 %s4485_s20, %s4576_s23 }
   0x6   : > { %p277_p0 = scmp.ne.s32.totalorder %s4481_s19, %s4477_s18  ;;  %p265_p1 = scmp.eq.s32.totalorder %s264_s25, 0 }
   0x7   : > { %p278_p2 = scmp.eq.s32.totalorder %s4572_s21, 1  ;;  %p283_p3 = scmp.ne.s32.totalorder %s4477_s18, %s4473_s17 }
   0x8   : > { %p284_p4 = scmp.eq.s32.totalorder %s3705_s22, 1  ;;  %p3708_p7 = scmp.ge.s32.totalorder %s4485_s20, 1 }
   0x9   : > { %s4587_s26 = scalar_select %p265_p1, %s4481_s19, %s267_s24  }
   0xa   : > { %p4589_p5 = por %p278_p2, %p277_p0  ;;  %p4593_p6 = por %p284_p4, %p283_p3 }
   0xb   : > { %6172 = sst [smem:[#allocation10_spill]] %s4587_s26  ;;  %p340_p8 = scmp.lt.s32.totalorder %s4485_s20, 3 }
   0xd   : > { %p341_p9 = pnand %p3708_p7, %p340_p8 }
   0xf   : > { %344 = sbr.rel (%p341_p9) target bundleno = 1845 (0x735), region = 64 }
  0x14   : > { %v4237_v0 = vld [vmem:[%s6155_s1 + $0x34] ss:$8 sps:$4 sm:$0x3f]   ;;  %vm558_vm0 = vcmask 1045504   ;;  %v4240_v2 = vld [vmem:[%s6155_s1 + $0x24] ss:$8 sps:$4 sm:$0xff]  }
  0x15   : > { %v4239_v1 = vld [vmem:[%s6155_s1 + $0x30] ss:$8 sps:$4 sm:$0x3f]   ;;  %3719 = vmatprep.subr.msk.bf16.mxu0 %vm558_vm0, %v4237_v0  ;;  %4190 = vmatprep.subr.msk.bf16.mxu1 %vm558_vm0, %v4237_v0  ;;  %p380_p10 = scmp.lt.s32.totalorder %s4572_s21, 1  ;;  %v6167_v4 = vmov 0   ;;  %vm509_vm1 = vcmask 228352  }
  0x16   : > { %v560_v3 = vsel %vm558_vm0, %v4239_v1, 0  ;;  %597 = vmatprep.mubr.bf16.mxu0 %v6167_v4  ;;  %747 = vmatprep.mubr.bf16.mxu1 %v6167_v4  ;;  %v4242_v5 = vld [vmem:[%s6155_s1 + $0x20] ss:$8 sps:$4 sm:$0xff]   ;;  %v4243_v6 = vld [vmem:[%s6155_s1 + $0x14] ss:$8 sps:$4 sm:$0x3f]  }
  0x17   : > { %578 = vmatpush1.bf16.msra.mxu0 %v560_v3  ;;  %4192 = vmatpush1.bf16.msra.mxu1 %v560_v3  ;;  %s381_s24 = scalar_select %p380_p10, %s4572_s21, 1  ;;  %v4245_v7 = vld [vmem:[%s6155_s1 + $0x54] ss:$8 sps:$4 sm:$0x3f]   ;;  %v4251_v18 = vld [vmem:[%s6155_s1 + $0x4] ss:$8 sps:$4 sm:$0xff]  }
  0x18   : > { %579 = vmatprep.subr.bf16.mxu0 %v4240_v2  ;;  %4191 = vmatprep.subr.bf16.mxu1 %v4240_v2  ;;  %v4248_v8 = vld [vmem:[%s6155_s1 + $0x50] ss:$8 sps:$4 sm:$0x3f]   ;;  %v4254_v19 = vld [vmem:[%s6155_s1 + $0x44] ss:$8 sps:$4 sm:$0xff]   ;;  %vm4489_vm2 = vmmov 0  }
  0x19   : > { %s4194_s13 = smul.u32 264, %s381_s24  ;;  %v4247_v9 = vld [vmem:[%s6155_s1 + $0x10] ss:$8 sps:$4 sm:$0x3f]   ;;  %v1143_v15 = vsel %vm558_vm0, %v4248_v8, 0  ;;  %vm3573_vm3 = vcmask 523264  }
  0x1a   : > { %v825_v17 = vsel %vm558_vm0, %v4247_v9, 0  ;;  %v4252_v22 = vld [vmem:[%s6155_s1 + $0x40] ss:$8 sps:$4 sm:$0xff]   ;;  %vm3617_vm4 = vcmask 80896   ;;  %s377_s14 = sand.u32 1, %s4477_s18   ;;  %s4025_s16 = sshll.u32 %s4572_s21, 7 }
  0x1b   : > { %580 = vmatpush1.bf16.msra.mxu0 %v4242_v5  ;;  %4193 = vmatpush1.bf16.msra.mxu1 %v4242_v5  ;;  %s4633_s25 = scalar_lea.vmem %s6154_s0, %s4194_s13  ;;  %v4249_v23 = vld [vmem:[%s6155_s1] ss:$8 sps:$4 sm:$0xff]   ;;  %s3709_s15 = sshll.u32 %s377_s14, 3 }
  0x1c   : > { %v438_v10 = vld [vmem:[%s4633_s25 + $0x1] sm:$0xff]  ;;  %v439_v11 = vld [vmem:[%s4633_s25 + $0x9] sm:$0xff]  ;;  %v468_v12 = vld [vmem:[%s4633_s25 + $0xf1] sm:$0xff]  ;;  %3740 = vmatprep.subr.msk.bf16.mxu1 %vm558_vm0, %v4243_v6  ;;  %3765 = vmatprep.subr.msk.bf16.mxu0 %vm558_vm0, %v4245_v7  ;;  %s379_s22 = scalar_lea.vmem [#allocation6], %s3709_s15  ;;  %s3644_s29 = scalar_lea.hbm %s6165_s11, %s4025_s16 }
  0x1d   : > { %v475_v13 = vpack.c.bf16 %v439_v11, %v438_v10  ;;  %v469_v14 = vld [vmem:[%s4633_s25 + $0xf9] sm:$0xff]  ;;  %v440_v20 = vld [vmem:[%s4633_s25 + $0x11] sm:$0xff]  ;;  %v387_v25 = vld [vmem:[%s4633_s25 + $0x8] sm:$0xff]  ;;  %s3646_s19 = sshll.u32 %s379_s22, 4  ;;  %s3633_s30 = scalar_lea.sflag [#allocation7], %s377_s14  ;;  %s3647_s19 = int_to_ptr.vmem [resolvable:$true] %s3646_s19 }
  0x1e   : > { %v490_v16 = vpack.c.bf16 %v469_v14, %v468_v12  ;;  %v441_v21 = vld [vmem:[%s4633_s25 + $0x19] sm:$0xff]  ;;  %v442_v28 = vld [vmem:[%s4633_s25 + $0x21] sm:$0xff]  ;;  %v443_v29 = vld [vmem:[%s4633_s25 + $0x29] sm:$0xff]  ;;  %s4425_s12 = scalar_lea.vmem %s3647_s19, 128 }
  0x1f   : > { %3720 = vmatmul.mubr.msk.bf16.vlgmr.msra.gmra.mxu0 %vm509_vm1, %v475_v13  ;;  %v386_v24 = vld [vmem:[%s4633_s25] sm:$0xff]  ;;  %v476_v26 = vpack.c.bf16 %v441_v21, %v440_v20  ;;  %v388_v30 = vld [vmem:[%s4633_s25 + $0x10] sm:$0xff]  ;;  %v389_v31 = vld [vmem:[%s4633_s25 + $0x18] sm:$0xff]  ;;  %v477_v32 = vpack.c.bf16 %v443_v29, %v442_v28  ;;  %p4426_p11 = scmp.ne.s32.totalorder %s3647_s19, %s4425_s12 }
  0x20   : > { %3735 = vmatmul.mubr.msk.bf16.vlgmr.msra.gmra.mxu1 %vm509_vm1, %v490_v16  ;;  %1161 = vmatpush1.bf16.msra.mxu0 %v1143_v15  ;;  %v422_v27 = vpack.c.bf16 %v387_v25, %v386_v24  ;;  %v423_v33 = vpack.c.bf16 %v389_v31, %v388_v30  ;;  %v444_v34 = vld [vmem:[%s4633_s25 + $0x31] sm:$0xff]  ;;  %v445_v35 = vld [vmem:[%s4633_s25 + $0x39] sm:$0xff]  ;;  %v391_v37 = vld [vmem:[%s4633_s25 + $0x28] sm:$0xff] }
  0x21   : > { %843 = vmatpush1.bf16.msra.mxu1 %v825_v17  ;;  %607 = vmatprep.mubr.bf16.mxu0 %v6167_v4  ;;  %v390_v36 = vld [vmem:[%s4633_s25 + $0x20] sm:$0xff]  ;;  %v478_v38 = vpack.c.bf16 %v445_v35, %v444_v34  ;;  %v447_v41 = vld [vmem:[%s4633_s25 + $0x49] sm:$0xff]  ;;  %v393_v43 = vld [vmem:[%s4633_s25 + $0x38] sm:$0xff]  ;;  %p4427_p12 = pnand %p4426_p11, %p4589_p5 }
  0x22   : > { %844 = vmatprep.subr.bf16.mxu1 %v4251_v18  ;;  %862 = vmatprep.mubr.bf16.mxu1 %v6167_v4  ;;  %v424_v39 = vpack.c.bf16 %v391_v37, %v390_v36  ;;  %v446_v40 = vld [vmem:[%s4633_s25 + $0x41] sm:$0xff]  ;;  %v392_v42 = vld [vmem:[%s4633_s25 + $0x30] sm:$0xff]  ;;  %v449_v47 = vld [vmem:[%s4633_s25 + $0x59] sm:$0xff] }
  0x23   : > { %1162 = vmatprep.subr.bf16.mxu0 %v4254_v19  ;;  %v479_v44 = vpack.c.bf16 %v447_v41, %v446_v40  ;;  %v425_v45 = vpack.c.bf16 %v393_v43, %v392_v42  ;;  %v448_v46 = vld [vmem:[%s4633_s25 + $0x51] sm:$0xff]  ;;  %v394_v48 = vld [vmem:[%s4633_s25 + $0x40] sm:$0xff]  ;;  %v395_v49 = vld [vmem:[%s4633_s25 + $0x48] sm:$0xff]  ;;  %p4428_p13 = pneg %p4427_p12 }
  0x24   : > { %1163 = vmatpush1.bf16.msra.mxu0 %v4252_v22  ;;  %v480_v50 = vpack.c.bf16 %v449_v47, %v448_v46  ;;  %v426_v51 = vpack.c.bf16 %v395_v49, %v394_v48  ;;  %v450_v52 = vld [vmem:[%s4633_s25 + $0x61] sm:$0xff]  ;;  %v451_v53 = vld [vmem:[%s4633_s25 + $0x69] sm:$0xff]  ;;  %v397_v55 = vld [vmem:[%s4633_s25 + $0x58] sm:$0xff] }
  0x25   : > { %845 = vmatpush1.bf16.msra.mxu1 %v4249_v23  ;;  %v396_v54 = vld [vmem:[%s4633_s25 + $0x50] sm:$0xff]  ;;  %v481_v56 = vpack.c.bf16 %v451_v53, %v450_v52  ;;  %v453_v59 = vld [vmem:[%s4633_s25 + $0x79] sm:$0xff]  ;;  %v399_v61 = vld [vmem:[%s4633_s25 + $0x68] sm:$0xff] }
  0x26   : > { %v427_v57 = vpack.c.bf16 %v397_v55, %v396_v54  ;;  %v452_v58 = vld [vmem:[%s4633_s25 + $0x71] sm:$0xff]  ;;  %v398_v60 = vld [vmem:[%s4633_s25 + $0x60] sm:$0xff]  ;;  %v455_v1 = vld [vmem:[%s4633_s25 + $0x89] sm:$0xff] }
  0x27   : > { %3721 = vmatmul.mubr.msk.bf16.gmra.mxu0 %vm509_vm1, %v476_v26  ;;  %v482_v62 = vpack.c.bf16 %v453_v59, %v452_v58  ;;  %v428_v63 = vpack.c.bf16 %v399_v61, %v398_v60  ;;  %v454_v0 = vld [vmem:[%s4633_s25 + $0x81] sm:$0xff]  ;;  %v400_v2 = vld [vmem:[%s4633_s25 + $0x70] sm:$0xff]  ;;  %v401_v3 = vld [vmem:[%s4633_s25 + $0x78] sm:$0xff] }
  0x28   : > { %3741 = vmatmul.mubr.msk.bf16.vlgmr.msra.gmra.mxu1 %vm509_vm1, %v422_v27  ;;  %617 = vmatprep.mubr.bf16.mxu0 %v6167_v4  ;;  %v483_v5 = vpack.c.bf16 %v455_v1, %v454_v0  ;;  %v429_v6 = vpack.c.bf16 %v401_v3, %v400_v2  ;;  %v456_v7 = vld [vmem:[%s4633_s25 + $0x91] sm:$0xff]  ;;  %v457_v8 = vld [vmem:[%s4633_s25 + $0x99] sm:$0xff]  ;;  %v403_v10 = vld [vmem:[%s4633_s25 + $0x88] sm:$0xff] }
  0x29   : > { %872 = vmatprep.mubr.bf16.mxu1 %v6167_v4  ;;  %v402_v9 = vld [vmem:[%s4633_s25 + $0x80] sm:$0xff]  ;;  %v484_v11 = vpack.c.bf16 %v457_v8, %v456_v7  ;;  %v459_v14 = vld [vmem:[%s4633_s25 + $0xa9] sm:$0xff]  ;;  %v405_v16 = vld [vmem:[%s4633_s25 + $0x98] sm:$0xff] }
  0x2a   : > { %v430_v12 = vpack.c.bf16 %v403_v10, %v402_v9  ;;  %v458_v13 = vld [vmem:[%s4633_s25 + $0xa1] sm:$0xff]  ;;  %v404_v15 = vld [vmem:[%s4633_s25 + $0x90] sm:$0xff]  ;;  %v461_v20 = vld [vmem:[%s4633_s25 + $0xb9] sm:$0xff] }
  0x2b   : > { %v485_v17 = vpack.c.bf16 %v459_v14, %v458_v13  ;;  %v431_v18 = vpack.c.bf16 %v405_v16, %v404_v15  ;;  %v460_v19 = vld [vmem:[%s4633_s25 + $0xb1] sm:$0xff]  ;;  %v406_v21 = vld [vmem:[%s4633_s25 + $0xa0] sm:$0xff]  ;;  %v407_v22 = vld [vmem:[%s4633_s25 + $0xa8] sm:$0xff] }
  0x2c   : > { %v486_v23 = vpack.c.bf16 %v461_v20, %v460_v19  ;;  %v432_v24 = vpack.c.bf16 %v407_v22, %v406_v21  ;;  %v462_v25 = vld [vmem:[%s4633_s25 + $0xc1] sm:$0xff]  ;;  %v463_v26 = vld [vmem:[%s4633_s25 + $0xc9] sm:$0xff]  ;;  %v409_v28 = vld [vmem:[%s4633_s25 + $0xb8] sm:$0xff] }
  0x2d   : > { %v408_v27 = vld [vmem:[%s4633_s25 + $0xb0] sm:$0xff]  ;;  %v487_v29 = vpack.c.bf16 %v463_v26, %v462_v25  ;;  %v411_v34 = vld [vmem:[%s4633_s25 + $0xc8] sm:$0xff]  ;;  %v413_v40 = vld [vmem:[%s4633_s25 + $0xd8] sm:$0xff] }
  0x2e   : > { %v433_v30 = vpack.c.bf16 %v409_v28, %v408_v27  ;;  %v464_v31 = vld [vmem:[%s4633_s25 + $0xd1] sm:$0xff]  ;;  %v466_v37 = vld [vmem:[%s4633_s25 + $0xe1] sm:$0xff] }
  0x2f   : > { %3722 = vmatmul.mubr.msk.bf16.gmra.mxu0 %vm509_vm1, %v477_v32  ;;  %v465_v32 = vld [vmem:[%s4633_s25 + $0xd9] sm:$0xff]  ;;  %v1023_v43 = vld [vmem:[%s4633_s25 + $0x2] sm:$0xff]  ;;  %v1036_v7 = vld [vmem:[%s4633_s25 + $0x6a] sm:$0xff] }
  0x30   : > { %3742 = vmatmul.mubr.msk.bf16.gmra.mxu1 %vm509_vm1, %v423_v33  ;;  %627 = vmatprep.mubr.bf16.mxu0 %v6167_v4  ;;  %v410_v33 = vld [vmem:[%s4633_s25 + $0xc0] sm:$0xff]  ;;  %v488_v35 = vpack.c.bf16 %v465_v32, %v464_v31  ;;  %v415_v46 = vld [vmem:[%s4633_s25 + $0xe8] sm:$0xff]  ;;  %v1025_v49 = vld [vmem:[%s4633_s25 + $0x12] sm:$0xff] }
  0x31   : > { %882 = vmatprep.mubr.bf16.mxu1 %v6167_v4  ;;  %v434_v36 = vpack.c.bf16 %v411_v34, %v410_v33  ;;  %v417_v52 = vld [vmem:[%s4633_s25 + $0xf8] sm:$0xff]  ;;  %v1027_v55 = vld [vmem:[%s4633_s25 + $0x22] sm:$0xff]  ;;  %v1040_v15 = vld [vmem:[%s4633_s25 + $0x8a] sm:$0xff] }
  0x32   : > { %v1029_v58 = vld [vmem:[%s4633_s25 + $0x32] sm:$0xff]  ;;  %v1030_v59 = vld [vmem:[%s4633_s25 + $0x3a] sm:$0xff]  ;;  %v1031_v61 = vld [vmem:[%s4633_s25 + $0x42] sm:$0xff] }
  0x33   : > { %v1063_v60 = vpack.c.bf16 %v1030_v59, %v1029_v58  ;;  %v1033_v0 = vld [vmem:[%s4633_s25 + $0x52] sm:$0xff]  ;;  %v1034_v1 = vld [vmem:[%s4633_s25 + $0x5a] sm:$0xff]  ;;  %v4260_v13 = vld [vmem:[%s6157_s3 + $0xe4] ss:$8 sps:$4 sm:$0xff]  }
  0x34   : > { %v1065_v2 = vpack.c.bf16 %v1034_v1, %v1033_v0  ;;  %v4255_v3 = vld [vmem:[%s6157_s3 + $0xf0] ss:$8 sps:$4 sm:$0xff]   ;;  %v1039_v14 = vld [vmem:[%s4633_s25 + $0x82] sm:$0xff]  ;;  %v4263_v21 = vld [vmem:[%s6157_s3 + $0xd4] ss:$8 sps:$4 sm:$0xff]  }
  0x35   : > { %v1037_v9 = vld [vmem:[%s4633_s25 + $0x72] sm:$0xff]  ;;  %v1038_v10 = vld [vmem:[%s4633_s25 + $0x7a] sm:$0xff]  ;;  %v1068_v16 = vpack.c.bf16 %v1040_v15, %v1039_v14  ;;  %v1044_v25 = vld [vmem:[%s4633_s25 + $0xaa] sm:$0xff] }
  0x36   : > { %v4261_v20 = vld [vmem:[%s6157_s3 + $0xd0] ss:$8 sps:$4 sm:$0xff]   ;;  %v4276_v0 = vld [vmem:[%s6157_s3 + $0x140] ss:$8 sps:$4 sm:$0xff]  }
  0x37   : > { %3723 = vmatmul.mubr.msk.bf16.gmra.mxu0 %vm509_vm1, %v478_v38  ;;  %v467_v38 = vld [vmem:[%s4633_s25 + $0xe9] sm:$0xff] }
  0x38   : > { %3743 = vmatmul.mubr.msk.bf16.gmra.mxu1 %vm509_vm1, %v424_v39  ;;  %637 = vmatprep.mubr.bf16.mxu0 %v6167_v4  ;;  %v412_v39 = vld [vmem:[%s4633_s25 + $0xd0] sm:$0xff]  ;;  %v489_v41 = vpack.c.bf16 %v467_v38, %v466_v37 }
  0x39   : > { %892 = vmatprep.mubr.bf16.mxu1 %v6167_v4  ;;  %v435_v42 = vpack.c.bf16 %v413_v40, %v412_v39  ;;  %v4269_v38 = vld [vmem:[%s6157_s3 + $0x174] ss:$8 sps:$4 sm:$0xff]   ;;  %v4267_v40 = vld [vmem:[%s6157_s3 + $0x170] ss:$8 sps:$4 sm:$0xff]  }
  0x3a   : > { %2192 = vmatprep.subr.bf16.mxu0 %v4269_v38  ;;  %v4291_v38 = vld [vmem:[%s6157_s3 + $0x90] ss:$8 sps:$4 sm:$0xff]  }
  0x3f   : > { %3724 = vmatmul.mubr.msk.bf16.gmra.mxu0 %vm509_vm1, %v479_v44  ;;  %v1024_v44 = vld [vmem:[%s4633_s25 + $0xa] sm:$0xff] }
  0x40   : > { %3744 = vmatmul.mubr.msk.bf16.gmra.mxu1 %vm509_vm1, %v425_v45  ;;  %647 = vmatprep.mubr.bf16.mxu0 %v6167_v4  ;;  %v414_v45 = vld [vmem:[%s4633_s25 + $0xe0] sm:$0xff]  ;;  %v1060_v47 = vpack.c.bf16 %v1024_v44, %v1023_v43 }
  0x41   : > { %902 = vmatprep.mubr.bf16.mxu1 %v6167_v4  ;;  %v436_v48 = vpack.c.bf16 %v415_v46, %v414_v45  ;;  %v4272_v45 = vld [vmem:[%s6157_s3 + $0x164] ss:$8 sps:$4 sm:$0xff]  }
  0x47   : > { %3725 = vmatmul.mubr.msk.bf16.gmra.mxu0 %vm509_vm1, %v480_v50  ;;  %v1026_v50 = vld [vmem:[%s4633_s25 + $0x1a] sm:$0xff] }
  0x48   : > { %3745 = vmatmul.mubr.msk.bf16.gmra.mxu1 %vm509_vm1, %v426_v51  ;;  %657 = vmatprep.mubr.bf16.mxu0 %v6167_v4  ;;  %v416_v51 = vld [vmem:[%s4633_s25 + $0xf0] sm:$0xff]  ;;  %v1061_v53 = vpack.c.bf16 %v1026_v50, %v1025_v49  ;;  %v1047_v50 = vld [vmem:[%s4633_s25 + $0xc2] sm:$0xff] }
  0x49   : > { %912 = vmatprep.mubr.bf16.mxu1 %v6167_v4  ;;  %v437_v54 = vpack.c.bf16 %v417_v52, %v416_v51  ;;  %v1048_v51 = vld [vmem:[%s4633_s25 + $0xca] sm:$0xff] }
  0x4f   : > { %3726 = vmatmul.mubr.msk.bf16.gmra.mxu0 %vm509_vm1, %v481_v56  ;;  %v1028_v56 = vld [vmem:[%s4633_s25 + $0x2a] sm:$0xff] }
  0x50   : > { %3746 = vmatmul.mubr.msk.bf16.gmra.mxu1 %vm509_vm1, %v427_v57  ;;  %667 = vmatprep.mubr.bf16.mxu0 %v6167_v4  ;;  %v1062_v57 = vpack.c.bf16 %v1028_v56, %v1027_v55  ;;  %v4273_v55 = vld [vmem:[%s6157_s3 + $0x150] ss:$8 sps:$4 sm:$0xff]  }
  0x51   : > { %922 = vmatprep.mubr.bf16.mxu1 %v6167_v4 }
  0x57   : > { %3727 = vmatmul.mubr.msk.bf16.gmra.mxu0 %vm509_vm1, %v482_v62  ;;  %v1032_v62 = vld [vmem:[%s4633_s25 + $0x4a] sm:$0xff] }
  0x58   : > { %3747 = vmatmul.mubr.msk.bf16.gmra.mxu1 %vm509_vm1, %v428_v63  ;;  %677 = vmatprep.mubr.bf16.mxu0 %v6167_v4  ;;  %v1064_v63 = vpack.c.bf16 %v1032_v62, %v1031_v61  ;;  %v4278_v61 = vld [vmem:[%s6157_s3 + $0x144] ss:$8 sps:$4 sm:$0xff]  }
  0x59   : > { %932 = vmatprep.mubr.bf16.mxu1 %v6167_v4 }
  0x5f   : > { %3728 = vmatmul.mubr.msk.bf16.gmra.mxu0 %vm509_vm1, %v483_v5  ;;  %v4257_v5 = vld [vmem:[%s6157_s3 + $0xf4] ss:$8 sps:$4 sm:$0xff]  }
  0x60   : > { %3748 = vmatmul.mubr.msk.bf16.gmra.mxu1 %vm509_vm1, %v429_v6  ;;  %687 = vmatprep.mubr.bf16.mxu0 %v6167_v4  ;;  %v1035_v6 = vld [vmem:[%s4633_s25 + $0x62] sm:$0xff] }
  0x61   : > { %942 = vmatprep.mubr.bf16.mxu1 %v6167_v4  ;;  %1765 = vmatprep.subr.bf16.mxu1 %v4257_v5  ;;  %v1066_v8 = vpack.c.bf16 %v1036_v7, %v1035_v6  ;;  %v1050_v5 = vld [vmem:[%s4633_s25 + $0xda] sm:$0xff] }
  0x62   : > { %1766 = vmatpush1.bf16.msra.mxu1 %v4255_v3  ;;  %v1049_v3 = vld [vmem:[%s4633_s25 + $0xd2] sm:$0xff] }
  0x63   : > { %1767 = vmatprep.subr.bf16.mxu1 %v4260_v13  ;;  %v4281_v7 = vld [vmem:[%s6157_s3 + $0xb4] ss:$8 sps:$4 sm:$0xff]   ;;  %v1073_v13 = vpack.c.bf16 %v1050_v5, %v1049_v3 }
  0x67   : > { %3729 = vmatmul.mubr.msk.bf16.gmra.mxu0 %vm509_vm1, %v484_v11  ;;  %v1067_v11 = vpack.c.bf16 %v1038_v10, %v1037_v9  ;;  %v4279_v10 = vld [vmem:[%s6157_s3 + $0xb0] ss:$8 sps:$4 sm:$0xff]  }
  0x68   : > { %3749 = vmatmul.mubr.msk.bf16.gmra.mxu1 %vm509_vm1, %v430_v12  ;;  %697 = vmatprep.mubr.bf16.mxu0 %v6167_v4  ;;  %v4258_v12 = vld [vmem:[%s6157_s3 + $0xe0] ss:$8 sps:$4 sm:$0xff]  }
  0x69   : > { %952 = vmatprep.mubr.bf16.mxu1 %v6167_v4  ;;  %1768 = vmatpush1.bf16.msra.mxu1 %v4258_v12 }
  0x6a   : > { %1769 = vmatprep.subr.bf16.mxu1 %v4263_v21  ;;  %v1051_v21 = vld [vmem:[%s4633_s25 + $0xe2] sm:$0xff] }
  0x6d   : > { %1770 = vmatpush1.bf16.msra.mxu1 %v4261_v20 }
  0x6f   : > { %3730 = vmatmul.mubr.msk.bf16.gmra.mxu0 %vm509_vm1, %v485_v17  ;;  %v1041_v17 = vld [vmem:[%s4633_s25 + $0x92] sm:$0xff] }
  0x70   : > { %3750 = vmatmul.mubr.msk.bf16.gmra.mxu1 %vm509_vm1, %v431_v18  ;;  %707 = vmatprep.mubr.bf16.mxu0 %v6167_v4  ;;  %v1042_v18 = vld [vmem:[%s4633_s25 + $0x9a] sm:$0xff] }
  0x71   : > { %962 = vmatprep.mubr.bf16.mxu1 %v6167_v4  ;;  %v1069_v19 = vpack.c.bf16 %v1042_v18, %v1041_v17  ;;  %v4290_v17 = vld [vmem:[%s6157_s3 + $0x124] ss:$8 sps:$4 sm:$0xff]   ;;  %v4285_v18 = vld [vmem:[%s6157_s3 + $0xa0] ss:$8 sps:$4 sm:$0xff]  }
  0x77   : > { %3731 = vmatmul.mubr.msk.bf16.gmra.mxu0 %vm509_vm1, %v486_v23 }
  0x78   : > { %3751 = vmatmul.mubr.msk.bf16.gmra.mxu1 %vm509_vm1, %v432_v24  ;;  %717 = vmatprep.mubr.bf16.mxu0 %v6167_v4  ;;  %v1043_v24 = vld [vmem:[%s4633_s25 + $0xa2] sm:$0xff] }
  0x79   : > { %972 = vmatprep.mubr.bf16.mxu1 %v6167_v4 }
  0x7f   : > { %3732 = vmatmul.mubr.msk.bf16.gmra.mxu0 %vm509_vm1, %v487_v29  ;;  %v1070_v29 = vpack.c.bf16 %v1044_v25, %v1043_v24  ;;  %v1052_v24 = vld [vmem:[%s4633_s25 + $0xea] sm:$0xff] }
  0x80   : > { %3752 = vmatmul.mubr.msk.bf16.gmra.mxu1 %vm509_vm1, %v433_v30  ;;  %727 = vmatprep.mubr.bf16.mxu0 %v6167_v4 }
  0x81   : > { %982 = vmatprep.mubr.bf16.mxu1 %v6167_v4 }
  0x87   : > { %3733 = vmatmul.mubr.msk.bf16.gmra.mxu0 %vm509_vm1, %v488_v35  ;;  %v1045_v35 = vld [vmem:[%s4633_s25 + $0xb2] sm:$0xff] }
  0x88   : > { %3753 = vmatmul.mubr.msk.bf16.gmra.mxu1 %vm509_vm1, %v434_v36  ;;  %737 = vmatprep.mubr.bf16.mxu0 %v6167_v4  ;;  %v1046_v36 = vld [vmem:[%s4633_s25 + $0xba] sm:$0xff] }
  0x89   : > { %992 = vmatprep.mubr.bf16.mxu1 %v6167_v4 }
  0x8f   : > { %3734 = vmatmul.mubr.msk.bf16.gmra.mxu0 %vm509_vm1, %v489_v41 }
  0x90   : > { %3754 = vmatmul.mubr.msk.bf16.gmra.mxu1 %vm509_vm1, %v435_v42  ;;  %1180 = vmatprep.mubr.bf16.mxu0 %v6167_v4  ;;  %v1071_v42 = vpack.c.bf16 %v1046_v36, %v1045_v35  ;;  %v4293_v35 = vld [vmem:[%s6157_s3 + $0x94] ss:$8 sps:$4 sm:$0xff]  }
  0x91   : > { %1002 = vmatprep.mubr.bf16.mxu1 %v6167_v4  ;;  %v4296_v36 = vld [vmem:[%s6157_s3 + $0x114] ss:$8 sps:$4 sm:$0xff]  }
  0x97   : > { %3766 = vmatmul.mubr.msk.bf16.vlgmr.msra.gmra.mxu0 %vm509_vm1, %v1060_v47  ;;  %v4270_v47 = vld [vmem:[%s6157_s3 + $0x160] ss:$8 sps:$4 sm:$0xff]  }
  0x98   : > { %3755 = vmatmul.mubr.msk.bf16.gmra.mxu1 %vm509_vm1, %v436_v48  ;;  %1190 = vmatprep.mubr.bf16.mxu0 %v6167_v4 }
  0x99   : > { %1012 = vmatprep.mubr.bf16.mxu1 %v6167_v4  ;;  %2193 = vmatpush1.bf16.msra.mxu0 %v4267_v40  ;;  %v4294_v40 = vld [vmem:[%s6157_s3 + $0x110] ss:$8 sps:$4 sm:$0xff]  }
  0x9a   : > { %2194 = vmatprep.subr.bf16.mxu0 %v4272_v45  ;;  %v1074_v45 = vpack.c.bf16 %v1052_v24, %v1051_v21 }
  0x9d   : > { %2195 = vmatpush1.bf16.msra.mxu0 %v4270_v47 }
  0x9f   : > { %3767 = vmatmul.mubr.msk.bf16.gmra.mxu0 %vm509_vm1, %v1061_v53  ;;  %v4275_v53 = vld [vmem:[%s6157_s3 + $0x154] ss:$8 sps:$4 sm:$0xff]  }
  0xa0   : > { %3756 = vmatmul.mubr.msk.bf16.gmra.mxu1 %vm509_vm1, %v437_v54  ;;  %1200 = vmatprep.mubr.bf16.mxu0 %v6167_v4 }
  0xa1   : > { %1797 = vmatprep.mubr.bf16.mxu1 %v6167_v4  ;;  %2196 = vmatprep.subr.bf16.mxu0 %v4275_v53  ;;  %v4302_v53 = vld [vmem:[%s6157_s3 + $0x104] ss:$8 sps:$4 sm:$0xff]  }
  0xa2   : > { %2197 = vmatpush1.bf16.msra.mxu0 %v4273_v55  ;;  %v4297_v55 = vld [vmem:[%s6157_s3 + $0x80] ss:$8 sps:$4 sm:$0xff]  }
  0xa3   : > { %2198 = vmatprep.subr.bf16.mxu0 %v4278_v61  ;;  %v1053_v61 = vld [vmem:[%s4633_s25 + $0xf2] sm:$0xff] }
  0xa6   : > { %2199 = vmatpush1.bf16.msra.mxu0 %v4276_v0 }
  0xa7   : > { %3768 = vmatmul.mubr.msk.bf16.gmra.mxu0 %vm509_vm1, %v1062_v57  ;;  %v1072_v57 = vpack.c.bf16 %v1048_v51, %v1047_v50  ;;  %v4299_v51 = vld [vmem:[%s6157_s3 + $0x84] ss:$8 sps:$4 sm:$0xff]  }
  0xa8   : > { %1210 = vmatprep.mubr.bf16.mxu0 %v6167_v4 }
  0xaf   : > { %3769 = vmatmul.mubr.msk.bf16.gmra.mxu0 %vm509_vm1, %v1063_v60  ;;  %v4266_v60 = vld [vmem:[%s6157_s3 + $0xc4] ss:$8 sps:$4 sm:$0xff]  }
  0xb0   : > { %1220 = vmatprep.mubr.bf16.mxu0 %v6167_v4  ;;  %1771 = vmatprep.subr.bf16.mxu1 %v4266_v60 }
  0xb7   : > { %3770 = vmatmul.mubr.msk.bf16.gmra.mxu0 %vm509_vm1, %v1064_v63  ;;  %v4264_v63 = vld [vmem:[%s6157_s3 + $0xc0] ss:$8 sps:$4 sm:$0xff]  }
  0xb8   : > { %1230 = vmatprep.mubr.bf16.mxu0 %v6167_v4  ;;  %1772 = vmatpush1.bf16.msra.mxu1 %v4264_v63  ;;  %v1054_v63 = vld [vmem:[%s4633_s25 + $0xfa] sm:$0xff]  ;;  %s4490_s25 = smov [#allocation6]  }
  0xb9   : > { %1773 = vmatprep.subr.bf16.mxu1 %v4281_v7  ;;  %v1075_v7 = vpack.c.bf16 %v1054_v63, %v1053_v61  ;;  %s4429_s13 = sshll.u32 %s4490_s25, 4  ;;  %s4430_s13 = int_to_ptr.vmem [resolvable:$false] %s4429_s13 }
  0xba   : > { %s4431_s21 = scalar_lea.vmem %s4430_s13, 256  ;;  %p4432_p0 = scmp.lt.s32.totalorder %s3647_s19, %s4430_s13 }
  0xbb   : > { %p4433_p1 = scmp.lt.s32.totalorder %s4431_s21, %s4425_s12 }
  0xbc   : > { %1774 = vmatpush1.bf16.msra.mxu1 %v4279_v10 }
  0xbd   : > { %p4434_p2 = por %p4433_p1, %p4432_p0 }
  0xbf   : > { %3771 = vmatmul.mubr.msk.bf16.gmra.mxu0 %vm509_vm1, %v1065_v2  ;;  %p4435_p3 = pnand %p4434_p2, %p4428_p13 }
  0xc0   : > { %1240 = vmatprep.mubr.bf16.mxu0 %v6167_v4 }
  0xc7   : > { %3772 = vmatmul.mubr.msk.bf16.gmra.mxu0 %vm509_vm1, %v1066_v8  ;;  %v4284_v8 = vld [vmem:[%s6157_s3 + $0x134] ss:$8 sps:$4 sm:$0xff]  }
  0xc8   : > { %1250 = vmatprep.mubr.bf16.mxu0 %v6167_v4  ;;  %2200 = vmatprep.subr.bf16.mxu0 %v4284_v8 }
  0xcf   : > { %3773 = vmatmul.mubr.msk.bf16.gmra.mxu0 %vm509_vm1, %v1067_v11  ;;  %v4282_v11 = vld [vmem:[%s6157_s3 + $0x130] ss:$8 sps:$4 sm:$0xff]  }
  0xd0   : > { %1260 = vmatprep.mubr.bf16.mxu0 %v6167_v4  ;;  %2201 = vmatpush1.bf16.msra.mxu0 %v4282_v11 }
  0xd1   : > { %2202 = vmatprep.subr.bf16.mxu0 %v4290_v17 }
  0xd7   : > { %3774 = vmatmul.mubr.msk.bf16.gmra.mxu0 %vm509_vm1, %v1068_v16  ;;  %v4287_v16 = vld [vmem:[%s6157_s3 + $0xa4] ss:$8 sps:$4 sm:$0xff]  }
  0xd8   : > { %1270 = vmatprep.mubr.bf16.mxu0 %v6167_v4  ;;  %1775 = vmatprep.subr.bf16.mxu1 %v4287_v16 }
  0xd9   : > { %1776 = vmatpush1.bf16.msra.mxu1 %v4285_v18 }
  0xda   : > { %1777 = vmatprep.subr.bf16.mxu1 %v4293_v35 }
  0xdd   : > { %1778 = vmatpush1.bf16.msra.mxu1 %v4291_v38 }
  0xde   : > { %1779 = vmatprep.subr.bf16.mxu1 %v4299_v51 }
  0xdf   : > { %v4835_v22 = vpop.f32.mrf.mxu0  ;;  %3775 = vmatmul.mubr.msk.bf16.gmra.mxu0 %vm509_vm1, %v1069_v19  ;;  %v4288_v19 = vld [vmem:[%s6157_s3 + $0x120] ss:$8 sps:$4 sm:$0xff]  }
  0xe0   : > { %v4838_v23 = vpop.f32.mrf.mxu1  ;;  %1280 = vmatprep.mubr.bf16.mxu0 %v6167_v4  ;;  %2203 = vmatpush1.bf16.msra.mxu0 %v4288_v19 }
  0xe1   : > { %6175 = vst [vmem:[#allocation11_spill] sm:$0xff] %v4838_v23  ;;  %v4843_v26 = vpop.f32.mrf.mxu0  ;;  %2204 = vmatprep.subr.bf16.mxu0 %v4296_v36  ;;  %1780 = vmatpush1.bf16.msra.mxu1 %v4297_v55 }
  0xe2   : > { %v4845_v27 = vpop.f32.mrf.mxu1 }
  0xe3   : > { %6176 = vst [vmem:[#allocation12_spill] sm:$0xff] %v4845_v27  ;;  %v4847_v28 = vpop.f32.mrf.mxu0 }
  0xe4   : > { %v4849_v30 = vpop.f32.mrf.mxu1  ;;  %2205 = vmatpush1.bf16.msra.mxu0 %v4294_v40 }
  0xe5   : > { %6177 = vst [vmem:[#allocation13_spill] sm:$0xff] %v4849_v30  ;;  %v4851_v31 = vpop.f32.mrf.mxu0  ;;  %2206 = vmatprep.subr.bf16.mxu0 %v4302_v53 }
  0xe6   : > { %v4853_v32 = vpop.f32.mrf.mxu1 }
  0xe7   : > { %6178 = vst [vmem:[#allocation14_spill] sm:$0xff] %v4853_v32  ;;  %v4855_v33 = vpop.f32.mrf.mxu0  ;;  %3776 = vmatmul.mubr.msk.bf16.gmra.mxu0 %vm509_vm1, %v1070_v29 }
  0xe8   : > { %v4858_v34 = vpop.f32.mrf.mxu1  ;;  %1290 = vmatprep.mubr.bf16.mxu0 %v6167_v4 }
  0xe9   : > { %v4863_v37 = vpop.f32.mrf.mxu0 }
  0xea   : > { %v4868_v39 = vpop.f32.mrf.mxu1 }
  0xeb   : > { %v4873_v41 = vpop.f32.mrf.mxu0 }
  0xec   : > { %v4875_v43 = vpop.f32.mrf.mxu1 }
  0xed   : > { %v4877_v44 = vpop.f32.mrf.mxu0 }
  0xee   : > { %v4882_v46 = vpop.f32.mrf.mxu1 }
  0xef   : > { %v4887_v48 = vpop.f32.mrf.mxu0  ;;  %3777 = vmatmul.mubr.msk.bf16.gmra.mxu0 %vm509_vm1, %v1071_v42 }
  0xf0   : > { %v4890_v49 = vpop.f32.mrf.mxu1  ;;  %1300 = vmatprep.mubr.bf16.mxu0 %v6167_v4 }
  0xf1   : > { %v4895_v52 = vpop.f32.mrf.mxu0 }
  0xf2   : > { %v4900_v54 = vpop.f32.mrf.mxu1 }
  0xf3   : > { %v4905_v56 = vpop.f32.mrf.mxu0 }
  0xf4   : > { %v4907_v58 = vpop.f32.mrf.mxu1 }
  0xf5   : > { %v4909_v59 = vpop.f32.mrf.mxu0 }
  0xf6   : > { %v4917_v62 = vpop.f32.mrf.mxu1 }
  0xf7   : > { %v4925_v1 = vpop.f32.mrf.mxu0  ;;  %3778 = vmatmul.mubr.msk.bf16.gmra.mxu0 %vm509_vm1, %v1072_v57  ;;  %v4300_v57 = vld [vmem:[%s6157_s3 + $0x100] ss:$8 sps:$4 sm:$0xff]  }
  0xf8   : > { %v4928_v2 = vpop.f32.mrf.mxu1  ;;  %1310 = vmatprep.mubr.bf16.mxu0 %v6167_v4  ;;  %2207 = vmatpush1.bf16.msra.mxu0 %v4300_v57 }
  0xf9   : > { %v4933_v6 = vpop.f32.mrf.mxu0 }
  0xfa   : > { %v4941_v9 = vpop.f32.mrf.mxu1 }
  0xfb   : > { %v4949_v12 = vpop.f32.mrf.mxu0 }
  0xfc   : > { %v4951_v14 = vpop.f32.mrf.mxu1 }
  0xfd   : > { %v4953_v15 = vpop.f32.mrf.mxu0 }
  0xfe   : > { %v4973_v25 = vpop.f32.mrf.mxu1 }
  0xff   : > { %v4967_v20 = vpop.f32.mrf.mxu0  ;;  %3779 = vmatmul.mubr.msk.bf16.gmra.mxu0 %vm509_vm1, %v1073_v13 }
 0x100   : > { %1320 = vmatprep.mubr.bf16.mxu0 %v6167_v4  ;;  %v4991_v47 = vpop.f32.mrf.mxu1 }
 0x101   : > { %v4975_v29 = vpop.f32.mrf.mxu0 }
 0x102   : > { %v5013_v0 = vpop.f32.mrf.mxu1 }
 0x103   : > { %v4989_v42 = vpop.f32.mrf.mxu0 }
 0x104   : > { %v5019_v8 = vpop.f32.mrf.mxu1 }
 0x105   : > { %v4993_v50 = vpop.f32.mrf.mxu0 }
 0x106   : > { %v5027_v13 = vpop.f32.mrf.mxu1 }
 0x107   : > { %v5007_v60 = vpop.f32.mrf.mxu0  ;;  %3780 = vmatmul.mubr.msk.bf16.gmra.mxu0 %vm509_vm1, %v1074_v45 }
 0x108   : > { %1330 = vmatprep.mubr.bf16.mxu0 %v6167_v4  ;;  %v5033_v18 = vpop.f32.mrf.mxu1 }
 0x109   : > { %v5015_v3 = vpop.f32.mrf.mxu0 }
 0x10a   : > { %v5039_v24 = vpop.f32.mrf.mxu1 }
 0x10b   : > { %v5017_v5 = vpop.f32.mrf.mxu0 }
 0x10c   : > { %v5045_v38 = vpop.f32.mrf.mxu1 }
 0x10d   : > { %v5021_v10 = vpop.f32.mrf.mxu0 }
 0x10e   : > { %v5051_v51 = vpop.f32.mrf.mxu1 }
 0x10f   : > { %v5023_v11 = vpop.f32.mrf.mxu0  ;;  %3781 = vmatmul.mubr.msk.bf16.gmra.mxu0 %vm509_vm1, %v1075_v7 }
 0x110   : > { %2224 = vmatprep.mubr.bf16.mxu0 %v6167_v4  ;;  %v5057_v57 = vpop.f32.mrf.mxu1 }
 0x111   : > { %v5029_v16 = vpop.f32.mrf.mxu0 }
 0x112   : > { %v5063_v7 = vpop.f32.mrf.mxu1 }
 0x113   : > { %v5031_v17 = vpop.f32.mrf.mxu0 }
 0x114   : > { %6179 = vst [vmem:[#allocation15_spill] sm:$0xff] %v5031_v17  ;;  %v5069_v30 = vpop.f32.mrf.mxu1 }
 0x115   : > { %v5035_v19 = vpop.f32.mrf.mxu0 }
 0x116   : > { %6180 = vst [vmem:[#allocation16_spill] sm:$0xff] %v5035_v19 }
 0x117   : > { %v5037_v21 = vpop.f32.mrf.mxu0 }
 0x118   : > { %6181 = vst [vmem:[#allocation17_spill] sm:$0xff] %v5037_v21 }
 0x119   : > { %v5041_v35 = vpop.f32.mrf.mxu0 }
 0x11a   : > { %6182 = vst [vmem:[#allocation18_spill] sm:$0xff] %v5041_v35 }
 0x11b   : > { %v5043_v36 = vpop.f32.mrf.mxu0 }
 0x11c   : > { %6183 = vst [vmem:[#allocation19_spill] sm:$0xff] %v5043_v36 }
 0x11d   : > { %v5047_v40 = vpop.f32.mrf.mxu0 }
 0x11e   : > { %6184 = vst [vmem:[#allocation20_spill] sm:$0xff] %v5047_v40 }
 0x11f   : > { %v5049_v45 = vpop.f32.mrf.mxu0 }
 0x120   : > { %6185 = vst [vmem:[#allocation21_spill] sm:$0xff] %v5049_v45 }
 0x121   : > { %v5053_v53 = vpop.f32.mrf.mxu0 }
 0x122   : > { %6186 = vst [vmem:[#allocation22_spill] sm:$0xff] %v5053_v53  ;;  %v5075_v53 = vpop.f32.mrf.mxu1 }
 0x123   : > { %v5055_v55 = vpop.f32.mrf.mxu0 }
 0x124   : > { %6187 = vst [vmem:[#allocation23_spill] sm:$0xff] %v5055_v55 }
 0x125   : > { %v5059_v61 = vpop.f32.mrf.mxu0 }
 0x126   : > { %6188 = vst [vmem:[#allocation24_spill] sm:$0xff] %v5059_v61  ;;  %v5081_v61 = vpop.f32.mrf.mxu1 }
 0x127   : > { %v5061_v63 = vpop.f32.mrf.mxu0 }
 0x128   : > { %6189 = vst [vmem:[#allocation25_spill] sm:$0xff] %v5061_v63 }
 0x129   : > { %v5065_v4 = vpop.f32.mrf.mxu0 }
 0x12a   : > { %6190 = vst [vmem:[#allocation26_spill] sm:$0xff] %v5065_v4  ;;  %v5087_v4 = vpop.f32.mrf.mxu1 }
 0x12b   : > { %v5067_v32 = vpop.f32.mrf.mxu0 }
 0x12c   : > { %6191 = vst [vmem:[#allocation27_spill] sm:$0xff] %v5067_v32 }
 0x12d   : > { %v5071_v27 = vpop.f32.mrf.mxu0 }
 0x12e   : > { %6192 = vst [vmem:[#allocation28_spill] sm:$0xff] %v5071_v27  ;;  %v5093_v27 = vpop.f32.mrf.mxu1 }
 0x12f   : > { %v5073_v23 = vpop.f32.mrf.mxu0  ;;  %6200 = vst [vmem:[#allocation36_spill] sm:$0xff] %v5093_v27 }
 0x130   : > { %6193 = vst [vmem:[#allocation29_spill] sm:$0xff] %v5073_v23 }
 0x131   : > { %v5077_v55 = vpop.f32.mrf.mxu0 }
 0x132   : > { %6194 = vst [vmem:[#allocation30_spill] sm:$0xff] %v5077_v55  ;;  %v5099_v55 = vpop.f32.mrf.mxu1 }
 0x133   : > { %v5079_v45 = vpop.f32.mrf.mxu0  ;;  %6203 = vst [vmem:[#allocation39_spill] sm:$0xff] %v5099_v55 }
 0x134   : > { %6195 = vst [vmem:[#allocation31_spill] sm:$0xff] %v5079_v45 }
 0x135   : > { %v5083_v63 = vpop.f32.mrf.mxu0 }
 0x136   : > { %6196 = vst [vmem:[#allocation32_spill] sm:$0xff] %v5083_v63 }
 0x137   : > { %v5085_v40 = vpop.f32.mrf.mxu0 }
 0x138   : > { %6197 = vst [vmem:[#allocation33_spill] sm:$0xff] %v5085_v40  ;;  %v4305_v40 = vld [vmem:[%s6157_s3 + $0x74] ss:$8 sps:$4 sm:$0xff]  }
 0x139   : > { %v5089_v32 = vpop.f32.mrf.mxu0  ;;  %1958 = vmatprep.subr.bf16.mxu1 %v4305_v40 }
 0x13a   : > { %6198 = vst [vmem:[#allocation34_spill] sm:$0xff] %v5089_v32  ;;  %v5108_v32 = vpop.f32.mrf.mxu1 }
 0x13b   : > { %v5091_v36 = vpop.f32.mrf.mxu0  ;;  %6206 = vst [vmem:[#allocation42_spill] sm:$0xff] %v5108_v32 }
 0x13c   : > { %6199 = vst [vmem:[#allocation35_spill] sm:$0xff] %v5091_v36 }
 0x13d   : > { %v5095_v23 = vpop.f32.mrf.mxu0 }
 0x13e   : > { %6201 = vst [vmem:[#allocation37_spill] sm:$0xff] %v5095_v23  ;;  %v5114_v23 = vpop.f32.mrf.mxu1 }
 0x13f   : > { %v5097_v35 = vpop.f32.mrf.mxu0  ;;  %6209 = vst [vmem:[#allocation45_spill] sm:$0xff] %v5114_v23 }
 0x140   : > { %6202 = vst [vmem:[#allocation38_spill] sm:$0xff] %v5097_v35 }
 0x141   : > { %v5101_v45 = vpop.f32.mrf.mxu0 }
 0x142   : > { %6204 = vst [vmem:[#allocation40_spill] sm:$0xff] %v5101_v45  ;;  %v5120_v45 = vpop.f32.mrf.mxu1 }
 0x143   : > { %v5106_v63 = vpop.f32.mrf.mxu0  ;;  %6212 = vst [vmem:[#allocation48_spill] sm:$0xff] %v5120_v45 }
 0x144   : > { %6205 = vst [vmem:[#allocation41_spill] sm:$0xff] %v5106_v63  ;;  %v5126_v63 = vpop.f32.mrf.mxu1 }
 0x145   : > { %v5110_v36 = vpop.f32.mrf.mxu0  ;;  %6215 = vst [vmem:[#allocation51_spill] sm:$0xff] %v5126_v63 }
 0x146   : > { %6207 = vst [vmem:[#allocation43_spill] sm:$0xff] %v5110_v36  ;;  %v5132_v36 = vpop.f32.mrf.mxu1 }
 0x147   : > { %v5112_v21 = vpop.f32.mrf.mxu0  ;;  %6218 = vst [vmem:[#allocation54_spill] sm:$0xff] %v5132_v36 }
 0x148   : > { %6208 = vst [vmem:[#allocation44_spill] sm:$0xff] %v5112_v21 }
 0x149   : > { %v5116_v35 = vpop.f32.mrf.mxu0 }
 0x14a   : > { %6210 = vst [vmem:[#allocation46_spill] sm:$0xff] %v5116_v35  ;;  %v867_v35 = vadd.f32 %v4868_v39, %v4843_v26 }
 0x14b   : > { %v5118_v55 = vpop.f32.mrf.mxu0 }
 0x14c   : > { %6211 = vst [vmem:[#allocation47_spill] sm:$0xff] %v5118_v55  ;;  %v865_v55 = vadd.f32 %v4858_v34, %v4835_v22  ;;  %v871_v22 = vadd.f32 %v4882_v46, %v4851_v31  ;;  %v879_v46 = vadd.f32 %v4907_v58, %v4873_v41 }
 0x14d   : > { %v5122_v19 = vpop.f32.mrf.mxu0 }
 0x14e   : > { %6213 = vst [vmem:[#allocation49_spill] sm:$0xff] %v5122_v19  ;;  %v5140_v19 = vpop.f32.mrf.mxu1 }
 0x14f   : > { %v5124_v27 = vpop.f32.mrf.mxu0  ;;  %6220 = vst [vmem:[#allocation56_spill] sm:$0xff] %v5140_v19 }
 0x150   : > { %6214 = vst [vmem:[#allocation50_spill] sm:$0xff] %v5124_v27  ;;  %v5149_v36 = vpop.f32.mrf.mxu1 }
 0x151   : > { %v5128_v40 = vpop.f32.mrf.mxu0 }
 0x152   : > { %6216 = vst [vmem:[#allocation52_spill] sm:$0xff] %v5128_v40  ;;  %v4320_v40 = vld [vmem:[%s6157_s3 + $0x274] ss:$8 sps:$4 sm:$0xff]  }
 0x153   : > { %v5130_v32 = vpop.f32.mrf.mxu0  ;;  %2724 = vmatprep.subr.bf16.mxu0 %v4320_v40 }
 0x154   : > { %6217 = vst [vmem:[#allocation53_spill] sm:$0xff] %v5130_v32 }
 0x155   : > { %v5134_v21 = vpop.f32.mrf.mxu0 }
 0x156   : > { %6219 = vst [vmem:[#allocation55_spill] sm:$0xff] %v5134_v21  ;;  %v869_v21 = vadd.f32 %v4875_v43, %v4847_v28 }
 0x157   : > { %v1182_v23 = vpop.f32.mrf.mxu0 }
 0x158   : > { %v1341_v63 = vadd.f32 %v1182_v23, %v865_v55  ;;  %v875_v23 = vadd.f32 %v4890_v49, %v4855_v33  ;;  %v5155_v55 = vpop.f32.mrf.mxu1 }
 0x159   : > { %v1184_v27 = vpop.f32.mrf.mxu0 }
 0x15a   : > { %v1342_v32 = vadd.f32 %v1184_v27, %v867_v35  ;;  %v877_v27 = vadd.f32 %v4900_v54, %v4863_v37 }
 0x15b   : > { %v1186_v45 = vpop.f32.mrf.mxu0 }
 0x15c   : > { %v1405_v34 = vmax.f32 %v1341_v63, %v1342_v32  ;;  %v1343_v39 = vadd.f32 %v1186_v45, %v869_v21  ;;  %v881_v21 = vadd.f32 %v4917_v62, %v4877_v44  ;;  %v5161_v63 = vpop.f32.mrf.mxu1  ;;  %v5172_v44 = vld [vmem:[%s6156_s2] ss:$0 sm:$0xff] }
 0x15d   : > { %v1188_v26 = vpop.f32.mrf.mxu0 }
 0x15e   : > { %1437 = vst [vmem:[#allocation2] sm:$0xff] %v1405_v34  ;;  %v1344_v19 = vadd.f32 %v1188_v26, %v871_v22  ;;  %v5167_v22 = vpop.f32.mrf.mxu1  ;;  %v4488_v34 = vmov 0.0  }
 0x15f   : > { %v1192_v17 = vpop.f32.mrf.mxu0  ;;  %1603 = vst [vmem:[#allocation3 + $0x80] sm:$0xff] %v4488_v34 }
 0x160   : > { %v1406_v35 = vmax.f32 %v1343_v39, %v1344_v19  ;;  %v1345_v31 = vadd.f32 %v1192_v17, %v875_v23  ;;  %v885_v19 = vadd.f32 %v4928_v2, %v4887_v48  ;;  %v887_v17 = vadd.f32 %v4941_v9, %v4895_v52 }
 0x161   : > { %v1194_v28 = vpop.f32.mrf.mxu0  ;;  %v889_v52 = vadd.f32 %v4951_v14, %v4905_v56  ;;  %v891_v9 = vadd.f32 %v4973_v25, %v4909_v59  ;;  %v897_v56 = vadd.f32 %v5013_v0, %v4933_v6 }
 0x162   : > { %1438 = vst [vmem:[#allocation2 + $0x8] sm:$0xff] %v1406_v35  ;;  %v1346_v32 = vadd.f32 %v1194_v28, %v877_v27  ;;  %v5180_v35 = vpop.f32.mrf.mxu1 }
 0x163   : > { %v1196_v43 = vpop.f32.mrf.mxu0 }
 0x164   : > { %v1407_v45 = vmax.f32 %v1345_v31, %v1346_v32  ;;  %v1347_v37 = vadd.f32 %v1196_v43, %v879_v46  ;;  %v5186_v59 = vpop.f32.mrf.mxu1 }
 0x165   : > { %v1198_v33 = vpop.f32.mrf.mxu0 }
 0x166   : > { %1439 = vst [vmem:[#allocation2 + $0x10] sm:$0xff] %v1407_v45  ;;  %v1348_v49 = vadd.f32 %v1198_v33, %v881_v21  ;;  %v895_v21 = vadd.f32 %v4991_v47, %v4925_v1  ;;  %v901_v1 = vadd.f32 %v5027_v13, %v4953_v15  ;;  %v5195_v0 = vpop.f32.mrf.mxu1 }
 0x167   : > { %v1202_v54 = vpop.f32.mrf.mxu0 }
 0x168   : > { %v1408_v40 = vmax.f32 %v1347_v37, %v1348_v49  ;;  %v1349_v48 = vadd.f32 %v1202_v54, %v885_v19 }
 0x169   : > { %v1469_v41 = vld [vmem:[#allocation2] ss:$2 sm:$0xff]  ;;  %v1501_v58 = vld [vmem:[#allocation2 + $0x1] ss:$2 sm:$0xff]  ;;  %v1204_v62 = vpop.f32.mrf.mxu0 }
 0x16a   : > { %v1532_v26 = vmax.f32 %v1469_v41, %v1501_v58  ;;  %1440 = vst [vmem:[#allocation2 + $0x18] sm:$0xff] %v1408_v40  ;;  %v1350_v2 = vadd.f32 %v1204_v62, %v887_v17  ;;  %v899_v17 = vadd.f32 %v5019_v8, %v4949_v12  ;;  %v907_v12 = vadd.f32 %v5039_v24, %v4975_v29  ;;  %v5204_v8 = vpop.f32.mrf.mxu1 }
 0x16b   : > { %v1206_v39 = vpop.f32.mrf.mxu0  ;;  %v911_v29 = vadd.f32 %v5051_v51, %v4993_v50 }
 0x16c   : > { %v1555_v23 = vadd.f32 %v5172_v44, %v1532_v26  ;;  %v1409_v27 = vmax.f32 %v1349_v48, %v1350_v2  ;;  %v1351_v32 = vadd.f32 %v1206_v39, %v889_v52  ;;  %v905_v48 = vadd.f32 %v5033_v18, %v4967_v20 }
 0x16d   : > { %v1208_v28 = vpop.f32.mrf.mxu0  ;;  %v909_v20 = vadd.f32 %v5045_v38, %v4989_v42  ;;  %v917_v42 = vadd.f32 %v5063_v7, %v5015_v3 }
 0x16e   : > { %v1571_v31 = vmax.f32 %v1555_v23, 0.0  ;;  %1441 = vst [vmem:[#allocation2 + $0x20] sm:$0xff] %v1409_v27  ;;  %v1352_v43 = vadd.f32 %v1208_v28, %v891_v9  ;;  %v5211_v28 = vpop.f32.mrf.mxu1 }
 0x16f   : > { %v1212_v46 = vpop.f32.mrf.mxu0 }
 0x170   : > { %1587 = vst [vmem:[#allocation3] sm:$0xff] %v1571_v31  ;;  %v1410_v14 = vmax.f32 %v1351_v32, %v1352_v43  ;;  %v1353_v49 = vadd.f32 %v1212_v46, %v895_v21  ;;  %v5217_v50 = vpop.f32.mrf.mxu1 }
 0x171   : > { %v1471_v25 = vld [vmem:[#allocation2 + $0x10] ss:$2 sm:$0xff]  ;;  %v1503_v45 = vld [vmem:[#allocation2 + $0x11] ss:$2 sm:$0xff]  ;;  %v1214_v33 = vpop.f32.mrf.mxu0 }
 0x172   : > { %v1533_v37 = vmax.f32 %v1471_v25, %v1503_v45  ;;  %1442 = vst [vmem:[#allocation2 + $0x28] sm:$0xff] %v1410_v14  ;;  %v1354_v54 = vadd.f32 %v1214_v33, %v897_v56  ;;  %v915_v56 = vadd.f32 %v5057_v57, %v5007_v60  ;;  %v921_v60 = vadd.f32 %v5075_v53, %v5021_v10  ;;  %v5224_v7 = vpop.f32.mrf.mxu1 }
 0x173   : > { %v1216_v19 = vpop.f32.mrf.mxu0  ;;  %v927_v10 = vadd.f32 %v5087_v4, %v5029_v16 }
 0x174   : > { %v5193_v6 = vadd.f32 %v5172_v44, %v1533_v37  ;;  %v1411_v47 = vmax.f32 %v1353_v49, %v1354_v54  ;;  %v1355_v58 = vadd.f32 %v1216_v19, %v899_v17  ;;  %v919_v54 = vadd.f32 %v5069_v30, %v5017_v5 }
 0x175   : > { %v1218_v40 = vpop.f32.mrf.mxu0 }
 0x176   : > { %v1572_v41 = vmax.f32 %v5193_v6, 0.0  ;;  %1443 = vst [vmem:[#allocation2 + $0x30] sm:$0xff] %v1411_v47  ;;  %v1356_v62 = vadd.f32 %v1218_v40, %v901_v1  ;;  %v4359_v6 = vld [vmem:[%s6157_s3 + $0x1d4] ss:$8 sps:$4 sm:$0xff]  }
 0x177   : > { %v1222_v26 = vpop.f32.mrf.mxu0 }
 0x178   : > { %1588 = vst [vmem:[#allocation3 + $0x8] sm:$0xff] %v1572_v41  ;;  %v1412_v15 = vmax.f32 %v1355_v58, %v1356_v62  ;;  %v1357_v9 = vadd.f32 %v1222_v26, %v905_v48  ;;  %v925_v58 = vadd.f32 %v5081_v61, %v5023_v11  ;;  %v4318_v11 = vld [vmem:[%s6157_s3 + $0x270] ss:$8 sps:$4 sm:$0xff]   ;;  %v5239_v61 = vpop.f32.mrf.mxu1 }
 0x179   : > { %v1473_v13 = vld [vmem:[#allocation2 + $0x20] ss:$2 sm:$0xff]  ;;  %v1505_v2 = vld [vmem:[#allocation2 + $0x21] ss:$2 sm:$0xff]  ;;  %v1224_v39 = vpop.f32.mrf.mxu0 }
 0x17a   : > { %v1534_v52 = vmax.f32 %v1473_v13, %v1505_v2  ;;  %1444 = vst [vmem:[#allocation2 + $0x38] sm:$0xff] %v1412_v15  ;;  %v1358_v23 = vadd.f32 %v1224_v39, %v907_v12  ;;  %v4303_v15 = vld [vmem:[%s6157_s3 + $0x70] ss:$8 sps:$4 sm:$0xff]   ;;  %v4308_v13 = vld [vmem:[%s6157_s3 + $0x64] ss:$8 sps:$4 sm:$0xff]  }
 0x17b   : > { %v1226_v27 = vpop.f32.mrf.mxu0  ;;  %v4323_v39 = vld [vmem:[%s6157_s3 + $0x264] ss:$8 sps:$4 sm:$0xff]  }
 0x17c   : > { %v1557_v18 = vadd.f32 %v5172_v44, %v1534_v52  ;;  %v1413_v24 = vmax.f32 %v1357_v9, %v1358_v23  ;;  %v1359_v43 = vadd.f32 %v1226_v27, %v909_v20  ;;  %v6221_v20 = vld [vmem:[#allocation15_spill] sm:$0xff] }
 0x17d   : > { %v1228_v31 = vpop.f32.mrf.mxu0 }
 0x17e   : > { %v1573_v32 = vmax.f32 %v1557_v18, 0.0  ;;  %1445 = vst [vmem:[#allocation2 + $0x40] sm:$0xff] %v1413_v24  ;;  %v1360_v46 = vadd.f32 %v1228_v31, %v911_v29  ;;  %v6222_v29 = vld [vmem:[#allocation36_spill] sm:$0xff]  ;;  %v6223_v31 = vmov 0  }
 0x17f   : > { %v1232_v21 = vpop.f32.mrf.mxu0  ;;  %v1644_v47 = vld [vmem:[#allocation3 + $0x1] sm:$0xff]  ;;  %v929_v18 = vadd.f32 %v6222_v29, %v6221_v20 }
 0x180   : > { %1589 = vst [vmem:[#allocation3 + $0x10] sm:$0xff] %v1573_v32  ;;  %v1414_v38 = vmax.f32 %v1359_v43, %v1360_v46  ;;  %v1361_v33 = vadd.f32 %v1232_v21, %v915_v56  ;;  %v2071_v30 = vld [vmem:[#allocation3 + $0x2] sm:$0xff]  ;;  %v6225_v46 = vld [vmem:[#allocation39_spill] sm:$0xff] }
 0x181   : > { %v1475_v51 = vld [vmem:[#allocation2 + $0x30] ss:$2 sm:$0xff]  ;;  %v1507_v14 = vld [vmem:[#allocation2 + $0x31] ss:$2 sm:$0xff]  ;;  %v1234_v25 = vpop.f32.mrf.mxu0  ;;  %v6224_v43 = vld [vmem:[#allocation16_spill] sm:$0xff] }
 0x182   : > { %v1535_v45 = vmax.f32 %v1475_v51, %v1507_v14  ;;  %1446 = vst [vmem:[#allocation2 + $0x48] sm:$0xff] %v1414_v38  ;;  %v1362_v37 = vadd.f32 %v1234_v25, %v917_v42  ;;  %v931_v21 = vadd.f32 %v6225_v46, %v6224_v43  ;;  %v4306_v42 = vld [vmem:[%s6157_s3 + $0x60] ss:$8 sps:$4 sm:$0xff]   ;;  %v5261_v51 = vpop.f32.mrf.mxu1  ;;  %v4311_v25 = vld [vmem:[%s6157_s3 + $0x54] ss:$8 sps:$4 sm:$0xff]  }
 0x183   : > { %v1236_v49 = vpop.f32.mrf.mxu0  ;;  %v4321_v38 = vld [vmem:[%s6157_s3 + $0x260] ss:$8 sps:$4 sm:$0xff]  }
 0x184   : > { %v1415_v57 = vmax.f32 %v1361_v33, %v1362_v37  ;;  %v1558_v3 = vadd.f32 %v5172_v44, %v1535_v45  ;;  %v1363_v17 = vadd.f32 %v1236_v49, %v919_v54  ;;  %v4329_v45 = vld [vmem:[%s6157_s3 + $0x254] ss:$8 sps:$4 sm:$0xff]   ;;  %v4312_v20 = vld [vmem:[%s6157_s3 + $0x40] ss:$8 sps:$4 sm:$0xff]  }
 0x185   : > { %v1238_v19 = vpop.f32.mrf.mxu0  ;;  %v4330_v43 = vld [vmem:[%s6157_s3 + $0x240] ss:$8 sps:$4 sm:$0xff]  }
 0x186   : > { %1447 = vst [vmem:[#allocation2 + $0x50] sm:$0xff] %v1415_v57  ;;  %v1364_v1 = vadd.f32 %v1238_v19, %v921_v60  ;;  %v1574_v40 = vmax.f32 %v1558_v3, 0.0  ;;  %v6226_v60 = vld [vmem:[#allocation17_spill] sm:$0xff]  ;;  %v6227_v57 = vld [vmem:[#allocation42_spill] sm:$0xff] }
 0x187   : > { %v1242_v62 = vpop.f32.mrf.mxu0  ;;  %v1645_v26 = vld [vmem:[#allocation3 + $0x9] sm:$0xff]  ;;  %v935_v3 = vadd.f32 %v6227_v57, %v6226_v60  ;;  %v6237_v60 = vld [vmem:[#allocation56_spill] sm:$0xff] }
 0x188   : > { %v2072_v5 = vld [vmem:[#allocation3 + $0xa] sm:$0xff]  ;;  %v1416_v53 = vmax.f32 %v1363_v17, %v1364_v1  ;;  %v1677_v48 = vpack.c.bf16 %v1645_v26, %v1644_v47  ;;  %1590 = vst [vmem:[#allocation3 + $0x18] sm:$0xff] %v1574_v40  ;;  %v5244_v52 = vpack.c.bf16 %v1574_v40, %v1573_v32  ;;  %v1365_v23 = vadd.f32 %v1242_v62, %v925_v58  ;;  %v5283_v26 = vpop.f32.mrf.mxu1 }
 0x189   : > { %v2104_v12 = vpack.c.bf16 %v2072_v5, %v2071_v30  ;;  %v1477_v2 = vld [vmem:[#allocation2 + $0x40] ss:$2 sm:$0xff]  ;;  %v1509_v4 = vld [vmem:[#allocation2 + $0x41] ss:$2 sm:$0xff]  ;;  %v1244_v16 = vpop.f32.mrf.mxu0  ;;  %v6228_v19 = vld [vmem:[#allocation18_spill] sm:$0xff] }
 0x18a   : > { %v1536_v9 = vmax.f32 %v1477_v2, %v1509_v4  ;;  %1448 = vst [vmem:[#allocation2 + $0x58] sm:$0xff] %v1416_v53  ;;  %v1366_v27 = vadd.f32 %v1244_v16, %v927_v10  ;;  %1798 = vmatmul.mubr.bf16.vlgmr.msra.gmra.mxu1 %v1677_v48  ;;  %v6229_v17 = vld [vmem:[#allocation45_spill] sm:$0xff]  ;;  %v4309_v40 = vld [vmem:[%s6157_s3 + $0x50] ss:$8 sps:$4 sm:$0xff]   ;;  %v6232_v16 = vld [vmem:[#allocation20_spill] sm:$0xff]  ;;  %v5296_v29 = vpop.f32.mrf.mxu1 }
 0x18b   : > { %2225 = vmatmul.mubr.bf16.vlgmr.msra.gmra.mxu0 %v2104_v12  ;;  %v1246_v24 = vpop.f32.mrf.mxu0  ;;  %1807 = vmatprep.mubr.bf16.mxu1 %v6223_v31  ;;  %v937_v1 = vadd.f32 %v6229_v17, %v6228_v19  ;;  %v4314_v58 = vld [vmem:[%s6157_s3 + $0x44] ss:$8 sps:$4 sm:$0xff]   ;;  %v4327_v62 = vld [vmem:[%s6157_s3 + $0x250] ss:$8 sps:$4 sm:$0xff]  }
 0x18c   : > { %2234 = vmatprep.mubr.bf16.mxu0 %v6223_v31  ;;  %v1417_v56 = vmax.f32 %v1365_v23, %v1366_v27  ;;  %v5253_v32 = vadd.f32 %v5172_v44, %v1536_v9  ;;  %1959 = vmatpush1.bf16.msra.mxu1 %v4303_v15  ;;  %v1367_v33 = vadd.f32 %v1246_v24, %v929_v18  ;;  %v4332_v53 = vld [vmem:[%s6157_s3 + $0x244] ss:$8 sps:$4 sm:$0xff]   ;;  %v4317_v24 = vld [vmem:[%s6157_s3 + $0x34] ss:$8 sps:$4 sm:$0xff]  }
 0x18d   : > { %2725 = vmatpush1.bf16.msra.mxu0 %v4318_v11  ;;  %v1248_v14 = vpop.f32.mrf.mxu0  ;;  %1960 = vmatprep.subr.bf16.mxu1 %v4308_v13  ;;  %v6230_v13 = vld [vmem:[#allocation19_spill] sm:$0xff]  ;;  %v6231_v11 = vld [vmem:[#allocation48_spill] sm:$0xff] }
 0x18e   : > { %2726 = vmatprep.subr.bf16.mxu0 %v4323_v39  ;;  %1449 = vst [vmem:[#allocation2 + $0x60] sm:$0xff] %v1417_v56  ;;  %v1368_v37 = vadd.f32 %v1248_v14, %v931_v21  ;;  %v1575_v49 = vmax.f32 %v5253_v32, 0.0  ;;  %v939_v2 = vadd.f32 %v6231_v11, %v6230_v13  ;;  %v6233_v39 = vld [vmem:[#allocation51_spill] sm:$0xff]  ;;  %v4341_v13 = vld [vmem:[%s6157_s3 + $0x224] ss:$8 sps:$4 sm:$0xff]  }
 0x18f   : > { %v1252_v54 = vpop.f32.mrf.mxu0  ;;  %v941_v9 = vadd.f32 %v6233_v39, %v6232_v16  ;;  %v1646_v56 = vld [vmem:[#allocation3 + $0x11] sm:$0xff] }
 0x190   : > { %v1418_v47 = vmax.f32 %v1367_v33, %v1368_v37  ;;  %1591 = vst [vmem:[#allocation3 + $0x20] sm:$0xff] %v1575_v49  ;;  %1961 = vmatpush1.bf16.msra.mxu1 %v4306_v42  ;;  %v1369_v12 = vadd.f32 %v1252_v54, %v935_v3  ;;  %v6234_v42 = vld [vmem:[#allocation21_spill] sm:$0xff]  ;;  %v2073_v33 = vld [vmem:[#allocation3 + $0x12] sm:$0xff] }
 0x191   : > { %2727 = vmatpush1.bf16.msra.mxu0 %v4321_v38  ;;  %v1479_v30 = vld [vmem:[#allocation2 + $0x50] ss:$2 sm:$0xff]  ;;  %v1511_v5 = vld [vmem:[#allocation2 + $0x51] ss:$2 sm:$0xff]  ;;  %v1254_v10 = vpop.f32.mrf.mxu0  ;;  %1962 = vmatprep.subr.bf16.mxu1 %v4311_v25 }
 0x192   : > { %2728 = vmatprep.subr.bf16.mxu0 %v4329_v45  ;;  %v1537_v48 = vmax.f32 %v1479_v30, %v1511_v5  ;;  %1450 = vst [vmem:[#allocation2 + $0x68] sm:$0xff] %v1418_v47  ;;  %v1370_v15 = vadd.f32 %v1254_v10, %v937_v1  ;;  %v6235_v38 = vld [vmem:[#allocation54_spill] sm:$0xff]  ;;  %v4326_v47 = vld [vmem:[%s6157_s3 + $0x24] ss:$8 sps:$4 sm:$0xff]   ;;  %v6238_v11 = vld [vmem:[#allocation23_spill] sm:$0xff] }
 0x193   : > { %v1256_v4 = vpop.f32.mrf.mxu0  ;;  %v945_v14 = vadd.f32 %v6235_v38, %v6234_v42  ;;  %v6236_v54 = vld [vmem:[#allocation22_spill] sm:$0xff] }
 0x194   : > { %v1419_v23 = vmax.f32 %v1369_v12, %v1370_v15  ;;  %v1560_v27 = vadd.f32 %v5172_v44, %v1537_v48  ;;  %1963 = vmatpush1.bf16.msra.mxu1 %v4309_v40  ;;  %v1371_v46 = vadd.f32 %v1256_v4, %v939_v2  ;;  %v947_v57 = vadd.f32 %v6237_v60, %v6236_v54  ;;  %v4315_v1 = vld [vmem:[%s6157_s3 + $0x30] ss:$8 sps:$4 sm:$0xff]   ;;  %v4338_v40 = vld [vmem:[%s6157_s3 + $0x234] ss:$8 sps:$4 sm:$0xff]  }
 0x195   : > { %2729 = vmatpush1.bf16.msra.mxu0 %v4327_v62  ;;  %v1258_v18 = vpop.f32.mrf.mxu0  ;;  %1964 = vmatprep.subr.bf16.mxu1 %v4314_v58  ;;  %v5317_v58 = vpop.f32.mrf.mxu1  ;;  %v4336_v10 = vld [vmem:[%s6157_s3 + $0x230] ss:$8 sps:$4 sm:$0xff]   ;;  %v949_v2 = vadd.f32 %v5149_v36, %v6238_v11 }
 0x196   : > { %2730 = vmatprep.subr.bf16.mxu0 %v4332_v53  ;;  %1451 = vst [vmem:[#allocation2 + $0x70] sm:$0xff] %v1419_v23  ;;  %v1372_v21 = vadd.f32 %v1258_v18, %v941_v9  ;;  %v1576_v32 = vmax.f32 %v1560_v27, 0.0  ;;  %v4324_v23 = vld [vmem:[%s6157_s3 + $0x20] ss:$8 sps:$4 sm:$0xff]   ;;  %v6241_v42 = vld [vmem:[#allocation26_spill] sm:$0xff] }
 0x197   : > { %v1262_v25 = vpop.f32.mrf.mxu0  ;;  %v1647_v45 = vld [vmem:[#allocation3 + $0x19] sm:$0xff]  ;;  %v5339_v27 = vpop.f32.mrf.mxu1  ;;  %v957_v38 = vadd.f32 %v5167_v22, %v6241_v42 }
 0x198   : > { %v2074_v37 = vld [vmem:[#allocation3 + $0x1a] sm:$0xff]  ;;  %v1420_v3 = vmax.f32 %v1371_v46, %v1372_v21  ;;  %v1678_v19 = vpack.c.bf16 %v1647_v45, %v1646_v56  ;;  %1592 = vst [vmem:[#allocation3 + $0x28] sm:$0xff] %v1576_v32  ;;  %1965 = vmatpush1.bf16.msra.mxu1 %v4312_v20  ;;  %v5322_v53 = vpack.c.bf16 %v1576_v32, %v1575_v49  ;;  %v6240_v56 = vld [vmem:[#allocation25_spill] sm:$0xff] }
 0x199   : > { %v2105_v17 = vpack.c.bf16 %v2074_v37, %v2073_v33  ;;  %v1481_v62 = vld [vmem:[#allocation2 + $0x60] ss:$2 sm:$0xff]  ;;  %v1513_v30 = vld [vmem:[#allocation2 + $0x61] ss:$2 sm:$0xff]  ;;  %v1264_v5 = vpop.f32.mrf.mxu0  ;;  %1966 = vmatprep.subr.bf16.mxu1 %v4317_v24  ;;  %2731 = vmatpush1.bf16.msra.mxu0 %v4330_v43  ;;  %v1373_v12 = vadd.f32 %v1262_v25, %v945_v14  ;;  %v4335_v20 = vld [vmem:[%s6157_s3 + $0x14] ss:$8 sps:$4 sm:$0xff]   ;;  %v955_v32 = vadd.f32 %v5161_v63, %v6240_v56  ;;  %v5361_v33 = vpop.f32.mrf.mxu1 }
 0x19a   : > { %v1538_v48 = vmax.f32 %v1481_v62, %v1513_v30  ;;  %1452 = vst [vmem:[#allocation2 + $0x78] sm:$0xff] %v1420_v3  ;;  %v1374_v15 = vadd.f32 %v1264_v5, %v947_v57  ;;  %1808 = vmatmul.mubr.bf16.gmra.mxu1 %v1678_v19  ;;  %v6239_v49 = vld [vmem:[#allocation24_spill] sm:$0xff]  ;;  %2732 = vmatprep.subr.bf16.mxu0 %v4338_v40  ;;  %v4347_v46 = vld [vmem:[%s6157_s3 + $0x214] ss:$8 sps:$4 sm:$0xff]   ;;  %v4333_v25 = vld [vmem:[%s6157_s3 + $0x10] ss:$8 sps:$4 sm:$0xff]  }
 0x19b   : > { %2235 = vmatmul.mubr.bf16.gmra.mxu0 %v2105_v17  ;;  %v1266_v4 = vpop.f32.mrf.mxu0  ;;  %1817 = vmatprep.mubr.bf16.mxu1 %v6223_v31  ;;  %v951_v16 = vadd.f32 %v5155_v55, %v6239_v49  ;;  %v4339_v55 = vld [vmem:[%s6157_s3 + $0x220] ss:$8 sps:$4 sm:$0xff]   ;;  %v4344_v45 = vld [vmem:[%s6157_s3 + $0x4] ss:$8 sps:$4 sm:$0xff]   ;;  %v4345_v63 = vld [vmem:[%s6157_s3 + $0x210] ss:$8 sps:$4 sm:$0xff]  }
 0x19c   : > { %2244 = vmatprep.mubr.bf16.mxu0 %v6223_v31  ;;  %v1421_v39 = vmax.f32 %v1373_v12, %v1374_v15  ;;  %v5334_v9 = vadd.f32 %v5172_v44, %v1538_v48  ;;  %1967 = vmatpush1.bf16.msra.mxu1 %v4315_v1  ;;  %v1375_v18 = vadd.f32 %v1266_v4, %v949_v2  ;;  %v4350_v19 = vld [vmem:[%s6157_s3 + $0x204] ss:$8 sps:$4 sm:$0xff]   ;;  %v6242_v1 = vld [vmem:[#allocation27_spill] sm:$0xff]  ;;  %v5377_v48 = vpop.f32.mrf.mxu1 }
 0x19d   : > { %v1268_v36 = vpop.f32.mrf.mxu0  ;;  %1968 = vmatprep.subr.bf16.mxu1 %v4326_v47  ;;  %2733 = vmatpush1.bf16.msra.mxu0 %v4336_v10  ;;  %v959_v47 = vadd.f32 %v5180_v35, %v6242_v1  ;;  %v6243_v40 = vld [vmem:[#allocation28_spill] sm:$0xff]  ;;  %v6244_v4 = vld [vmem:[#allocation29_spill] sm:$0xff] }
 0x19e   : > { %1453 = vst [vmem:[#allocation2 + $0x80] sm:$0xff] %v1421_v39  ;;  %v1376_v24 = vadd.f32 %v1268_v36, %v951_v16  ;;  %v1577_v43 = vmax.f32 %v5334_v9, 0.0  ;;  %2734 = vmatprep.subr.bf16.mxu0 %v4341_v13  ;;  %v961_v62 = vadd.f32 %v5186_v59, %v6243_v40  ;;  %v4342_v10 = vld [vmem:[%s6157_s3] ss:$8 sps:$4 sm:$0xff]   ;;  %v4353_v59 = vld [vmem:[%s6157_s3 + $0x1f4] ss:$8 sps:$4 sm:$0xff]   ;;  %v965_v49 = vadd.f32 %v5195_v0, %v6244_v4 }
 0x19f   : > { %v1272_v21 = vpop.f32.mrf.mxu0  ;;  %v4348_v35 = vld [vmem:[%s6157_s3 + $0x200] ss:$8 sps:$4 sm:$0xff]   ;;  %v6245_v36 = vld [vmem:[#allocation30_spill] sm:$0xff] }
 0x1a0   : > { %v1422_v14 = vmax.f32 %v1375_v18, %v1376_v24  ;;  %1593 = vst [vmem:[#allocation3 + $0x30] sm:$0xff] %v1577_v43  ;;  %1969 = vmatpush1.bf16.msra.mxu1 %v4324_v23  ;;  %v1377_v57 = vadd.f32 %v1272_v21, %v955_v32  ;;  %v1648_v11 = vld [vmem:[#allocation3 + $0x21] sm:$0xff] }
 0x1a1   : > { %v1483_v37 = vld [vmem:[#allocation2 + $0x70] ss:$2 sm:$0xff]  ;;  %v1515_v54 = vld [vmem:[#allocation2 + $0x71] ss:$2 sm:$0xff]  ;;  %v1274_v60 = vpop.f32.mrf.mxu0  ;;  %1970 = vmatprep.subr.bf16.mxu1 %v4335_v20  ;;  %2735 = vmatpush1.bf16.msra.mxu0 %v4339_v55  ;;  %v2075_v9 = vld [vmem:[#allocation3 + $0x22] sm:$0xff]  ;;  %v967_v20 = vadd.f32 %v5204_v8, %v6245_v36 }
 0x1a2   : > { %v1539_v22 = vmax.f32 %v1483_v37, %v1515_v54  ;;  %1454 = vst [vmem:[#allocation2 + $0x88] sm:$0xff] %v1422_v14  ;;  %v1378_v3 = vadd.f32 %v1274_v60, %v957_v38  ;;  %2736 = vmatprep.subr.bf16.mxu0 %v4347_v46  ;;  %v5389_v46 = vpop.f32.mrf.mxu1  ;;  %v6247_v37 = vld [vmem:[#allocation32_spill] sm:$0xff]  ;;  %v6248_v1 = vld [vmem:[#allocation33_spill] sm:$0xff]  ;;  %v6252_v36 = vld [vmem:[#allocation38_spill] sm:$0xff] }
 0x1a3   : > { %v1276_v17 = vpop.f32.mrf.mxu0  ;;  %v971_v54 = vadd.f32 %v5217_v50, %v6247_v37 }
 0x1a4   : > { %v1423_v30 = vmax.f32 %v1377_v57, %v1378_v3  ;;  %v1562_v5 = vadd.f32 %v5172_v44, %v1539_v22  ;;  %1971 = vmatpush1.bf16.msra.mxu1 %v4333_v25  ;;  %v1379_v15 = vadd.f32 %v1276_v17, %v959_v47  ;;  %v6246_v25 = vld [vmem:[#allocation31_spill] sm:$0xff]  ;;  %v975_v47 = vadd.f32 %v5224_v7, %v6248_v1 }
 0x1a5   : > { %v1278_v12 = vpop.f32.mrf.mxu0  ;;  %1972 = vmatprep.subr.bf16.mxu1 %v4344_v45  ;;  %2737 = vmatpush1.bf16.msra.mxu0 %v4345_v63  ;;  %v969_v45 = vadd.f32 %v5211_v28, %v6246_v25  ;;  %v5401_v63 = vpop.f32.mrf.mxu1  ;;  %v6249_v28 = vld [vmem:[#allocation34_spill] sm:$0xff] }
 0x1a6   : > { %1455 = vst [vmem:[#allocation2 + $0x90] sm:$0xff] %v1423_v30  ;;  %v1380_v13 = vadd.f32 %v1278_v12, %v961_v62  ;;  %v1578_v2 = vmax.f32 %v1562_v5, 0.0  ;;  %2738 = vmatprep.subr.bf16.mxu0 %v4350_v19  ;;  %v977_v40 = vadd.f32 %v5239_v61, %v6249_v28 }
 0x1a7   : > { %v1282_v16 = vpop.f32.mrf.mxu0  ;;  %v1649_v39 = vld [vmem:[#allocation3 + $0x29] sm:$0xff]  ;;  %v5407_v62 = vpop.f32.mrf.mxu1 }
 0x1a8   : > { %v2076_v23 = vld [vmem:[#allocation3 + $0x2a] sm:$0xff]  ;;  %v1424_v55 = vmax.f32 %v1379_v15, %v1380_v13  ;;  %v1679_v18 = vpack.c.bf16 %v1649_v39, %v1648_v11  ;;  %1594 = vst [vmem:[#allocation3 + $0x38] sm:$0xff] %v1578_v2  ;;  %1973 = vmatpush1.bf16.msra.mxu1 %v4342_v10  ;;  %v5391_v0 = vpack.c.bf16 %v1578_v2, %v1577_v43  ;;  %v6250_v15 = vld [vmem:[#allocation35_spill] sm:$0xff] }
 0x1a9   : > { %v2106_v24 = vpack.c.bf16 %v2076_v23, %v2075_v9  ;;  %v1485_v21 = vld [vmem:[#allocation2 + $0x80] ss:$2 sm:$0xff]  ;;  %v1517_v56 = vld [vmem:[#allocation2 + $0x81] ss:$2 sm:$0xff]  ;;  %v1284_v32 = vpop.f32.mrf.mxu0  ;;  %2739 = vmatpush1.bf16.msra.mxu0 %v4348_v35  ;;  %2458 = vmatprep.subr.bf16.mxu1 %v4353_v59  ;;  %v1381_v38 = vadd.f32 %v1282_v16, %v965_v49  ;;  %v979_v13 = vadd.f32 %v5261_v51, %v6250_v15  ;;  %v5414_v4 = vpop.f32.mrf.mxu1 }
 0x1aa   : > { %v1540_v42 = vmax.f32 %v1485_v21, %v1517_v56  ;;  %1456 = vst [vmem:[#allocation2 + $0x98] sm:$0xff] %v1424_v55  ;;  %v1382_v14 = vadd.f32 %v1284_v32, %v967_v20  ;;  %1818 = vmatmul.mubr.bf16.gmra.mxu1 %v1679_v18  ;;  %4118 = vmatprep.subr.bf16.mxu0 %v4488_v34  ;;  %v6251_v11 = vld [vmem:[#allocation37_spill] sm:$0xff]  ;;  %v6253_v21 = vld [vmem:[#allocation40_spill] sm:$0xff] }
 0x1ab   : > { %2245 = vmatmul.mubr.bf16.gmra.mxu0 %v2106_v24  ;;  %v1286_v8 = vpop.f32.mrf.mxu0  ;;  %1827 = vmatprep.mubr.bf16.mxu1 %v6223_v31  ;;  %v981_v7 = vadd.f32 %v5283_v26, %v6251_v11  ;;  %v985_v20 = vadd.f32 %v5296_v29, %v6252_v36  ;;  %v987_v26 = vadd.f32 %v5317_v58, %v6253_v21  ;;  %v6254_v58 = vld [vmem:[#allocation41_spill] sm:$0xff] }
 0x1ac   : > { %2254 = vmatprep.mubr.bf16.mxu0 %v6223_v31  ;;  %v1425_v60 = vmax.f32 %v1381_v38, %v1382_v14  ;;  %v1563_v43 = vadd.f32 %v5172_v44, %v1540_v42  ;;  %v1383_v57 = vadd.f32 %v1286_v8, %v969_v45  ;;  %v1006_v38 = vpop.f32.mrf.mxu1 }
 0x1ad   : > { %v1288_v22 = vpop.f32.mrf.mxu0 }
 0x1ae   : > { %1457 = vst [vmem:[#allocation2 + $0xa0] sm:$0xff] %v1425_v60  ;;  %v1384_v3 = vadd.f32 %v1288_v22, %v971_v54  ;;  %v1579_v19 = vmax.f32 %v1563_v43, 0.0  ;;  %v989_v43 = vadd.f32 %v5339_v27, %v6254_v58  ;;  %v6255_v22 = vld [vmem:[#allocation43_spill] sm:$0xff] }
 0x1af   : > { %v1292_v17 = vpop.f32.mrf.mxu0  ;;  %v1650_v9 = vld [vmem:[#allocation3 + $0x31] sm:$0xff] }
 0x1b0   : > { %v1426_v50 = vmax.f32 %v1383_v57, %v1384_v3  ;;  %1595 = vst [vmem:[#allocation3 + $0x40] sm:$0xff] %v1579_v19  ;;  %v1385_v12 = vadd.f32 %v1292_v17, %v975_v47  ;;  %v2077_v51 = vld [vmem:[#allocation3 + $0x32] sm:$0xff]  ;;  %v991_v57 = vadd.f32 %v5361_v33, %v6255_v22  ;;  %v1008_v17 = vpop.f32.mrf.mxu1 }
 0x1b1   : > { %v1487_v30 = vld [vmem:[#allocation2 + $0x90] ss:$2 sm:$0xff]  ;;  %v1519_v34 = vld [vmem:[#allocation2 + $0x91] ss:$2 sm:$0xff]  ;;  %v1294_v5 = vpop.f32.mrf.mxu0 }
 0x1b2   : > { %v1541_v10 = vmax.f32 %v1487_v30, %v1519_v34  ;;  %1458 = vst [vmem:[#allocation2 + $0xa8] sm:$0xff] %v1426_v50  ;;  %v1386_v35 = vadd.f32 %v1294_v5, %v977_v40  ;;  %v6256_v30 = vld [vmem:[#allocation44_spill] sm:$0xff]  ;;  %v6257_v5 = vld [vmem:[#allocation46_spill] sm:$0xff] }
 0x1b3   : > { %v1296_v59 = vpop.f32.mrf.mxu0  ;;  %v995_v34 = vadd.f32 %v5377_v48, %v6256_v30 }
 0x1b4   : > { %v1427_v2 = vmax.f32 %v1385_v12, %v1386_v35  ;;  %v1564_v61 = vadd.f32 %v5172_v44, %v1541_v10  ;;  %v1387_v16 = vadd.f32 %v1296_v59, %v979_v13  ;;  %v997_v10 = vadd.f32 %v5389_v46, %v6257_v5  ;;  %v1010_v12 = vpop.f32.mrf.mxu1  ;;  %v6264_v5 = vld [vmem:[#allocation11_spill] sm:$0xff] }
 0x1b5   : > { %v1298_v49 = vpop.f32.mrf.mxu0 }
 0x1b6   : > { %1459 = vst [vmem:[#allocation2 + $0xb0] sm:$0xff] %v1427_v2  ;;  %v1388_v39 = vadd.f32 %v1298_v49, %v981_v7  ;;  %v1580_v23 = vmax.f32 %v1564_v61, 0.0  ;;  %v6258_v2 = vld [vmem:[#allocation47_spill] sm:$0xff]  ;;  %v6259_v49 = vld [vmem:[#allocation49_spill] sm:$0xff] }
 0x1b7   : > { %v1302_v55 = vpop.f32.mrf.mxu0  ;;  %v1651_v18 = vld [vmem:[#allocation3 + $0x39] sm:$0xff]  ;;  %v999_v61 = vadd.f32 %v5401_v63, %v6258_v2  ;;  %v1001_v48 = vadd.f32 %v5407_v62, %v6259_v49 }
 0x1b8   : > { %v2078_v24 = vld [vmem:[#allocation3 + $0x3a] sm:$0xff]  ;;  %v1428_v56 = vmax.f32 %v1387_v16, %v1388_v39  ;;  %v1680_v32 = vpack.c.bf16 %v1651_v18, %v1650_v9  ;;  %1596 = vst [vmem:[#allocation3 + $0x48] sm:$0xff] %v1580_v23  ;;  %v5420_v45 = vpack.c.bf16 %v1580_v23, %v1579_v19  ;;  %v1389_v29 = vadd.f32 %v1302_v55, %v985_v20  ;;  %v1014_v39 = vpop.f32.mrf.mxu1  ;;  %v6260_v18 = vld [vmem:[#allocation50_spill] sm:$0xff] }
 0x1b9   : > { %v2107_v42 = vpack.c.bf16 %v2078_v24, %v2077_v51  ;;  %v1489_v14 = vld [vmem:[#allocation2 + $0xa0] ss:$2 sm:$0xff]  ;;  %v1521_v8 = vld [vmem:[#allocation2 + $0xa1] ss:$2 sm:$0xff]  ;;  %v1304_v25 = vpop.f32.mrf.mxu0  ;;  %v1005_v51 = vadd.f32 %v5414_v4, %v6260_v18 }
 0x1ba   : > { %v1542_v37 = vmax.f32 %v1489_v14, %v1521_v8  ;;  %1460 = vst [vmem:[#allocation2 + $0xb8] sm:$0xff] %v1428_v56  ;;  %v1390_v54 = vadd.f32 %v1304_v25, %v987_v26  ;;  %1828 = vmatmul.mubr.bf16.gmra.mxu1 %v1680_v32  ;;  %v6261_v56 = vld [vmem:[#allocation52_spill] sm:$0xff]  ;;  %v1016_v8 = vpop.f32.mrf.mxu1 }
 0x1bb   : > { %2255 = vmatmul.mubr.bf16.gmra.mxu0 %v2107_v42  ;;  %v1306_v60 = vpop.f32.mrf.mxu0  ;;  %1837 = vmatprep.mubr.bf16.mxu1 %v6223_v31  ;;  %v1007_v32 = vadd.f32 %v1006_v38, %v6261_v56  ;;  %v6262_v38 = vld [vmem:[#allocation53_spill] sm:$0xff] }
 0x1bc   : > { %2264 = vmatprep.mubr.bf16.mxu0 %v6223_v31  ;;  %v1429_v3 = vmax.f32 %v1389_v29, %v1390_v54  ;;  %v1565_v19 = vadd.f32 %v5172_v44, %v1542_v37  ;;  %v1391_v47 = vadd.f32 %v1306_v60, %v989_v43  ;;  %v1009_v22 = vadd.f32 %v1008_v17, %v6262_v38 }
 0x1bd   : > { %v1308_v1 = vpop.f32.mrf.mxu0 }
 0x1be   : > { %1461 = vst [vmem:[#allocation2 + $0xc0] sm:$0xff] %v1429_v3  ;;  %v1392_v28 = vadd.f32 %v1308_v1, %v991_v57  ;;  %v1581_v40 = vmax.f32 %v1565_v19, 0.0  ;;  %v6263_v57 = vld [vmem:[#allocation55_spill] sm:$0xff] }
 0x1bf   : > { %v1312_v50 = vpop.f32.mrf.mxu0  ;;  %v1652_v20 = vld [vmem:[#allocation3 + $0x41] sm:$0xff]  ;;  %v1011_v3 = vadd.f32 %v1010_v12, %v6263_v57 }
 0x1c0   : > { %v1430_v27 = vmax.f32 %v1391_v47, %v1392_v28  ;;  %1597 = vst [vmem:[#allocation3 + $0x50] sm:$0xff] %v1581_v40  ;;  %v1393_v13 = vadd.f32 %v1312_v50, %v995_v34  ;;  %v2079_v26 = vld [vmem:[#allocation3 + $0x42] sm:$0xff]  ;;  %v1018_v47 = vpop.f32.mrf.mxu1 }
 0x1c1   : > { %v1491_v33 = vld [vmem:[#allocation2 + $0xb0] ss:$2 sm:$0xff]  ;;  %v1523_v35 = vld [vmem:[#allocation2 + $0xb1] ss:$2 sm:$0xff]  ;;  %v1314_v59 = vpop.f32.mrf.mxu0 }
 0x1c2   : > { %v1543_v15 = vmax.f32 %v1491_v33, %v1523_v35  ;;  %1462 = vst [vmem:[#allocation2 + $0xc8] sm:$0xff] %v1430_v27  ;;  %v1394_v11 = vadd.f32 %v1314_v59, %v997_v10  ;;  %v1015_v10 = vadd.f32 %v1014_v39, %v6264_v5  ;;  %v6265_v27 = vld [vmem:[#allocation12_spill] sm:$0xff]  ;;  %v1020_v59 = vpop.f32.mrf.mxu1  ;;  %v4351_v5 = vld [vmem:[%s6157_s3 + $0x1f0] ss:$8 sps:$4 sm:$0xff]  }
 0x1c3   : > { %v1316_v7 = vpop.f32.mrf.mxu0  ;;  %v1017_v33 = vadd.f32 %v1016_v8, %v6265_v27  ;;  %v2603_v27 = vld [vmem:[#allocation3 + $0x4] sm:$0xff] }
 0x1c4   : > { %v1431_v16 = vmax.f32 %v1393_v13, %v1394_v11  ;;  %v1566_v46 = vadd.f32 %v5172_v44, %v1543_v15  ;;  %v1395_v23 = vadd.f32 %v1316_v7, %v999_v61  ;;  %v6266_v61 = vld [vmem:[#allocation13_spill] sm:$0xff] }
 0x1c5   : > { %v1318_v9 = vpop.f32.mrf.mxu0  ;;  %v1019_v49 = vadd.f32 %v1018_v47, %v6266_v61  ;;  %v2607_v61 = vld [vmem:[#allocation3 + $0x24] sm:$0xff] }
 0x1c6   : > { %1463 = vst [vmem:[#allocation2 + $0xd0] sm:$0xff] %v1431_v16  ;;  %v1396_v36 = vadd.f32 %v1318_v9, %v1001_v48  ;;  %v1582_v55 = vmax.f32 %v1566_v46, 0.0  ;;  %v6267_v48 = vld [vmem:[#allocation14_spill] sm:$0xff] }
 0x1c7   : > { %v1322_v24 = vpop.f32.mrf.mxu0  ;;  %v1653_v21 = vld [vmem:[#allocation3 + $0x49] sm:$0xff]  ;;  %v1021_v16 = vadd.f32 %v1020_v59, %v6267_v48 }
 0x1c8   : > { %v2080_v63 = vld [vmem:[#allocation3 + $0x4a] sm:$0xff]  ;;  %v1432_v62 = vmax.f32 %v1395_v23, %v1396_v36  ;;  %v1681_v42 = vpack.c.bf16 %v1653_v21, %v1652_v20  ;;  %1598 = vst [vmem:[#allocation3 + $0x58] sm:$0xff] %v1582_v55  ;;  %v5441_v54 = vpack.c.bf16 %v1582_v55, %v1581_v40  ;;  %v1397_v58 = vadd.f32 %v1322_v24, %v1005_v51 }
 0x1c9   : > { %v2108_v14 = vpack.c.bf16 %v2080_v63, %v2079_v26  ;;  %v1493_v25 = vld [vmem:[#allocation2 + $0xc0] ss:$2 sm:$0xff]  ;;  %v1525_v37 = vld [vmem:[#allocation2 + $0xc1] ss:$2 sm:$0xff]  ;;  %v1324_v29 = vpop.f32.mrf.mxu0 }
 0x1ca   : > { %v1544_v60 = vmax.f32 %v1493_v25, %v1525_v37  ;;  %1464 = vst [vmem:[#allocation2 + $0xd8] sm:$0xff] %v1432_v62  ;;  %v1398_v4 = vadd.f32 %v1324_v29, %v1007_v32  ;;  %1838 = vmatmul.mubr.bf16.gmra.mxu1 %v1681_v42  ;;  %v4354_v59 = vld [vmem:[%s6157_s3 + $0x1e0] ss:$8 sps:$4 sm:$0xff]   ;;  %v4368_v48 = vld [vmem:[%s6157_s3 + $0x1a4] ss:$8 sps:$4 sm:$0xff]  }
 0x1cb   : > { %2265 = vmatmul.mubr.bf16.gmra.mxu0 %v2108_v14  ;;  %v1326_v43 = vpop.f32.mrf.mxu0  ;;  %1847 = vmatprep.mubr.bf16.mxu1 %v6223_v31 }
 0x1cc   : > { %2274 = vmatprep.mubr.bf16.mxu0 %v6223_v31  ;;  %v1433_v19 = vmax.f32 %v1397_v58, %v1398_v4  ;;  %v1567_v1 = vadd.f32 %v5172_v44, %v1544_v60  ;;  %v1399_v40 = vadd.f32 %v1326_v43, %v1009_v22 }
 0x1cd   : > { %v1328_v28 = vpop.f32.mrf.mxu0 }
 0x1ce   : > { %1465 = vst [vmem:[#allocation2 + $0xe0] sm:$0xff] %v1433_v19  ;;  %v1400_v50 = vadd.f32 %v1328_v28, %v1011_v3  ;;  %v1583_v30 = vmax.f32 %v1567_v1, 0.0 }
 0x1cf   : > { %v1332_v34 = vpop.f32.mrf.mxu0  ;;  %v1654_v20 = vld [vmem:[#allocation3 + $0x51] sm:$0xff] }
 0x1d0   : > { %v1434_v35 = vmax.f32 %v1399_v40, %v1400_v50  ;;  %1599 = vst [vmem:[#allocation3 + $0x60] sm:$0xff] %v1583_v30  ;;  %v1401_v11 = vadd.f32 %v1332_v34, %v1015_v10  ;;  %v2081_v51 = vld [vmem:[#allocation3 + $0x52] sm:$0xff] }
 0x1d1   : > { %v1495_v17 = vld [vmem:[#allocation2 + $0xd0] ss:$2 sm:$0xff]  ;;  %v1527_v15 = vld [vmem:[#allocation2 + $0xd1] ss:$2 sm:$0xff]  ;;  %v1334_v12 = vpop.f32.mrf.mxu0 }
 0x1d2   : > { %v1545_v13 = vmax.f32 %v1495_v17, %v1527_v15  ;;  %1466 = vst [vmem:[#allocation2 + $0xe8] sm:$0xff] %v1434_v35  ;;  %v1402_v7 = vadd.f32 %v1334_v12, %v1017_v33  ;;  %v2604_v34 = vld [vmem:[#allocation3 + $0xc] sm:$0xff]  ;;  %v2605_v17 = vld [vmem:[#allocation3 + $0x14] sm:$0xff] }
 0x1d3   : > { %v1336_v2 = vpop.f32.mrf.mxu0  ;;  %v2636_v33 = vpack.c.bf16 %v2604_v34, %v2603_v27  ;;  %v4356_v35 = vld [vmem:[%s6157_s3 + $0x1e4] ss:$8 sps:$4 sm:$0xff]   ;;  %v4357_v15 = vld [vmem:[%s6157_s3 + $0x1d0] ss:$8 sps:$4 sm:$0xff]  }
 0x1d4   : > { %v1435_v46 = vmax.f32 %v1401_v11, %v1402_v7  ;;  %v1568_v39 = vadd.f32 %v5172_v44, %v1545_v13  ;;  %v1403_v23 = vadd.f32 %v1336_v2, %v1019_v49  ;;  %v4362_v13 = vld [vmem:[%s6157_s3 + $0x1c4] ss:$8 sps:$4 sm:$0xff]   ;;  %v4360_v11 = vld [vmem:[%s6157_s3 + $0x1c0] ss:$8 sps:$4 sm:$0xff]   ;;  %v4365_v7 = vld [vmem:[%s6157_s3 + $0x1b4] ss:$8 sps:$4 sm:$0xff]  }
 0x1d5   : > { %v1338_v9 = vpop.f32.mrf.mxu0  ;;  %v2608_v2 = vld [vmem:[#allocation3 + $0x2c] sm:$0xff] }
 0x1d6   : > { %1467 = vst [vmem:[#allocation2 + $0xf0] sm:$0xff] %v1435_v46  ;;  %v1404_v36 = vadd.f32 %v1338_v9, %v1021_v16  ;;  %v1584_v55 = vmax.f32 %v1568_v39, 0.0  ;;  %v2638_v49 = vpack.c.bf16 %v2608_v2, %v2607_v61  ;;  %v4366_v16 = vld [vmem:[%s6157_s3 + $0x1a0] ss:$8 sps:$4 sm:$0xff]   ;;  %v4371_v46 = vld [vmem:[%s6157_s3 + $0x194] ss:$8 sps:$4 sm:$0xff]  }
 0x1d7   : > { %v1655_v18 = vld [vmem:[#allocation3 + $0x59] sm:$0xff] }
 0x1d8   : > { %v2082_v24 = vld [vmem:[#allocation3 + $0x5a] sm:$0xff]  ;;  %v1436_v21 = vmax.f32 %v1403_v23, %v1404_v36  ;;  %v1682_v26 = vpack.c.bf16 %v1655_v18, %v1654_v20  ;;  %1600 = vst [vmem:[#allocation3 + $0x68] sm:$0xff] %v1584_v55  ;;  %v5453_v62 = vpack.c.bf16 %v1584_v55, %v1583_v30  ;;  %v4374_v36 = vld [vmem:[%s6157_s3 + $0x184] ss:$8 sps:$4 sm:$0xff]  }
 0x1d9   : > { %v2109_v63 = vpack.c.bf16 %v2082_v24, %v2081_v51  ;;  %v1497_v56 = vld [vmem:[#allocation2 + $0xe0] ss:$2 sm:$0xff]  ;;  %v1529_v32 = vld [vmem:[#allocation2 + $0xe1] ss:$2 sm:$0xff]  ;;  %v2609_v9 = vld [vmem:[#allocation3 + $0x34] sm:$0xff] }
 0x1da   : > { %v1546_v42 = vmax.f32 %v1497_v56, %v1529_v32  ;;  %1468 = vst [vmem:[#allocation2 + $0xf8] sm:$0xff] %v1436_v21  ;;  %1848 = vmatmul.mubr.bf16.gmra.mxu1 %v1682_v26  ;;  %v1604_v30 = vld [vmem:[#allocation3] sm:$0xff]  ;;  %v2612_v55 = vld [vmem:[#allocation3 + $0x4c] sm:$0xff]  ;;  %v2613_v21 = vld [vmem:[#allocation3 + $0x54] sm:$0xff] }
 0x1db   : > { %2275 = vmatmul.mubr.bf16.gmra.mxu0 %v2109_v63  ;;  %1857 = vmatprep.mubr.bf16.mxu1 %v6223_v31  ;;  %v1636_v10 = vpack.c.bf16 %v1572_v41, %v1604_v30  ;;  %v2606_v41 = vld [vmem:[#allocation3 + $0x1c] sm:$0xff]  ;;  %v2611_v18 = vld [vmem:[#allocation3 + $0x44] sm:$0xff]  ;;  %v2347_v34 = vld [vmem:[#allocation3 + $0x53] sm:$0xff] }
 0x1dc   : > { %2284 = vmatprep.mubr.bf16.mxu0 %v6223_v31  ;;  %v1569_v14 = vadd.f32 %v5172_v44, %v1546_v42  ;;  %v2637_v12 = vpack.c.bf16 %v2606_v41, %v2605_v17  ;;  %v2610_v39 = vld [vmem:[#allocation3 + $0x3c] sm:$0xff]  ;;  %v2640_v51 = vpack.c.bf16 %v2612_v55, %v2611_v18 }
 0x1dd   : > { %v2639_v23 = vpack.c.bf16 %v2610_v39, %v2609_v9  ;;  %v4372_v20 = vld [vmem:[%s6157_s3 + $0x180] ss:$8 sps:$4 sm:$0xff]  }
 0x1de   : > { %v1585_v8 = vmax.f32 %v1569_v14, 0.0  ;;  %v5523_v24 = vld [vmem:[#allocation3 + $0x80] sm:$0xff] }
 0x1df   : > { %v1656_v58 = vld [vmem:[#allocation3 + $0x61] sm:$0xff]  ;;  %6268 = vst [vmem:[#allocation15_spill] sm:$0xff] %v5523_v24 }
 0x1e0   : > { %1601 = vst [vmem:[#allocation3 + $0x70] sm:$0xff] %v1585_v8  ;;  %v2083_v38 = vld [vmem:[#allocation3 + $0x62] sm:$0xff] }
 0x1e1   : > { %v1499_v25 = vld [vmem:[#allocation2 + $0xf0] ss:$2 sm:$0xff]  ;;  %v1531_v37 = vld [vmem:[#allocation2 + $0xf1] ss:$2 sm:$0xff]  ;;  %v2615_v56 = vld [vmem:[#allocation3 + $0x64] sm:$0xff] }
 0x1e2   : > { %v1547_v29 = vmax.f32 %v1499_v25, %v1531_v37  ;;  %v2339_v37 = vld [vmem:[#allocation3 + $0x13] sm:$0xff] }
 0x1e4   : > { %v1570_v60 = vadd.f32 %v5172_v44, %v1547_v29 }
 0x1e6   : > { %v1586_v4 = vmax.f32 %v1570_v60, 0.0  ;;  %v2342_v60 = vld [vmem:[#allocation3 + $0x2b] sm:$0xff] }
 0x1e7   : > { %v1657_v43 = vld [vmem:[#allocation3 + $0x69] sm:$0xff] }
 0x1e8   : > { %v2084_v22 = vld [vmem:[#allocation3 + $0x6a] sm:$0xff]  ;;  %v1683_v57 = vpack.c.bf16 %v1657_v43, %v1656_v58  ;;  %1602 = vst [vmem:[#allocation3 + $0x78] sm:$0xff] %v1586_v4  ;;  %v5459_v19 = vpack.c.bf16 %v1586_v4, %v1585_v8  ;;  %v2344_v43 = vld [vmem:[#allocation3 + $0x3b] sm:$0xff] }
 0x1e9   : > { %v2110_v3 = vpack.c.bf16 %v2084_v22, %v2083_v38  ;;  %v2616_v63 = vld [vmem:[#allocation3 + $0x6c] sm:$0xff]  ;;  %v2337_v8 = vld [vmem:[#allocation3 + $0x3] sm:$0xff] }
 0x1ea   : > { %1858 = vmatmul.mubr.bf16.gmra.mxu1 %v1683_v57  ;;  %v2642_v32 = vpack.c.bf16 %v2616_v63, %v2615_v56  ;;  %v2341_v58 = vld [vmem:[#allocation3 + $0x23] sm:$0xff]  ;;  %v2343_v38 = vld [vmem:[#allocation3 + $0x33] sm:$0xff]  ;;  %v2346_v57 = vld [vmem:[#allocation3 + $0x4b] sm:$0xff] }
 0x1eb   : > { %2285 = vmatmul.mubr.bf16.gmra.mxu0 %v2110_v3  ;;  %1867 = vmatprep.mubr.bf16.mxu1 %v6223_v31  ;;  %v2372_v4 = vpack.c.bf16 %v2342_v60, %v2341_v58  ;;  %v2373_v22 = vpack.c.bf16 %v2344_v43, %v2343_v38 }
 0x1ec   : > { %2294 = vmatprep.mubr.bf16.mxu0 %v6223_v31 }
 0x1ef   : > { %v1658_v1 = vld [vmem:[#allocation3 + $0x71] sm:$0xff]  ;;  %v1659_v47 = vld [vmem:[#allocation3 + $0x79] sm:$0xff] }
 0x1f0   : > { %v2085_v28 = vld [vmem:[#allocation3 + $0x72] sm:$0xff]  ;;  %v1684_v44 = vpack.c.bf16 %v1659_v47, %v1658_v1  ;;  %v2086_v40 = vld [vmem:[#allocation3 + $0x7a] sm:$0xff]  ;;  %v2345_v1 = vld [vmem:[#allocation3 + $0x43] sm:$0xff] }
 0x1f1   : > { %v2111_v50 = vpack.c.bf16 %v2086_v40, %v2085_v28  ;;  %v2618_v42 = vld [vmem:[#allocation3 + $0x7c] sm:$0xff]  ;;  %v2374_v47 = vpack.c.bf16 %v2346_v57, %v2345_v1 }
 0x1f2   : > { %1868 = vmatmul.mubr.bf16.gmra.mxu1 %v1684_v44  ;;  %v2348_v40 = vld [vmem:[#allocation3 + $0x5b] sm:$0xff] }
 0x1f3   : > { %2295 = vmatmul.mubr.bf16.gmra.mxu0 %v2111_v50  ;;  %1990 = vmatprep.mubr.bf16.mxu1 %v6223_v31  ;;  %v4375_v1 = vld [vmem:[%s6159_s5 + $0x78] sm:$0xff]  }
 0x1f4   : > { %2756 = vmatprep.mubr.bf16.mxu0 %v6223_v31 }
 0x1fa   : > { %1991 = vmatmul.mubr.bf16.vlgmr.msra.gmra.mxu1 %v1636_v10 }
 0x1fb   : > { %2757 = vmatmul.mubr.bf16.vlgmr.msra.gmra.mxu0 %v2636_v33  ;;  %2459 = vmatpush1.bf16.msra.mxu1 %v4351_v5  ;;  %v2375_v5 = vpack.c.bf16 %v2348_v40, %v2347_v34 }
 0x1fc   : > { %2000 = vmatprep.mubr.bf16.mxu1 %v6223_v31  ;;  %2766 = vmatprep.mubr.bf16.mxu0 %v6223_v31 }
 0x1fd   : > { %2460 = vmatprep.subr.bf16.mxu1 %v4356_v35 }
 0x1ff   : > { %2461 = vmatpush1.bf16.msra.mxu1 %v4354_v59  ;;  %v2350_v59 = vld [vmem:[#allocation3 + $0x6b] sm:$0xff] }
 0x200   : > { %2462 = vmatprep.subr.bf16.mxu1 %v4359_v6  ;;  %v2349_v6 = vld [vmem:[#allocation3 + $0x63] sm:$0xff] }
 0x202   : > { %2001 = vmatmul.mubr.bf16.gmra.mxu1 %v5244_v52  ;;  %v4363_v52 = vld [vmem:[%s6157_s3 + $0x1b0] ss:$8 sps:$4 sm:$0xff]  }
 0x203   : > { %2767 = vmatmul.mubr.bf16.gmra.mxu0 %v2637_v12  ;;  %2010 = vmatprep.mubr.bf16.mxu1 %v6223_v31 }
 0x204   : > { %2776 = vmatprep.mubr.bf16.mxu0 %v6223_v31  ;;  %2463 = vmatpush1.bf16.msra.mxu1 %v4357_v15  ;;  %v2376_v15 = vpack.c.bf16 %v2350_v59, %v2349_v6 }
 0x205   : > { %2464 = vmatprep.subr.bf16.mxu1 %v4362_v13 }
 0x208   : > { %2465 = vmatpush1.bf16.msra.mxu1 %v4360_v11  ;;  %v2351_v11 = vld [vmem:[#allocation3 + $0x73] sm:$0xff] }
 0x209   : > { %2466 = vmatprep.subr.bf16.mxu1 %v4365_v7  ;;  %v2352_v7 = vld [vmem:[#allocation3 + $0x7b] sm:$0xff] }
 0x20a   : > { %2011 = vmatmul.mubr.bf16.gmra.mxu1 %v5322_v53  ;;  %v4369_v53 = vld [vmem:[%s6157_s3 + $0x190] ss:$8 sps:$4 sm:$0xff]  }
 0x20b   : > { %2777 = vmatmul.mubr.bf16.gmra.mxu0 %v2638_v49  ;;  %2020 = vmatprep.mubr.bf16.mxu1 %v6223_v31 }
 0x20c   : > { %2786 = vmatprep.mubr.bf16.mxu0 %v6223_v31  ;;  %2467 = vmatpush1.bf16.msra.mxu1 %v4363_v52  ;;  %v2377_v52 = vpack.c.bf16 %v2352_v7, %v2351_v11  ;;  %v4376_v7 = vld [vmem:[%s6159_s5 + $0x70] sm:$0xff]  }
 0x20d   : > { %2468 = vmatprep.subr.bf16.mxu1 %v4368_v48 }
 0x210   : > { %2469 = vmatpush1.bf16.msra.mxu1 %v4366_v16 }
 0x211   : > { %2470 = vmatprep.subr.bf16.mxu1 %v4371_v46 }
 0x212   : > { %2021 = vmatmul.mubr.bf16.gmra.mxu1 %v5391_v0  ;;  %v2614_v0 = vld [vmem:[#allocation3 + $0x5c] sm:$0xff] }
 0x213   : > { %2787 = vmatmul.mubr.bf16.gmra.mxu0 %v2639_v23  ;;  %2030 = vmatprep.mubr.bf16.mxu1 %v6223_v31  ;;  %v2641_v26 = vpack.c.bf16 %v2614_v0, %v2613_v21 }
 0x214   : > { %2796 = vmatprep.mubr.bf16.mxu0 %v6223_v31  ;;  %2471 = vmatpush1.bf16.msra.mxu1 %v4369_v53 }
 0x215   : > { %2472 = vmatprep.subr.bf16.mxu1 %v4374_v36 }
 0x218   : > { %2473 = vmatpush1.bf16.msra.mxu1 %v4372_v20 }
 0x219   : > { %4078 = vmatprep.subr.bf16.mxu1 %v5523_v24 }
 0x21a   : > { %2031 = vmatmul.mubr.bf16.gmra.mxu1 %v5420_v45  ;;  %v2617_v45 = vld [vmem:[#allocation3 + $0x74] sm:$0xff] }
 0x21b   : > { %2797 = vmatmul.mubr.bf16.gmra.mxu0 %v2640_v51  ;;  %2040 = vmatprep.mubr.bf16.mxu1 %v6223_v31  ;;  %v2643_v14 = vpack.c.bf16 %v2618_v42, %v2617_v45 }
 0x21c   : > { %2806 = vmatprep.mubr.bf16.mxu0 %v6223_v31 }
 0x222   : > { %2041 = vmatmul.mubr.bf16.gmra.mxu1 %v5441_v54  ;;  %v2338_v54 = vld [vmem:[#allocation3 + $0xb] sm:$0xff] }
 0x223   : > { %2807 = vmatmul.mubr.bf16.gmra.mxu0 %v2641_v26  ;;  %2050 = vmatprep.mubr.bf16.mxu1 %v6223_v31  ;;  %v2370_v25 = vpack.c.bf16 %v2338_v54, %v2337_v8 }
 0x224   : > { %2816 = vmatprep.mubr.bf16.mxu0 %v6223_v31 }
 0x22a   : > { %2051 = vmatmul.mubr.bf16.gmra.mxu1 %v5453_v62  ;;  %v2340_v62 = vld [vmem:[#allocation3 + $0x1b] sm:$0xff] }
 0x22b   : > { %2817 = vmatmul.mubr.bf16.gmra.mxu0 %v2642_v32  ;;  %2060 = vmatprep.mubr.bf16.mxu1 %v6223_v31  ;;  %v2371_v29 = vpack.c.bf16 %v2340_v62, %v2339_v37 }
 0x22c   : > { %2826 = vmatprep.mubr.bf16.mxu0 %v6223_v31 }
 0x232   : > { %2061 = vmatmul.mubr.bf16.gmra.mxu1 %v5459_v19 }
 0x233   : > { %2827 = vmatmul.mubr.bf16.gmra.mxu0 %v2643_v14  ;;  %2490 = vmatprep.mubr.bf16.mxu1 %v6223_v31 }
 0x234   : > { %4134 = vmatprep.mubr.msk.bf16.mxu0 %vm4489_vm2, %v5523_v24 }
 0x23a   : > { %2491 = vmatmul.mubr.bf16.vlgmr.msra.gmra.mxu1 %v2370_v25 }
 0x23b   : > { %2500 = vmatprep.mubr.bf16.mxu1 %v6223_v31  ;;  %4079 = vmatpush3.bf16.msra.mxu1 %v4375_v1 }
 0x23c   : > { %4080 = vmatprep.subr.bf16.mxu1 %v5523_v24 }
 0x23f   : > { %4081 = vmatpush3.bf16.msra.mxu1 %v4376_v7 }
 0x240   : > { %4082 = vmatprep.subr.bf16.mxu1 %v5523_v24 }
 0x242   : > { %2501 = vmatmul.mubr.bf16.gmra.mxu1 %v2371_v29 }
 0x243   : > { %2510 = vmatprep.mubr.bf16.mxu1 %v6223_v31 }
 0x24a   : > { %2511 = vmatmul.mubr.bf16.gmra.mxu1 %v2372_v4  ;;  %v5541_v3 = vpop.f32.mrf.mxu1 }
 0x24b   : > { %2520 = vmatprep.mubr.bf16.mxu1 %v6223_v31  ;;  %v5543_v19 = vpop.f32.mrf.mxu0 }
 0x24c   : > { %v5545_v28 = vpop.f32.mrf.mxu1 }
 0x24d   : > { %v5547_v44 = vpop.f32.mrf.mxu0 }
 0x24e   : > { %v5550_v50 = vpop.f32.mrf.mxu1 }
 0x24f   : > { %v5552_v30 = vpop.f32.mrf.mxu0 }
 0x250   : > { %v5554_v10 = vpop.f32.mrf.mxu1 }
 0x251   : > { %v5556_v27 = vpop.f32.mrf.mxu0 }
 0x252   : > { %2521 = vmatmul.mubr.bf16.gmra.mxu1 %v2373_v22 }
 0x253   : > { %2530 = vmatprep.mubr.bf16.mxu1 %v6223_v31 }
 0x25a   : > { %2531 = vmatmul.mubr.bf16.gmra.mxu1 %v2374_v47  ;;  %v5559_v33 = vpop.f32.mrf.mxu1 }
 0x25b   : > { %2540 = vmatprep.mubr.bf16.mxu1 %v6223_v31  ;;  %v5561_v35 = vpop.f32.mrf.mxu0 }
 0x25c   : > { %v5563_v41 = vpop.f32.mrf.mxu1 }
 0x25d   : > { %v5565_v17 = vpop.f32.mrf.mxu0 }
 0x25e   : > { %v5568_v12 = vpop.f32.mrf.mxu1 }
 0x25f   : > { %v5570_v13 = vpop.f32.mrf.mxu0 }
 0x260   : > { %v5572_v2 = vpop.f32.mrf.mxu1 }
 0x261   : > { %v5574_v61 = vpop.f32.mrf.mxu0 }
 0x262   : > { %2541 = vmatmul.mubr.bf16.gmra.mxu1 %v2375_v5 }
 0x263   : > { %2550 = vmatprep.mubr.bf16.mxu1 %v6223_v31 }
 0x26a   : > { %2551 = vmatmul.mubr.bf16.gmra.mxu1 %v2376_v15  ;;  %v5576_v49 = vpop.f32.mrf.mxu1 }
 0x26b   : > { %2560 = vmatprep.mubr.bf16.mxu1 %v6223_v31  ;;  %v5578_v48 = vpop.f32.mrf.mxu0 }
 0x26c   : > { %v5580_v16 = vpop.f32.mrf.mxu1 }
 0x26d   : > { %v5582_v46 = vpop.f32.mrf.mxu0 }
 0x26e   : > { %v5584_v31 = vpop.f32.mrf.mxu1 }
 0x26f   : > { %v5586_v39 = vpop.f32.mrf.mxu0 }
 0x270   : > { %v5588_v9 = vpop.f32.mrf.mxu1 }
 0x271   : > { %v5590_v53 = vpop.f32.mrf.mxu0 }
 0x272   : > { %2561 = vmatmul.mubr.bf16.gmra.mxu1 %v2377_v52 }
 0x273   : > { %4094 = vmatprep.mubr.msk.bf16.mxu1 %vm4489_vm2, %v5523_v24 }
 0x27a   : > { %v5592_v23 = vpop.f32.mrf.mxu1 }
 0x27b   : > { %v5594_v36 = vpop.f32.mrf.mxu0 }
 0x27c   : > { %v5596_v20 = vpop.f32.mrf.mxu1 }
 0x27d   : > { %v5598_v55 = vpop.f32.mrf.mxu0 }
 0x27e   : > { %6269 = vst [vmem:[#allocation36_spill] sm:$0xff] %v5598_v55  ;;  %v5600_v18 = vpop.f32.mrf.mxu1 }
 0x27f   : > { %v5602_v51 = vpop.f32.mrf.mxu0 }
 0x280   : > { %6270 = vst [vmem:[#allocation16_spill] sm:$0xff] %v5602_v51  ;;  %v5604_v0 = vpop.f32.mrf.mxu1 }
 0x281   : > { %6271 = vst [vmem:[#allocation39_spill] sm:$0xff] %v5604_v0  ;;  %v5606_v21 = vpop.f32.mrf.mxu0 }
 0x282   : > { %6272 = vst [vmem:[#allocation17_spill] sm:$0xff] %v5606_v21 }
 0x28a   : > { %v5608_v26 = vpop.f32.mrf.mxu1 }
 0x28b   : > { %6273 = vst [vmem:[#allocation42_spill] sm:$0xff] %v5608_v26  ;;  %v5610_v63 = vpop.f32.mrf.mxu0 }
 0x28c   : > { %6274 = vst [vmem:[#allocation18_spill] sm:$0xff] %v5610_v63  ;;  %v5612_v56 = vpop.f32.mrf.mxu1 }
 0x28d   : > { %6275 = vst [vmem:[#allocation45_spill] sm:$0xff] %v5612_v56  ;;  %v5614_v32 = vpop.f32.mrf.mxu0 }
 0x28e   : > { %6276 = vst [vmem:[#allocation19_spill] sm:$0xff] %v5614_v32  ;;  %v5616_v45 = vpop.f32.mrf.mxu1 }
 0x28f   : > { %6277 = vst [vmem:[#allocation48_spill] sm:$0xff] %v5616_v45  ;;  %v5618_v42 = vpop.f32.mrf.mxu0 }
 0x290   : > { %6278 = vst [vmem:[#allocation20_spill] sm:$0xff] %v5618_v42  ;;  %v5620_v14 = vpop.f32.mrf.mxu1 }
 0x291   : > { %6279 = vst [vmem:[#allocation51_spill] sm:$0xff] %v5620_v14  ;;  %v5622_v54 = vpop.f32.mrf.mxu0 }
 0x292   : > { %6280 = vst [vmem:[#allocation21_spill] sm:$0xff] %v5622_v54 }
 0x29a   : > { %v5624_v8 = vpop.f32.mrf.mxu1 }
 0x29b   : > { %6281 = vst [vmem:[#allocation54_spill] sm:$0xff] %v5624_v8  ;;  %v5626_v25 = vpop.f32.mrf.mxu0 }
 0x29c   : > { %6282 = vst [vmem:[#allocation22_spill] sm:$0xff] %v5626_v25  ;;  %v5628_v62 = vpop.f32.mrf.mxu1  ;;  %v4389_v25 = vld [vmem:[%s6159_s5 + $0x88] sm:$0xff]  }
 0x29d   : > { %6283 = vst [vmem:[#allocation56_spill] sm:$0xff] %v5628_v62  ;;  %v5630_v37 = vpop.f32.mrf.mxu0 }
 0x29e   : > { %6284 = vst [vmem:[#allocation23_spill] sm:$0xff] %v5630_v37  ;;  %v5632_v29 = vpop.f32.mrf.mxu1  ;;  %v4387_v37 = vld [vmem:[%s6159_s5 + $0x90] sm:$0xff]  }
 0x29f   : > { %6285 = vst [vmem:[#allocation24_spill] sm:$0xff] %v5632_v29  ;;  %v5634_v60 = vpop.f32.mrf.mxu0 }
 0x2a0   : > { %6286 = vst [vmem:[#allocation25_spill] sm:$0xff] %v5634_v60  ;;  %v5636_v58 = vpop.f32.mrf.mxu1 }
 0x2a1   : > { %6287 = vst [vmem:[#allocation26_spill] sm:$0xff] %v5636_v58  ;;  %v5638_v4 = vpop.f32.mrf.mxu0 }
 0x2a2   : > { %6288 = vst [vmem:[#allocation27_spill] sm:$0xff] %v5638_v4 }
 0x2aa   : > { %v5640_v43 = vpop.f32.mrf.mxu1 }
 0x2ab   : > { %6289 = vst [vmem:[#allocation28_spill] sm:$0xff] %v5640_v43  ;;  %v5642_v38 = vpop.f32.mrf.mxu0  ;;  %v4386_v43 = vld [vmem:[%s6159_s5 + $0x98] sm:$0xff]  }
 0x2ac   : > { %6290 = vst [vmem:[#allocation29_spill] sm:$0xff] %v5642_v38  ;;  %v5644_v22 = vpop.f32.mrf.mxu1  ;;  %v4384_v38 = vld [vmem:[%s6159_s5 + $0xa0] sm:$0xff]  }
 0x2ad   : > { %6291 = vst [vmem:[#allocation30_spill] sm:$0xff] %v5644_v22  ;;  %v5646_v57 = vpop.f32.mrf.mxu0 }
 0x2ae   : > { %6292 = vst [vmem:[#allocation31_spill] sm:$0xff] %v5646_v57  ;;  %v5651_v47 = vpop.f32.mrf.mxu1  ;;  %v4383_v57 = vld [vmem:[%s6159_s5 + $0xa8] sm:$0xff]  }
 0x2af   : > { %6293 = vst [vmem:[#allocation32_spill] sm:$0xff] %v5651_v47  ;;  %v5653_v40 = vpop.f32.mrf.mxu0 }
 0x2b0   : > { %6294 = vst [vmem:[#allocation33_spill] sm:$0xff] %v5653_v40  ;;  %v5655_v34 = vpop.f32.mrf.mxu1 }
 0x2b1   : > { %6295 = vst [vmem:[#allocation34_spill] sm:$0xff] %v5655_v34  ;;  %v5657_v5 = vpop.f32.mrf.mxu0 }
 0x2b2   : > { %6296 = vst [vmem:[#allocation35_spill] sm:$0xff] %v5657_v5  ;;  %v5660_v59 = vpop.f32.mrf.mxu1 }
 0x2b3   : > { %6297 = vst [vmem:[#allocation37_spill] sm:$0xff] %v5660_v59  ;;  %v5662_v6 = vpop.f32.mrf.mxu0 }
 0x2b4   : > { %6298 = vst [vmem:[#allocation38_spill] sm:$0xff] %v5662_v6  ;;  %v5664_v15 = vpop.f32.mrf.mxu1 }
 0x2b5   : > { %6299 = vst [vmem:[#allocation40_spill] sm:$0xff] %v5664_v15  ;;  %v5666_v11 = vpop.f32.mrf.mxu0 }
 0x2b6   : > { %6300 = vst [vmem:[#allocation41_spill] sm:$0xff] %v5666_v11  ;;  %v5671_v52 = vpop.f32.mrf.mxu1  ;;  %v4380_v11 = vld [vmem:[%s6159_s5 + $0xb8] sm:$0xff]  }
 0x2b7   : > { %6301 = vst [vmem:[#allocation43_spill] sm:$0xff] %v5671_v52  ;;  %v5673_v1 = vpop.f32.mrf.mxu0  ;;  %4119 = vmatpush3.bf16.msra.mxu0 %v4380_v11 }
 0x2b8   : > { %6302 = vst [vmem:[#allocation44_spill] sm:$0xff] %v5673_v1  ;;  %v5675_v5 = vpop.f32.mrf.mxu1  ;;  %v4377_v1 = vld [vmem:[%s6159_s5 + $0x68] sm:$0xff]   ;;  %4120 = vmatprep.subr.bf16.mxu0 %v5523_v24 }
 0x2b9   : > { %6303 = vst [vmem:[#allocation46_spill] sm:$0xff] %v5675_v5  ;;  %v5678_v40 = vpop.f32.mrf.mxu0  ;;  %4083 = vmatpush3.bf16.msra.mxu1 %v4377_v1  ;;  %v4378_v1 = vld [vmem:[%s6159_s5 + $0x60] sm:$0xff]  }
 0x2ba   : > { %6304 = vst [vmem:[#allocation47_spill] sm:$0xff] %v5678_v40  ;;  %v5680_v6 = vpop.f32.mrf.mxu1  ;;  %v4381_v40 = vld [vmem:[%s6159_s5 + $0xb0] sm:$0xff]   ;;  %4084 = vmatprep.subr.bf16.mxu1 %v5523_v24 }
 0x2bb   : > { %v5691_v7 = vpop.f32.mrf.mxu0  ;;  %4121 = vmatpush3.bf16.msra.mxu0 %v4381_v40 }
 0x2bc   : > { %v5685_v15 = vpop.f32.mrf.mxu1  ;;  %4122 = vmatprep.subr.bf16.mxu0 %v5523_v24 }
 0x2bd   : > { %v5702_v11 = vpop.f32.mrf.mxu0  ;;  %4085 = vmatpush3.bf16.msra.mxu1 %v4378_v1 }
 0x2be   : > { %v5693_v5 = vpop.f32.mrf.mxu1  ;;  %4086 = vmatprep.subr.bf16.mxu1 %v5523_v24 }
 0x2bf   : > { %4123 = vmatpush3.bf16.msra.mxu0 %v4383_v57  ;;  %v5715_v40 = vpop.f32.mrf.mxu0  ;;  %v4379_v57 = vld [vmem:[%s6159_s5 + $0x58] sm:$0xff]  }
 0x2c0   : > { %v5698_v52 = vpop.f32.mrf.mxu1  ;;  %4124 = vmatprep.subr.bf16.mxu0 %v5523_v24 }
 0x2c1   : > { %v5729_v22 = vpop.f32.mrf.mxu0  ;;  %4087 = vmatpush3.bf16.msra.mxu1 %v4379_v57 }
 0x2c2   : > { %v5704_v59 = vpop.f32.mrf.mxu1  ;;  %4088 = vmatprep.subr.bf16.mxu1 %v5523_v24 }
 0x2c3   : > { %4125 = vmatpush3.bf16.msra.mxu0 %v4384_v38  ;;  %v4382_v38 = vld [vmem:[%s6159_s5 + $0x50] sm:$0xff]   ;;  %v5746_v58 = vpop.f32.mrf.mxu0 }
 0x2c4   : > { %v5709_v34 = vpop.f32.mrf.mxu1  ;;  %4126 = vmatprep.subr.bf16.mxu0 %v5523_v24 }
 0x2c5   : > { %4089 = vmatpush3.bf16.msra.mxu1 %v4382_v38  ;;  %v5764_v54 = vpop.f32.mrf.mxu0  ;;  %v4388_v38 = vld [vmem:[%s6159_s5 + $0x40] sm:$0xff]  }
 0x2c6   : > { %v5717_v47 = vpop.f32.mrf.mxu1  ;;  %4090 = vmatprep.subr.bf16.mxu1 %v5523_v24 }
 0x2c7   : > { %4127 = vmatpush3.bf16.msra.mxu0 %v4386_v43  ;;  %v4385_v43 = vld [vmem:[%s6159_s5 + $0x48] sm:$0xff]   ;;  %v5778_v8 = vpop.f32.mrf.mxu0 }
 0x2c8   : > { %v5722_v4 = vpop.f32.mrf.mxu1  ;;  %4128 = vmatprep.subr.bf16.mxu0 %v5523_v24 }
 0x2c9   : > { %4091 = vmatpush3.bf16.msra.mxu1 %v4385_v43  ;;  %v5786_v14 = vpop.f32.mrf.mxu0 }
 0x2ca   : > { %v5731_v60 = vpop.f32.mrf.mxu1  ;;  %4092 = vmatprep.subr.bf16.mxu1 %v5523_v24 }
 0x2cb   : > { %4129 = vmatpush3.bf16.msra.mxu0 %v4387_v37  ;;  %v4390_v37 = vld [vmem:[%s6159_s5 + $0x80] sm:$0xff]   ;;  %v5792_v63 = vpop.f32.mrf.mxu0 }
 0x2cc   : > { %v5736_v1 = vpop.f32.mrf.mxu1  ;;  %4130 = vmatprep.subr.bf16.mxu0 %v5523_v24 }
 0x2cd   : > { %4093 = vmatpush3.bf16.msra.mxu1 %v4388_v38  ;;  %v5798_v38 = vpop.f32.mrf.mxu0 }
 0x2ce   : > { %v5748_v29 = vpop.f32.mrf.mxu1  ;;  %4098 = vmatprep.subr.bf16.mxu1 %v5523_v24 }
 0x2cf   : > { %4131 = vmatpush3.bf16.msra.mxu0 %v4389_v25  ;;  %v5804_v26 = vpop.f32.mrf.mxu0 }
 0x2d0   : > { %v5757_v57 = vpop.f32.mrf.mxu1  ;;  %4132 = vmatprep.subr.bf16.mxu0 %v5523_v24  ;;  %6312 = vst [vmem:[#allocation13_spill] sm:$0xff] %v5804_v26 }
 0x2d2   : > { %v5766_v62 = vpop.f32.mrf.mxu1 }
 0x2d3   : > { %4133 = vmatpush3.bf16.msra.mxu0 %v4390_v37 }
 0x2d4   : > { %v5771_v42 = vpop.f32.mrf.mxu1  ;;  %4158 = vmatprep.subr.bf16.mxu0 %v5523_v24 }
 0x2d6   : > { %v5780_v32 = vpop.f32.mrf.mxu1 }
 0x2d8   : > { %v5782_v43 = vpop.f32.mrf.mxu1 }
 0x2d9   : > { %6305 = vst [vmem:[#allocation49_spill] sm:$0xff] %v5782_v43 }
 0x2da   : > { %v5788_v25 = vpop.f32.mrf.mxu1 }
 0x2db   : > { %6306 = vst [vmem:[#allocation50_spill] sm:$0xff] %v5788_v25  ;;  %v5810_v25 = vpop.f32.mrf.mxu0 }
 0x2dc   : > { %v5790_v45 = vpop.f32.mrf.mxu1 }
 0x2dd   : > { %6307 = vst [vmem:[#allocation52_spill] sm:$0xff] %v5790_v45 }
 0x2de   : > { %v5794_v21 = vpop.f32.mrf.mxu1 }
 0x2df   : > { %6308 = vst [vmem:[#allocation53_spill] sm:$0xff] %v5794_v21  ;;  %v5816_v21 = vpop.f32.mrf.mxu0 }
 0x2e0   : > { %v5796_v56 = vpop.f32.mrf.mxu1  ;;  %6317 = vst [vmem:[#allocation60_spill] sm:$0xff] %v5816_v21 }
 0x2e1   : > { %6309 = vst [vmem:[#allocation55_spill] sm:$0xff] %v5796_v56 }
 0x2e2   : > { %v5800_v51 = vpop.f32.mrf.mxu1 }
 0x2e3   : > { %6310 = vst [vmem:[#allocation11_spill] sm:$0xff] %v5800_v51  ;;  %v5822_v51 = vpop.f32.mrf.mxu0 }
 0x2e4   : > { %v5802_v37 = vpop.f32.mrf.mxu1  ;;  %6320 = vst [vmem:[#allocation63_spill] sm:$0xff] %v5822_v51 }
 0x2e5   : > { %6311 = vst [vmem:[#allocation12_spill] sm:$0xff] %v5802_v37 }
 0x2e6   : > { %v5806_v24 = vpop.f32.mrf.mxu1 }
 0x2e7   : > { %6313 = vst [vmem:[#allocation14_spill] sm:$0xff] %v5806_v24  ;;  %v5830_v24 = vpop.f32.mrf.mxu0 }
 0x2e8   : > { %v5808_v55 = vpop.f32.mrf.mxu1  ;;  %6323 = vst [vmem:[#allocation66_spill] sm:$0xff] %v5830_v24 }
 0x2e9   : > { %6314 = vst [vmem:[#allocation57_spill] sm:$0xff] %v5808_v55  ;;  %v1993_v55 = vadd.f32 %v5680_v6, %v5541_v3 }
 0x2ea   : > { %v5812_v45 = vpop.f32.mrf.mxu1 }
 0x2eb   : > { %6315 = vst [vmem:[#allocation58_spill] sm:$0xff] %v5812_v45 }
 0x2ec   : > { %v5814_v43 = vpop.f32.mrf.mxu1 }
 0x2ed   : > { %6316 = vst [vmem:[#allocation59_spill] sm:$0xff] %v5814_v43  ;;  %v1995_v43 = vadd.f32 %v5685_v15, %v5545_v28  ;;  %v2003_v28 = vadd.f32 %v5704_v59, %v5559_v33  ;;  %v2007_v33 = vadd.f32 %v5717_v47, %v5568_v12  ;;  %v2013_v12 = vadd.f32 %v5731_v60, %v5576_v49 }
 0x2ee   : > { %v5818_v56 = vpop.f32.mrf.mxu1  ;;  %v2017_v49 = vadd.f32 %v5748_v29, %v5584_v31  ;;  %v2023_v31 = vadd.f32 %v5766_v62, %v5592_v23 }
 0x2ef   : > { %6318 = vst [vmem:[#allocation61_spill] sm:$0xff] %v5818_v56  ;;  %v2305_v56 = vadd.f32 %v5543_v19, %v1993_v55  ;;  %v2306_v24 = vadd.f32 %v5547_v44, %v1995_v43 }
 0x2f0   : > { %v5820_v0 = vpop.f32.mrf.mxu1 }
 0x2f1   : > { %6319 = vst [vmem:[#allocation62_spill] sm:$0xff] %v5820_v0  ;;  %v1997_v0 = vadd.f32 %v5693_v5, %v5550_v50 }
 0x2f2   : > { %v5824_v37 = vpop.f32.mrf.mxu1 }
 0x2f3   : > { %6321 = vst [vmem:[#allocation64_spill] sm:$0xff] %v5824_v37  ;;  %v5843_v37 = vpop.f32.mrf.mxu0 }
 0x2f4   : > { %v5826_v26 = vpop.f32.mrf.mxu1 }
 0x2f5   : > { %6322 = vst [vmem:[#allocation65_spill] sm:$0xff] %v5826_v26  ;;  %v1999_v26 = vadd.f32 %v5698_v52, %v5554_v10  ;;  %v5849_v51 = vpop.f32.mrf.mxu0  ;;  %v2005_v10 = vadd.f32 %v5709_v34, %v5563_v41 }
 0x2f6   : > { %v5832_v45 = vpop.f32.mrf.mxu1 }
 0x2f7   : > { %6324 = vst [vmem:[#allocation67_spill] sm:$0xff] %v5832_v45  ;;  %v2308_v19 = vadd.f32 %v5556_v27, %v1999_v26  ;;  %v5861_v27 = vpop.f32.mrf.mxu0  ;;  %v2310_v59 = vadd.f32 %v5565_v17, %v2005_v10 }
 0x2f8   : > { %v5836_v21 = vpop.f32.mrf.mxu1 }
 0x2f9   : > { %6325 = vst [vmem:[#allocation68_spill] sm:$0xff] %v5836_v21  ;;  %v2307_v21 = vadd.f32 %v5552_v30, %v1997_v0  ;;  %v2309_v30 = vadd.f32 %v5561_v35, %v2003_v28  ;;  %v2009_v0 = vadd.f32 %v5722_v4, %v5572_v2  ;;  %v5869_v2 = vpop.f32.mrf.mxu0 }
 0x2fa   : > { %v2492_v3 = vpop.f32.mrf.mxu1 }
 0x2fb   : > { %v2571_v6 = vadd.f32 %v2492_v3, %v2305_v56  ;;  %v5881_v28 = vpop.f32.mrf.mxu0 }
 0x2fc   : > { %v2494_v45 = vpop.f32.mrf.mxu1 }
 0x2fd   : > { %v2572_v15 = vadd.f32 %v2494_v45, %v2306_v24  ;;  %v2837_v55 = vadd.f32 %v5691_v7, %v2571_v6  ;;  %v2311_v7 = vadd.f32 %v5570_v13, %v2007_v33  ;;  %v2313_v6 = vadd.f32 %v5578_v48, %v2013_v12 }
 0x2fe   : > { %v2496_v50 = vpop.f32.mrf.mxu1 }
 0x2ff   : > { %v2838_v56 = vadd.f32 %v5702_v11, %v2572_v15  ;;  %v2573_v44 = vadd.f32 %v2496_v50, %v2307_v21  ;;  %v2312_v11 = vadd.f32 %v5574_v61, %v2009_v0  ;;  %v2019_v61 = vadd.f32 %v5757_v57, %v5588_v9  ;;  %v5891_v57 = vpop.f32.mrf.mxu0 }
 0x300   : > { %v2498_v5 = vpop.f32.mrf.mxu1  ;;  %v2025_v9 = vadd.f32 %v5771_v42, %v5596_v20  ;;  %v2317_v42 = vadd.f32 %v5594_v36, %v2023_v31 }
 0x301   : > { %v2869_v24 = vmax.f32 %v2837_v55, %v2838_v56  ;;  %v2574_v45 = vadd.f32 %v2498_v5, %v2308_v19  ;;  %v2839_v41 = vadd.f32 %v5715_v40, %v2573_v44  ;;  %v2015_v40 = vadd.f32 %v5736_v1, %v5580_v16  ;;  %v5907_v0 = vpop.f32.mrf.mxu0 }
 0x302   : > { %v2502_v26 = vpop.f32.mrf.mxu1  ;;  %v2315_v19 = vadd.f32 %v5586_v39, %v2017_v49  ;;  %v2316_v23 = vadd.f32 %v5590_v53, %v2019_v61  ;;  %v2027_v44 = vadd.f32 %v5780_v32, %v5600_v18  ;;  %v6330_v18 = vld [vmem:[#allocation42_spill] sm:$0xff] }
 0x303   : > { %2885 = vst [vmem:[#allocation4] sm:$0xff] %v2869_v24  ;;  %v2840_v34 = vadd.f32 %v5729_v22, %v2574_v45  ;;  %v2575_v21 = vadd.f32 %v2502_v26, %v2309_v30  ;;  %v2314_v15 = vadd.f32 %v5582_v46, %v2015_v40  ;;  %v6326_v45 = vld [vmem:[#allocation39_spill] sm:$0xff]  ;;  %v6327_v30 = vld [vmem:[#allocation49_spill] sm:$0xff]  ;;  %v6331_v32 = vld [vmem:[#allocation50_spill] sm:$0xff] }
 0x304   : > { %v2504_v52 = vpop.f32.mrf.mxu1  ;;  %v2029_v53 = vadd.f32 %v6327_v30, %v6326_v45  ;;  %v6334_v40 = vld [vmem:[#allocation52_spill] sm:$0xff]  ;;  %v6346_v45 = vld [vmem:[#allocation11_spill] sm:$0xff] }
 0x305   : > { %v2870_v47 = vmax.f32 %v2839_v41, %v2840_v34  ;;  %v2576_v35 = vadd.f32 %v2504_v52, %v2310_v59  ;;  %v2841_v22 = vadd.f32 %v5746_v58, %v2575_v21  ;;  %v6329_v34 = vld [vmem:[#allocation13_spill] sm:$0xff]  ;;  %v2033_v52 = vadd.f32 %v6331_v32, %v6330_v18 }
 0x306   : > { %v2506_v4 = vpop.f32.mrf.mxu1 }
 0x307   : > { %2886 = vst [vmem:[#allocation4 + $0x8] sm:$0xff] %v2870_v47  ;;  %v2842_v17 = vadd.f32 %v5764_v54, %v2576_v35  ;;  %v2577_v43 = vadd.f32 %v2506_v4, %v2311_v7  ;;  %v6332_v7 = vld [vmem:[#allocation16_spill] sm:$0xff] }
 0x308   : > { %v2508_v3 = vpop.f32.mrf.mxu1  ;;  %v2319_v4 = vadd.f32 %v6332_v7, %v2027_v44 }
 0x309   : > { %v2871_v60 = vmax.f32 %v2841_v22, %v2842_v17  ;;  %v2578_v13 = vadd.f32 %v2508_v3, %v2312_v11  ;;  %v2843_v58 = vadd.f32 %v5778_v8, %v2577_v43  ;;  %v6333_v11 = vld [vmem:[#allocation45_spill] sm:$0xff]  ;;  %v5917_v17 = vpop.f32.mrf.mxu0 }
 0x30a   : > { %v2512_v16 = vpop.f32.mrf.mxu1  ;;  %v2035_v22 = vadd.f32 %v6334_v40, %v6333_v11  ;;  %v6351_v40 = vld [vmem:[#allocation22_spill] sm:$0xff] }
 0x30b   : > { %2887 = vst [vmem:[#allocation4 + $0x10] sm:$0xff] %v2871_v60  ;;  %v2844_v54 = vadd.f32 %v5786_v14, %v2578_v13  ;;  %v2579_v1 = vadd.f32 %v2512_v16, %v2313_v6  ;;  %v5896_v14 = vld [vmem:[%s6158_s4] ss:$0 sm:$0xff]  ;;  %v6335_v60 = vld [vmem:[#allocation17_spill] sm:$0xff]  ;;  %v6337_v16 = vld [vmem:[#allocation63_spill] sm:$0xff] }
 0x30c   : > { %v2514_v29 = vpop.f32.mrf.mxu1  ;;  %v6336_v6 = vld [vmem:[#allocation60_spill] sm:$0xff] }
 0x30d   : > { %v2872_v50 = vmax.f32 %v2843_v58, %v2844_v54  ;;  %v2580_v48 = vadd.f32 %v2514_v29, %v2314_v15  ;;  %v2845_v55 = vadd.f32 %v5792_v63, %v2579_v1  ;;  %v6328_v63 = vld [vmem:[#allocation36_spill] sm:$0xff]  ;;  %v6338_v15 = vld [vmem:[#allocation18_spill] sm:$0xff] }
 0x30e   : > { %v2901_v10 = vld [vmem:[#allocation4] ss:$2 sm:$0xff]  ;;  %v2917_v8 = vld [vmem:[#allocation4 + $0x1] ss:$2 sm:$0xff]  ;;  %v2516_v46 = vpop.f32.mrf.mxu1  ;;  %v2318_v41 = vadd.f32 %v6328_v63, %v2025_v9  ;;  %v2321_v31 = vadd.f32 %v6338_v15, %v2033_v52  ;;  %v6339_v29 = vld [vmem:[#allocation48_spill] sm:$0xff] }
 0x30f   : > { %v2932_v62 = vmax.f32 %v2901_v10, %v2917_v8  ;;  %2888 = vst [vmem:[#allocation4 + $0x18] sm:$0xff] %v2872_v50  ;;  %v2846_v39 = vadd.f32 %v5798_v38, %v2580_v48  ;;  %v2581_v56 = vadd.f32 %v2516_v46, %v2315_v19  ;;  %v6340_v50 = vld [vmem:[#allocation53_spill] sm:$0xff]  ;;  %v6341_v8 = vld [vmem:[#allocation51_spill] sm:$0xff] }
 0x310   : > { %v2518_v20 = vpop.f32.mrf.mxu1  ;;  %v2037_v48 = vadd.f32 %v6340_v50, %v6339_v29  ;;  %v6342_v46 = vld [vmem:[#allocation55_spill] sm:$0xff]  ;;  %v6357_v50 = vld [vmem:[#allocation28_spill] sm:$0xff] }
 0x311   : > { %v2947_v5 = vadd.f32 %v5896_v14, %v2932_v62  ;;  %v2873_v33 = vmax.f32 %v2845_v55, %v2846_v39  ;;  %v2582_v24 = vadd.f32 %v2518_v20, %v2316_v23  ;;  %v2847_v21 = vadd.f32 %v6329_v34, %v2581_v56  ;;  %v5928_v62 = vpop.f32.mrf.mxu0  ;;  %v6343_v39 = vld [vmem:[#allocation19_spill] sm:$0xff]  ;;  %v6348_v34 = vld [vmem:[#allocation56_spill] sm:$0xff] }
 0x312   : > { %v2522_v26 = vpop.f32.mrf.mxu1  ;;  %v2039_v23 = vadd.f32 %v6342_v46, %v6341_v8  ;;  %v2322_v56 = vadd.f32 %v6343_v39, %v2035_v22  ;;  %v6359_v46 = vld [vmem:[#allocation25_spill] sm:$0xff]  ;;  %v6361_v39 = vld [vmem:[#allocation59_spill] sm:$0xff] }
 0x313   : > { %v2955_v38 = vmax.f32 %v2947_v5, 0.0  ;;  %2889 = vst [vmem:[#allocation4 + $0x20] sm:$0xff] %v2873_v33  ;;  %v2848_v36 = vadd.f32 %v5810_v25, %v2582_v24  ;;  %v2583_v59 = vadd.f32 %v2522_v26, %v2317_v42  ;;  %v2320_v25 = vadd.f32 %v6335_v60, %v2029_v53  ;;  %v6344_v42 = vld [vmem:[#allocation66_spill] sm:$0xff] }
 0x314   : > { %v2524_v12 = vpop.f32.mrf.mxu1  ;;  %v6345_v24 = vld [vmem:[#allocation54_spill] sm:$0xff] }
 0x315   : > { %2963 = vst [vmem:[#allocation5] sm:$0xff] %v2955_v38  ;;  %v2874_v47 = vmax.f32 %v2847_v21, %v2848_v36  ;;  %v2584_v35 = vadd.f32 %v2524_v12, %v2318_v41  ;;  %v2849_v61 = vadd.f32 %v6336_v6, %v2583_v59  ;;  %v2043_v30 = vadd.f32 %v6346_v45, %v6345_v24  ;;  %v6347_v41 = vld [vmem:[#allocation20_spill] sm:$0xff]  ;;  %v5938_v59 = vpop.f32.mrf.mxu0  ;;  %v6350_v12 = vld [vmem:[#allocation21_spill] sm:$0xff]  ;;  %v6354_v6 = vld [vmem:[#allocation26_spill] sm:$0xff] }
 0x316   : > { %v2903_v43 = vld [vmem:[#allocation4 + $0x10] ss:$2 sm:$0xff]  ;;  %v2919_v3 = vld [vmem:[#allocation4 + $0x11] ss:$2 sm:$0xff]  ;;  %v2526_v49 = vpop.f32.mrf.mxu1  ;;  %v2323_v38 = vadd.f32 %v6347_v41, %v2037_v48  ;;  %v6358_v48 = vld [vmem:[#allocation58_spill] sm:$0xff] }
 0x317   : > { %v2933_v13 = vmax.f32 %v2903_v43, %v2919_v3  ;;  %2890 = vst [vmem:[#allocation4 + $0x28] sm:$0xff] %v2874_v47  ;;  %v2850_v58 = vadd.f32 %v6337_v16, %v2584_v35  ;;  %v2585_v54 = vadd.f32 %v2526_v49, %v2319_v4  ;;  %v6349_v21 = vld [vmem:[#allocation12_spill] sm:$0xff]  ;;  %v2325_v22 = vadd.f32 %v6351_v40, %v2043_v30  ;;  %v6353_v3 = vld [vmem:[#allocation14_spill] sm:$0xff]  ;;  %v6369_v40 = vld [vmem:[#allocation37_spill] sm:$0xff] }
 0x318   : > { %v2528_v1 = vpop.f32.mrf.mxu1  ;;  %v2045_v36 = vadd.f32 %v6349_v21, %v6348_v34  ;;  %v6352_v43 = vld [vmem:[#allocation24_spill] sm:$0xff] }
 0x319   : > { %v2948_v19 = vadd.f32 %v5896_v14, %v2933_v13  ;;  %v2875_v9 = vmax.f32 %v2849_v61, %v2850_v58  ;;  %v2586_v10 = vadd.f32 %v2528_v1, %v2320_v25  ;;  %v2851_v44 = vadd.f32 %v6344_v42, %v2585_v54  ;;  %v6355_v61 = vld [vmem:[#allocation57_spill] sm:$0xff]  ;;  %v2820_v58 = vpop.f32.mrf.mxu0  ;;  %v6356_v1 = vld [vmem:[#allocation23_spill] sm:$0xff]  ;;  %v6364_v41 = vld [vmem:[#allocation32_spill] sm:$0xff] }
 0x31a   : > { %v2532_v55 = vpop.f32.mrf.mxu1  ;;  %v2047_v49 = vadd.f32 %v6353_v3, %v6352_v43  ;;  %v2049_v16 = vadd.f32 %v6355_v61, %v6354_v6  ;;  %v6372_v61 = vld [vmem:[#allocation40_spill] sm:$0xff] }
 0x31b   : > { %v2956_v20 = vmax.f32 %v2948_v19, 0.0  ;;  %2891 = vst [vmem:[#allocation4 + $0x30] sm:$0xff] %v2875_v9  ;;  %v2852_v5 = vadd.f32 %v5843_v37, %v2586_v10  ;;  %v2587_v33 = vadd.f32 %v2532_v55, %v2321_v31  ;;  %v2324_v37 = vadd.f32 %v6350_v12, %v2039_v23  ;;  %v6360_v55 = vld [vmem:[#allocation30_spill] sm:$0xff] }
 0x31c   : > { %v2534_v53 = vpop.f32.mrf.mxu1  ;;  %v2053_v19 = vadd.f32 %v6358_v48, %v6357_v50  ;;  %v2327_v23 = vadd.f32 %v6359_v46, %v2047_v49 }
 0x31d   : > { %2964 = vst [vmem:[#allocation5 + $0x8] sm:$0xff] %v2956_v20  ;;  %v2876_v26 = vmax.f32 %v2851_v44, %v2852_v5  ;;  %v2588_v63 = vadd.f32 %v2534_v53, %v2322_v56  ;;  %v2853_v35 = vadd.f32 %v5849_v51, %v2587_v33  ;;  %v2326_v51 = vadd.f32 %v6356_v1, %v2045_v36  ;;  %v2822_v20 = vpop.f32.mrf.mxu0 }
 0x31e   : > { %v2905_v18 = vld [vmem:[#allocation4 + $0x20] ss:$2 sm:$0xff]  ;;  %v2921_v32 = vld [vmem:[#allocation4 + $0x21] ss:$2 sm:$0xff]  ;;  %v2536_v52 = vpop.f32.mrf.mxu1  ;;  %v2055_v56 = vadd.f32 %v6361_v39, %v6360_v55 }
 0x31f   : > { %v2934_v47 = vmax.f32 %v2905_v18, %v2921_v32  ;;  %2892 = vst [vmem:[#allocation4 + $0x38] sm:$0xff] %v2876_v26  ;;  %v2854_v7 = vadd.f32 %v5861_v27, %v2588_v63  ;;  %v2589_v4 = vadd.f32 %v2536_v52, %v2323_v38  ;;  %v6363_v26 = vld [vmem:[#allocation29_spill] sm:$0xff]  ;;  %v6366_v32 = vld [vmem:[#allocation34_spill] sm:$0xff] }
 0x320   : > { %v2538_v11 = vpop.f32.mrf.mxu1  ;;  %v2329_v63 = vadd.f32 %v6363_v26, %v2053_v19  ;;  %v6365_v38 = vld [vmem:[#allocation61_spill] sm:$0xff]  ;;  %v6367_v52 = vld [vmem:[#allocation62_spill] sm:$0xff] }
 0x321   : > { %v2949_v60 = vadd.f32 %v5896_v14, %v2934_v47  ;;  %v2877_v25 = vmax.f32 %v2853_v35, %v2854_v7  ;;  %v2590_v13 = vadd.f32 %v2538_v11, %v2324_v37  ;;  %v2855_v27 = vadd.f32 %v5869_v2, %v2589_v4  ;;  %v6362_v2 = vld [vmem:[#allocation27_spill] sm:$0xff]  ;;  %v2824_v37 = vpop.f32.mrf.mxu0  ;;  %v6375_v19 = vld [vmem:[#allocation38_spill] sm:$0xff] }
 0x322   : > { %v2542_v54 = vpop.f32.mrf.mxu1  ;;  %v2328_v33 = vadd.f32 %v6362_v2, %v2049_v16  ;;  %v2057_v34 = vadd.f32 %v6365_v38, %v6364_v41  ;;  %v2059_v12 = vadd.f32 %v6367_v52, %v6366_v32  ;;  %v6368_v35 = vld [vmem:[#allocation31_spill] sm:$0xff]  ;;  %v6373_v16 = vld [vmem:[#allocation65_spill] sm:$0xff] }
 0x323   : > { %v2957_v15 = vmax.f32 %v2949_v60, 0.0  ;;  %2893 = vst [vmem:[#allocation4 + $0x40] sm:$0xff] %v2877_v25  ;;  %v2856_v31 = vadd.f32 %v5881_v28, %v2590_v13  ;;  %v2591_v29 = vadd.f32 %v2542_v54, %v2325_v22  ;;  %v6370_v22 = vld [vmem:[#allocation64_spill] sm:$0xff]  ;;  %v6371_v25 = vld [vmem:[#allocation33_spill] sm:$0xff]  ;;  %v2828_v6 = vpop.f32.mrf.mxu0  ;;  %v2065_v54 = vadd.f32 %v6373_v16, %v6372_v61 }
 0x324   : > { %v2544_v9 = vpop.f32.mrf.mxu1  ;;  %v2063_v43 = vadd.f32 %v6370_v22, %v6369_v40  ;;  %v2331_v13 = vadd.f32 %v6371_v25, %v2057_v34 }
 0x325   : > { %2965 = vst [vmem:[#allocation5 + $0x10] sm:$0xff] %v2957_v15  ;;  %v2878_v10 = vmax.f32 %v2855_v27, %v2856_v31  ;;  %v2592_v8 = vadd.f32 %v2544_v9, %v2326_v51  ;;  %v2857_v24 = vadd.f32 %v5891_v57, %v2591_v29  ;;  %v2330_v57 = vadd.f32 %v6368_v35, %v2055_v56  ;;  %v2830_v56 = vpop.f32.mrf.mxu0 }
 0x326   : > { %v2907_v42 = vld [vmem:[#allocation4 + $0x30] ss:$2 sm:$0xff]  ;;  %v2923_v44 = vld [vmem:[#allocation4 + $0x31] ss:$2 sm:$0xff]  ;;  %v2546_v5 = vpop.f32.mrf.mxu1  ;;  %v2333_v9 = vadd.f32 %v6375_v19, %v2063_v43  ;;  %v4393_v19 = vld [vmem:[%s6159_s5 + $0x28] sm:$0xff]  }
 0x327   : > { %v2935_v28 = vmax.f32 %v2907_v42, %v2923_v44  ;;  %2894 = vst [vmem:[#allocation4 + $0x48] sm:$0xff] %v2878_v10  ;;  %v2858_v45 = vadd.f32 %v5907_v0, %v2592_v8  ;;  %v2593_v30 = vadd.f32 %v2546_v5, %v2327_v23  ;;  %v6376_v10 = vld [vmem:[#allocation43_spill] sm:$0xff]  ;;  %v6378_v42 = vld [vmem:[#allocation46_spill] sm:$0xff]  ;;  %v6379_v44 = vld [vmem:[#allocation68_spill] sm:$0xff]  ;;  %v2832_v38 = vpop.f32.mrf.mxu0 }
 0x328   : > { %v2548_v53 = vpop.f32.mrf.mxu1  ;;  %v6377_v8 = vld [vmem:[#allocation67_spill] sm:$0xff]  ;;  %v2069_v5 = vadd.f32 %v6379_v44, %v6378_v42 }
 0x329   : > { %v2950_v21 = vadd.f32 %v5896_v14, %v2935_v28  ;;  %v2879_v36 = vmax.f32 %v2857_v24, %v2858_v45  ;;  %v2594_v18 = vadd.f32 %v2548_v53, %v2328_v33  ;;  %v2859_v0 = vadd.f32 %v5917_v17, %v2593_v30  ;;  %v6374_v17 = vld [vmem:[#allocation35_spill] sm:$0xff]  ;;  %v6380_v33 = vld [vmem:[#allocation41_spill] sm:$0xff] }
 0x32a   : > { %v2552_v47 = vpop.f32.mrf.mxu1  ;;  %v2332_v27 = vadd.f32 %v6374_v17, %v2059_v12  ;;  %v2067_v46 = vadd.f32 %v6377_v8, %v6376_v10  ;;  %v2334_v28 = vadd.f32 %v6380_v33, %v2065_v54  ;;  %v4395_v10 = vld [vmem:[%s6159_s5 + $0x18] sm:$0xff]   ;;  %v4396_v8 = vld [vmem:[%s6159_s5 + $0x10] sm:$0xff]   ;;  %v4401_v33 = vld [vmem:[%s6159_s5 + $0xe8] sm:$0xff]  }
 0x32b   : > { %v2958_v7 = vmax.f32 %v2950_v21, 0.0  ;;  %2895 = vst [vmem:[#allocation4 + $0x50] sm:$0xff] %v2879_v36  ;;  %v2860_v4 = vadd.f32 %v5928_v62, %v2594_v18  ;;  %v2595_v11 = vadd.f32 %v2552_v47, %v2329_v63  ;;  %v6381_v63 = vld [vmem:[#allocation44_spill] sm:$0xff]  ;;  %v6382_v18 = vld [vmem:[#allocation47_spill] sm:$0xff] }
 0x32c   : > { %v2554_v3 = vpop.f32.mrf.mxu1  ;;  %v2335_v41 = vadd.f32 %v6381_v63, %v2067_v46  ;;  %v2336_v32 = vadd.f32 %v6382_v18, %v2069_v5  ;;  %v4397_v46 = vld [vmem:[%s6159_s5 + $0x8] sm:$0xff]   ;;  %v4399_v44 = vld [vmem:[%s6159_s5 + $0xf8] sm:$0xff]   ;;  %v4412_v18 = vld [vmem:[%s6161_s7 + $0x10] sm:$0xff]  }
 0x32d   : > { %2966 = vst [vmem:[#allocation5 + $0x18] sm:$0xff] %v2958_v7  ;;  %v2880_v49 = vmax.f32 %v2859_v0, %v2860_v4  ;;  %v2596_v60 = vadd.f32 %v2554_v3, %v2330_v57  ;;  %v2861_v31 = vadd.f32 %v5938_v59, %v2595_v11  ;;  %v2834_v0 = vpop.f32.mrf.mxu0 }
 0x32e   : > { %v2909_v1 = vld [vmem:[#allocation4 + $0x40] ss:$2 sm:$0xff]  ;;  %v2925_v51 = vld [vmem:[#allocation4 + $0x41] ss:$2 sm:$0xff]  ;;  %v2556_v15 = vpop.f32.mrf.mxu1 }
 0x32f   : > { %v2936_v62 = vmax.f32 %v2909_v1, %v2925_v51  ;;  %2896 = vst [vmem:[#allocation4 + $0x58] sm:$0xff] %v2880_v49  ;;  %v2862_v29 = vadd.f32 %v2820_v58, %v2596_v60  ;;  %v2597_v50 = vadd.f32 %v2556_v15, %v2331_v13 }
 0x330   : > { %v2558_v48 = vpop.f32.mrf.mxu1 }
 0x331   : > { %v2951_v23 = vadd.f32 %v5896_v14, %v2936_v62  ;;  %v2881_v55 = vmax.f32 %v2861_v31, %v2862_v29  ;;  %v2598_v39 = vadd.f32 %v2558_v48, %v2332_v27  ;;  %v2863_v58 = vadd.f32 %v2822_v20, %v2597_v50  ;;  %v4391_v31 = vld [vmem:[%s6159_s5 + $0x38] sm:$0xff]  }
 0x332   : > { %v2562_v2 = vpop.f32.mrf.mxu1  ;;  %v6383_v48 = vld [vmem:[#allocation15_spill] sm:$0xff] }
 0x333   : > { %v2959_v59 = vmax.f32 %v2951_v23, 0.0  ;;  %2897 = vst [vmem:[#allocation4 + $0x60] sm:$0xff] %v2881_v55  ;;  %v2864_v24 = vadd.f32 %v2824_v37, %v2598_v39  ;;  %v2599_v45 = vadd.f32 %v2562_v2, %v2333_v9  ;;  %v4394_v9 = vld [vmem:[%s6159_s5 + $0x20] sm:$0xff]   ;;  %v4400_v2 = vld [vmem:[%s6159_s5 + $0xf0] sm:$0xff]  }
 0x334   : > { %v2564_v30 = vpop.f32.mrf.mxu1  ;;  %v2992_v1 = vld [vmem:[#allocation5 + $0x1] ss:$8 sm:$0xf]  ;;  %v3190_v51 = vld [vmem:[#allocation5 + $0x2] ss:$8 sm:$0xf] }
 0x335   : > { %2967 = vst [vmem:[#allocation5 + $0x20] sm:$0xff] %v2959_v59  ;;  %v2882_v53 = vmax.f32 %v2863_v58, %v2864_v24  ;;  %v2600_v26 = vadd.f32 %v2564_v30, %v2334_v28  ;;  %v2865_v12 = vadd.f32 %v2828_v6, %v2599_v45  ;;  %v6018_v23 = vld [vmem:[#allocation3 + $0x80] sm:$0xff]  ;;  %v4403_v59 = vld [vmem:[%s6159_s5 + $0xd8] sm:$0xff]   ;;  %v4404_v58 = vld [vmem:[%s6159_s5 + $0xd0] sm:$0xff]  }
 0x336   : > { %v2911_v34 = vld [vmem:[#allocation4 + $0x50] ss:$2 sm:$0xff]  ;;  %v2927_v21 = vld [vmem:[#allocation4 + $0x51] ss:$2 sm:$0xff]  ;;  %v2566_v36 = vpop.f32.mrf.mxu1  ;;  %v4405_v24 = vld [vmem:[%s6159_s5 + $0xc8] sm:$0xff]  }
 0x337   : > { %v2937_v52 = vmax.f32 %v2911_v34, %v2927_v21  ;;  %2898 = vst [vmem:[#allocation4 + $0x68] sm:$0xff] %v2882_v53  ;;  %v2866_v47 = vadd.f32 %v2830_v56, %v2600_v26  ;;  %v2601_v35 = vadd.f32 %v2566_v36, %v2335_v41  ;;  %v4398_v39 = vld [vmem:[%s6159_s5] sm:$0xff]   ;;  %v4407_v41 = vld [vmem:[%s6161_s7 + $0x38] sm:$0xff]   ;;  %v4409_v34 = vld [vmem:[%s6161_s7 + $0x28] sm:$0xff]  }
 0x338   : > { %v2568_v20 = vpop.f32.mrf.mxu1  ;;  %v2971_v56 = vld [vmem:[#allocation5] ss:$8 sm:$0xf]  ;;  %v3301_v53 = vld [vmem:[#allocation5 + $0x3] ss:$8 sm:$0xf] }
 0x339   : > { %v2952_v37 = vadd.f32 %v5896_v14, %v2937_v52  ;;  %v2883_v57 = vmax.f32 %v2865_v12, %v2866_v47  ;;  %v2602_v7 = vadd.f32 %v2568_v20, %v2336_v32  ;;  %v2867_v11 = vadd.f32 %v2832_v38, %v2601_v35  ;;  %v4402_v28 = vld [vmem:[%s6159_s5 + $0xe0] sm:$0xff]   ;;  %v4408_v38 = vld [vmem:[%s6161_s7 + $0x30] sm:$0xff]   ;;  %v4411_v36 = vld [vmem:[%s6161_s7 + $0x18] sm:$0xff]  }
 0x33a   : > { %v4406_v30 = vld [vmem:[%s6159_s5 + $0xc0] sm:$0xff]   ;;  %v4413_v32 = vld [vmem:[%s6161_s7 + $0x8] sm:$0xff]   ;;  %v4415_v12 = vld [vmem:[%s6163_s9 + $0x18] sm:$0xff]  }
 0x33b   : > { %v2960_v4 = vmax.f32 %v2952_v37, 0.0  ;;  %2899 = vst [vmem:[#allocation4 + $0x70] sm:$0xff] %v2883_v57  ;;  %v2868_v40 = vadd.f32 %v2834_v0, %v2602_v7  ;;  %v4410_v21 = vld [vmem:[%s6161_s7 + $0x20] sm:$0xff]   ;;  %v4416_v47 = vld [vmem:[%s6163_s9 + $0x10] sm:$0xff]  }
 0x33c   : > { %v4414_v52 = vld [vmem:[%s6161_s7] sm:$0xff]  }
 0x33d   : > { %2968 = vst [vmem:[#allocation5 + $0x28] sm:$0xff] %v2960_v4  ;;  %v2884_v22 = vmax.f32 %v2867_v11, %v2868_v40 }
 0x33e   : > { %v2913_v43 = vld [vmem:[#allocation4 + $0x60] ss:$2 sm:$0xff]  ;;  %v2929_v3 = vld [vmem:[#allocation4 + $0x61] ss:$2 sm:$0xff] }
 0x33f   : > { %v2938_v49 = vmax.f32 %v2913_v43, %v2929_v3  ;;  %2900 = vst [vmem:[#allocation4 + $0x78] sm:$0xff] %v2884_v22 }
 0x341   : > { %v2953_v60 = vadd.f32 %v5896_v14, %v2938_v49 }
 0x343   : > { %v2961_v25 = vmax.f32 %v2953_v60, 0.0 }
 0x345   : > { %2969 = vst [vmem:[#allocation5 + $0x30] sm:$0xff] %v2961_v25 }
 0x346   : > { %v2915_v13 = vld [vmem:[#allocation4 + $0x70] ss:$2 sm:$0xff]  ;;  %v2931_v6 = vld [vmem:[#allocation4 + $0x71] ss:$2 sm:$0xff] }
 0x347   : > { %v2939_v61 = vmax.f32 %v2915_v13, %v2931_v6  ;;  %v4008_v13 = vld [vmem:[%s6160_s6] ss:$0 sm:$0xff] }
 0x349   : > { %v2954_v16 = vadd.f32 %v5896_v14, %v2939_v61  ;;  %v4392_v14 = vld [vmem:[%s6159_s5 + $0x30] sm:$0xff]  }
 0x34b   : > { %v2962_v54 = vmax.f32 %v2954_v16, 0.0 }
 0x34d   : > { %2970 = vst [vmem:[#allocation5 + $0x38] sm:$0xff] %v2962_v54 }
 0x354   : > { %v2993_v15 = vld [vmem:[#allocation5 + $0x1] ss:$8 sm:$0xf0]  ;;  %v3191_v17 = vld [vmem:[#allocation5 + $0x2] ss:$8 sm:$0xf0] }
 0x355   : > { %v2994_v27 = vor.u32 %v2993_v15, %v2992_v1  ;;  %v3192_v62 = vor.u32 %v3191_v17, %v3190_v51  ;;  %v2972_v55 = vld [vmem:[#allocation5] ss:$8 sm:$0xf0]  ;;  %v3302_v45 = vld [vmem:[#allocation5 + $0x3] ss:$8 sm:$0xf0] }
 0x356   : > { %v2973_v42 = vor.u32 %v2972_v55, %v2971_v56  ;;  %v3303_v26 = vor.u32 %v3302_v45, %v3301_v53  ;;  %v4417_v17 = vld [vmem:[%s6163_s9 + $0x8] sm:$0xff]  }
 0x357   : > { %v3012_v29 = vpack.c.bf16 %v2994_v27, %v2994_v27  ;;  %v3210_v50 = vpack.c.bf16 %v3192_v62, %v3192_v62  ;;  %v4418_v27 = vld [vmem:[%s6163_s9] sm:$0xff]  }
 0x358   : > { %v2990_v5 = vpack.c.bf16 %v2973_v42, %v2973_v42  ;;  %v3321_v63 = vpack.c.bf16 %v3303_v26, %v3303_v26  ;;  %v4009_v62 = vld [vmem:[%s6162_s8] ss:$0 sm:$0xff] }
 0x359   : > { %4095 = vmatmul.mubr.bf16.vlgmr.msra.gmra.mxu1 %v3012_v29  ;;  %4135 = vmatmul.mubr.bf16.vlgmr.msra.gmra.mxu0 %v3210_v50 }
 0x35a   : > { %4099 = vmatpush3.bf16.msra.mxu1 %v4391_v31  ;;  %4114 = vmatprep.mubr.msk.bf16.mxu1 %vm4489_vm2, %v6383_v48 }
 0x35b   : > { %4100 = vmatprep.subr.bf16.mxu1 %v6383_v48  ;;  %4174 = vmatprep.mubr.msk.bf16.mxu0 %vm4489_vm2, %v6383_v48 }
 0x35c   : > { %4159 = vmatpush3.bf16.msra.mxu0 %v4407_v41 }
 0x35d   : > { %4160 = vmatprep.subr.bf16.mxu0 %v6018_v23 }
 0x35e   : > { %4101 = vmatpush3.bf16.msra.mxu1 %v4392_v14 }
 0x35f   : > { %4102 = vmatprep.subr.bf16.mxu1 %v6383_v48 }
 0x360   : > { %4161 = vmatpush3.bf16.msra.mxu0 %v4408_v38 }
 0x361   : > { %4162 = vmatprep.subr.bf16.mxu0 %v6018_v23 }
 0x362   : > { %4103 = vmatpush3.bf16.msra.mxu1 %v4393_v19 }
 0x363   : > { %4104 = vmatprep.subr.bf16.mxu1 %v6383_v48 }
 0x364   : > { %4163 = vmatpush3.bf16.msra.mxu0 %v4409_v34 }
 0x365   : > { %4164 = vmatprep.subr.bf16.mxu0 %v6018_v23 }
 0x366   : > { %4105 = vmatpush3.bf16.msra.mxu1 %v4394_v9 }
 0x367   : > { %4106 = vmatprep.subr.bf16.mxu1 %v6383_v48 }
 0x368   : > { %4165 = vmatpush3.bf16.msra.mxu0 %v4410_v21 }
 0x369   : > { %4166 = vmatprep.subr.bf16.mxu0 %v6018_v23 }
 0x36a   : > { %4107 = vmatpush3.bf16.msra.mxu1 %v4395_v10  ;;  %v4018_v10 = vld [vmem:[%s6164_s10] ss:$0 sm:$0xff] }
 0x36b   : > { %4108 = vmatprep.subr.bf16.mxu1 %v6383_v48 }
 0x36c   : > { %4167 = vmatpush3.bf16.msra.mxu0 %v4411_v36 }
 0x36d   : > { %4168 = vmatprep.subr.bf16.mxu0 %v6018_v23 }
 0x36e   : > { %4109 = vmatpush3.bf16.msra.mxu1 %v4396_v8 }
 0x36f   : > { %4110 = vmatprep.subr.bf16.mxu1 %v6018_v23 }
 0x370   : > { %4169 = vmatpush3.bf16.msra.mxu0 %v4412_v18 }
 0x371   : > { %4170 = vmatprep.subr.bf16.mxu0 %v6018_v23 }
 0x372   : > { %4111 = vmatpush3.bf16.msra.mxu1 %v4397_v46 }
 0x373   : > { %4112 = vmatprep.subr.bf16.mxu1 %v6018_v23 }
 0x374   : > { %4171 = vmatpush3.bf16.msra.mxu0 %v4413_v32 }
 0x375   : > { %4172 = vmatprep.subr.bf16.mxu0 %v6018_v23 }
 0x376   : > { %4113 = vmatpush3.bf16.msra.mxu1 %v4398_v39 }
 0x377   : > { %4138 = vmatprep.subr.bf16.mxu1 %v6018_v23 }
 0x378   : > { %4173 = vmatpush3.bf16.msra.mxu0 %v4414_v52 }
 0x379   : > { %4115 = vmatmul.mubr.bf16.vlgmr.msra.gmra.mxu1 %v2990_v5 }
 0x37a   : > { %4139 = vmatpush3.bf16.msra.mxu1 %v4399_v44  ;;  %4154 = vmatprep.mubr.msk.bf16.mxu1 %vm4489_vm2, %v6018_v23 }
 0x37b   : > { %4140 = vmatprep.subr.bf16.mxu1 %v6018_v23 }
 0x37e   : > { %4141 = vmatpush3.bf16.msra.mxu1 %v4400_v2 }
 0x37f   : > { %4142 = vmatprep.subr.bf16.mxu1 %v6018_v23 }
 0x382   : > { %4143 = vmatpush3.bf16.msra.mxu1 %v4401_v33 }
 0x383   : > { %4144 = vmatprep.subr.bf16.mxu1 %v6018_v23 }
 0x386   : > { %4145 = vmatpush3.bf16.msra.mxu1 %v4402_v28 }
 0x387   : > { %4146 = vmatprep.subr.bf16.mxu1 %v6018_v23 }
 0x38a   : > { %4147 = vmatpush3.bf16.msra.mxu1 %v4403_v59 }
 0x38b   : > { %4148 = vmatprep.subr.bf16.mxu1 %v6018_v23 }
 0x38e   : > { %4149 = vmatpush3.bf16.msra.mxu1 %v4404_v58 }
 0x38f   : > { %4150 = vmatprep.subr.bf16.mxu1 %v6018_v23 }
 0x392   : > { %4151 = vmatpush3.bf16.msra.mxu1 %v4405_v24 }
 0x393   : > { %4152 = vmatprep.subr.bf16.mxu1 %v6018_v23 }
 0x396   : > { %4153 = vmatpush3.bf16.msra.mxu1 %v4406_v30 }
 0x397   : > { %4178 = vmatprep.subr.bf16.mxu1 %v6018_v23 }
 0x399   : > { %4155 = vmatmul.mubr.bf16.vlgmr.msra.gmra.mxu1 %v3321_v63 }
 0x39a   : > { %4186 = vmatprep.mubr.msk.bf16.mxu1 %vm4489_vm2, %v6018_v23  ;;  %4179 = vmatpush3.bf16.msra.mxu1 %v4415_v12 }
 0x39b   : > { %4180 = vmatprep.subr.bf16.mxu1 %v6018_v23 }
 0x39e   : > { %4181 = vmatpush3.bf16.msra.mxu1 %v4416_v47 }
 0x39f   : > { %4182 = vmatprep.subr.bf16.mxu1 %v6018_v23 }
 0x3a2   : > { %4183 = vmatpush3.bf16.msra.mxu1 %v4417_v17 }
 0x3a3   : > { %4184 = vmatprep.subr.bf16.mxu1 %v6018_v23 }
 0x3a6   : > { %4185 = vmatpush3.bf16.msra.mxu1 %v4418_v27 }
 0x419   : > { %v3095_v35 = vpop.f32.mrf.mxu1  ;;  %v3293_v20 = vpop.f32.mrf.mxu0 }
 0x41b   : > { %v4096_v37 = vpop.f32.mrf.mxu1  ;;  %v4136_v57 = vpop.f32.mrf.mxu0 }
 0x41d   : > { %v3098_v7 = vpop.f32.mrf.mxu1  ;;  %v3296_v0 = vpop.f32.mrf.mxu0 }
 0x41f   : > { %v4097_v4 = vpop.f32.mrf.mxu1  ;;  %v4137_v11 = vpop.f32.mrf.mxu0 }
 0x439   : > { %v3183_v40 = vpop.f32.mrf.mxu1 }
 0x43a   : > { %v3184_v49 = vadd.f32 %v3183_v40, %v3095_v35 }
 0x43b   : > { %v4116_v22 = vpop.f32.mrf.mxu1 }
 0x43c   : > { %v3299_v60 = vadd.f32 %v3293_v20, %v3184_v49 }
 0x43d   : > { %v3186_v43 = vpop.f32.mrf.mxu1 }
 0x43f   : > { %v4117_v3 = vpop.f32.mrf.mxu1 }
 0x459   : > { %v3404_v25 = vpop.f32.mrf.mxu1 }
 0x45a   : > { %v3410_v6 = vadd.f32 %v3404_v25, %v3299_v60 }
 0x45b   : > { %v4156_v61 = vpop.f32.mrf.mxu1 }
 0x45c   : > { %v3418_v16 = vadd.f32 %v4008_v13, %v3410_v6 }
 0x45d   : > { %v3407_v54 = vpop.f32.mrf.mxu1 }
 0x45e   : > { %v3419_v1 = vmax.f32 %v3418_v16, 0.0 }
 0x45f   : > { %v4157_v51 = vpop.f32.mrf.mxu1 }
 0x460   : > { %v3436_v15 = vpack.c.bf16 %v3419_v1, %v3419_v1 }
 0x462   : > { %4175 = vmatmul.mubr.bf16.vlgmr.msra.gmra.mxu0 %v3436_v15 }
 0x522   : > { %v3526_v31 = vpop.f32.mrf.mxu0 }
 0x523   : > { %v3527_v29 = vadd.f32 %v4009_v62, %v3526_v31 }
 0x524   : > { %v4176_v50 = vpop.f32.mrf.mxu0 }
 0x525   : > { %v3532_v14 = vmax.f32 %v3527_v29, 0.0 }
 0x526   : > { %v3529_v48 = vpop.f32.mrf.mxu0 }
 0x527   : > { %v3541_v19 = vpack.c.bf16 %v3532_v14, %v3532_v14 }
 0x528   : > { %v4177_v9 = vpop.f32.mrf.mxu0 }
 0x529   : > { %4187 = vmatmul.mubr.msk.bf16.vlgmr.msra.gmra.mxu1 %vm3573_vm3, %v3541_v19 }
 0x5e9   : > { %v3611_v8 = vpop.f32.mrf.mxu1 }
 0x5ea   : > { %v3612_v46 = vadd.f32 %v4018_v10, %v3611_v8 }
 0x5eb   : > { %v4188_v23 = vpop.f32.mrf.mxu1 }
 0x5ec   : > { %v3618_v55 = vsel %vm3617_vm4, %v3612_v46, -inf }
 0x5ed   : > { %3619 = vmax.xlane.f32.xlu0 %v3618_v55  ;;  %v3614_v39 = vpop.f32.mrf.mxu1 }
 0x5ef   : > { %v4189_v56 = vpop.f32.mrf.mxu1 }
 0x676   : > { %v3620_v42 = vpop.xlane.xlu0 %3619 }
 0x677   : > { %v3621_v44 = vsub.f32 %v3612_v46, %v3620_v42 }
 0x679   : > { %v3622_v5 = vmul.f32 1.442695, %v3621_v44 }
 0x67b   : > { %4419 = vpow2.f32 %v3622_v5 }
 0x688   : > { %v4420_v2 = vpop.eup %4419 }
 0x689   : > { %v3624_v33 = vsel %vm3617_vm4, %v4420_v2, 0.0 }
 0x68a   : > { %3625 = vadd.xlane.f32.xlu0 %v3624_v33 }
 0x713   : > { %v3626_v28 = vpop.xlane.xlu0 %3625 }
 0x714   : > { %4421 = vlog2.f32 %v3626_v28 }
 0x721   : > { %v4422_v59 = vpop.eup %4421 }
 0x722   : > { %v3628_v58 = vmul.f32 0.6931472, %v4422_v59 }
 0x724   : > { %v3629_v24 = vadd.f32 %v3628_v58, %v3620_v42 }
 0x726   : > { %v3630_v45 = vsub.f32 %v3612_v46, %v3629_v24 }
 0x728   : > { %3631 = vst.msk [vmem:[%s379_s22] sm:$0xff] %vm3617_vm4, %v3630_v45 }
 0x729   : > { %4438 = shalt.err (!%p4435_p3)
}
 0x72a   : > { %s4439_s15 = scalar_lea.hbm %s3644_s29, 128  ;;  %s4443_s22 = scalar_lea.hbm %s6165_s11, 256 }
 0x72b   : > { %p4440_p4 = scmp.ne.s32.totalorder %s3644_s29, %s4439_s15  ;;  %p4444_p9 = scmp.lt.s32.totalorder %s3644_s29, %s6165_s11 }
 0x72c   : > { %p4445_p10 = scmp.lt.s32.totalorder %s4443_s22, %s4439_s15 }
 0x72d   : > { %p4441_p7 = pnand %p4440_p4, %p4589_p5 }
 0x72e   : > { %p4446_p11 = por %p4445_p10, %p4444_p9 }
 0x72f   : > { %p4442_p8 = pneg %p4441_p7 }
 0x731   : > { %p4447_p12 = pnand %p4446_p11, %p4442_p8 }
 0x733   : > { %4450 = shalt.err (!%p4447_p12)
}
 0x734   : > { %4195 = dma.vmem_to_hbm [thread:$0]  (%p4589_p5), %s3647_s19, 128, %s3644_s29, %s3633_s30  }
 0x735 PF: > { %p4201_p13 = scmp.ge.s32.totalorder %s4485_s20, 2  ;;  %s3658_s12 = sand.u32 1, %s4473_s17  }
 0x736   : > { %s3659_s25 = scalar_lea.sflag [#allocation7], %s3658_s12 }
 0x737   : > { %p4198_p0 = pnand %p4201_p13, %p4593_p6 }
 0x739   : > { %p4199_p1 = pneg %p4198_p0 }
 0x73b   : > { %4468 = dma.done.wait (%p4199_p1), %s3659_s25, 128  }
 0x73c   : > { %4470 = vsyncadd (%p4199_p1), %s3659_s25, 4294967168  ;;  %s6384_s13 = sld [smem:[#allocation9_spill]]  ;;  %p21_p2 = scmp.ge.s32.totalorder %s4576_s23, 4  }
 0x73d   : > { %s6385_s19 = sld [smem:[#allocation10_spill]]  ;;  %s6386_s17 = smov %s4477_s18 }
 0x73e   : > { %s6388_s20 = smov %s4576_s23  ;;  %23 = sbr.rel (!%p21_p2) target bundleno = 3 (0x3), region = 157 }
 0x742   : > { %s6387_s18 = smov %s6384_s13 }
 0x743   :  { %3664 = vsyncpa [#allocation7], 1 }
 0x744   :  { %3666 = vsyncpa [#allocation7 + $0x1], 1 }

</bundles_post_ra>
